<compile_context>
chip_gen: v5e
topology: v5e:2x2
jax: 0.10.0
libtpu: 0.0.40
codegen_flags: <defaults>
</compile_context>

<pallas_src>
import functools

import jax
import jax.numpy as jnp
from jax import lax
from jax.experimental import pallas as pl
from jax.experimental.pallas import tpu as pltpu

# Configuration mirroring TwoSpeciesSystem_Diab(n_states_1=2, n_states_2=2)
N_STATES_1 = 2
N_STATES_2 = 2
N_STATES_T = N_STATES_1 + N_STATES_2
N_PAIRS = N_STATES_T * (N_STATES_T - 1) // 2
N_FEATS = N_STATES_T + N_PAIRS            # diag entries + upper-triangle couplings

N_JACOBI_SWEEPS = 4                        # was 6; 4 sweeps fully converge a 4x4
LANES = 128                                # lane (fast) dimension = batch
CHUNK_ROWS = 16                            # sublanes per inner chunk (2 f32 vregs)
ROWS_PER_BLOCK = 256                       # max rows of 128 batch elems per grid step
MIN_GRID_STEPS = 8                         # keep grid sharded across TCs (v7x)
TINY = 1e-18                               # tiny^2 stays in f32 normal range


def _cdiv(a, b):
    return -(-a // b)


def _sort_ascending(vals):
    """Elementwise compare/swap sorting network (ascending)."""
    vals = list(vals)
    n = len(vals)

    def cswap(i, j):
        lo = jnp.minimum(vals[i], vals[j])
        hi = jnp.maximum(vals[i], vals[j])
        vals[i], vals[j] = lo, hi

    if n == 4:
        # Optimal 5-comparator network for n = 4.
        for (i, j) in ((0, 1), (2, 3), (0, 2), (1, 3), (1, 2)):
            cswap(i, j)
    else:
        for i in range(n):
            for j in range(n - 1 - i):
                cswap(j, j + 1)
    return vals


def _jacobi_sorted_eigvals(h, consts):
    """Batched cyclic Jacobi on a dict (i,j)->(CHUNK_ROWS,128) f32 slab."""
    zeros = consts["zeros"]
    ones = consts["ones"]
    neg_ones = consts["neg_ones"]
    half = consts["half"]
    tiny = consts["tiny"]
    n = N_STATES_T
    for _ in range(N_JACOBI_SWEEPS):
        for p in range(n):
            for q in range(p + 1, n):
                app = h[(p, p)]
                aqq = h[(q, q)]
                apq = h[(p, q)]
                d = aqq - app
                apq_x2 = apq + apq                    # 2*apq (no const splat)
                four_apq2 = apq_x2 * apq_x2           # 4*apq^2
                r = jnp.sqrt(d * d + four_apq2)       # EUP
                sgn = jnp.where(d >= zeros, ones, neg_ones)
                # tiny only matters when |d| + r == 0 (zero 2x2 block /
                # zero-padded lanes): then c -> 1, s -> 0 (identity rotation).
                u = jnp.abs(d) + r + tiny
                inv = lax.rsqrt(u * u + four_apq2)    # EUP
                c = u * inv
                s = (apq_x2 * sgn) * inv
                tr = app + aqq
                srn = sgn * r
                # Trace-preserving diagonal update: exact 2x2 eigenvalues.
                h[(p, p)] = half * (tr - srn)
                h[(q, q)] = half * (tr + srn)
                h[(p, q)] = zeros
                h[(q, p)] = zeros
                # Off-diagonal rotation (each (k,p)/(k,q) read exactly once,
                # so in-place dict mutation is safe).
                for k in range(n):
                    if k == p or k == q:
                        continue
                    akp = h[(k, p)]
                    akq = h[(k, q)]
                    nkp = c * akp - s * akq
                    nkq = s * akp + c * akq
                    h[(k, p)] = nkp
                    h[(p, k)] = nkp
                    h[(k, q)] = nkq
                    h[(q, k)] = nkq
    diag = [h[(i, i)] for i in range(n)]
    return _sort_ascending(diag)


def _diab_eigvals_kernel(x_ref, o_ref, *, n_chunks):
    # x_ref: (N_FEATS, rows_blk, 128)  rows 0..n_t-1: diag = cat(E1, E2),
    #                                  rows n_t..   : couplings in (i, j>i) order.
    # o_ref: (N_STATES_T, rows_blk, 128) ascending eigenvalues.
    shape = (CHUNK_ROWS, LANES)
    # Constant splats hoisted once per grid step (JAX does not CSE them).
    consts = dict(
        zeros=jnp.zeros(shape, jnp.float32),
        ones=jnp.full(shape, 1.0, jnp.float32),
        neg_ones=jnp.full(shape, -1.0, jnp.float32),
        half=jnp.full(shape, 0.5, jnp.float32),
        tiny=jnp.full(shape, TINY, jnp.float32),
    )

    def process(rsl):
        h = {}
        for i in range(N_STATES_T):
            h[(i, i)] = x_ref[i, rsl, :]
        feat = N_STATES_T
        for i in range(N_STATES_T):
            for j in range(i + 1, N_STATES_T):
                cij = x_ref[feat, rsl, :]
                feat += 1
                h[(i, j)] = cij
                h[(j, i)] = cij               # UPLO='U': mirror upper triangle
        ev = _jacobi_sorted_eigvals(h, consts)
        for i in range(N_STATES_T):
            o_ref[i, rsl, :] = ev[i]

    if n_chunks == 1:
        process(slice(0, CHUNK_ROWS))          # static slice, no loop overhead
    else:
        # fori_loop (not a Python unroll) bounds the live vreg set per chunk.
        def body(cidx, carry):
            r0 = pl.multiple_of(cidx * CHUNK_ROWS, CHUNK_ROWS)
            process(pl.ds(r0, CHUNK_ROWS))
            return carry

        lax.fori_loop(0, n_chunks, body, 0)


def diab_eigenvalues(E1, E2, C):
    """E1: (B, n1), E2: (B, n2), C: (B, n_pairs) -> eigenvalues (B, n_total)."""
    B = E1.shape[0]
    assert E1.shape[1] == N_STATES_1
    assert E2.shape[1] == N_STATES_2
    assert C.shape[1] == N_PAIRS

    # Single concat + single transpose (one relayout, one kernel input).
    x = jnp.concatenate([E1, E2, C], axis=1).astype(jnp.float32)   # (B, 10)
    xt = jnp.transpose(x)                                          # (10, B)

    rows = _cdiv(B, LANES)
    rows_c = _cdiv(rows, CHUNK_ROWS) * CHUNK_ROWS
    # Big blocks to amortize per-step overhead, but keep >= MIN_GRID_STEPS
    # grid steps when there is enough work so both v7x TensorCores get work.
    target_blk = max(CHUNK_ROWS,
                     _cdiv(rows_c, MIN_GRID_STEPS * CHUNK_ROWS) * CHUNK_ROWS)
    rows_blk = min(ROWS_PER_BLOCK, target_blk)
    rows_pad = _cdiv(rows_c, rows_blk) * rows_blk
    b_pad = rows_pad * LANES
    if b_pad != B:
        # Zero padding is safe: zero matrix -> identity rotations -> eigvals 0.
        xt = jnp.pad(xt, ((0, 0), (0, b_pad - B)))
    xr = xt.reshape(N_FEATS, rows_pad, LANES)

    n_chunks = rows_blk // CHUNK_ROWS
    kernel = functools.partial(_diab_eigvals_kernel, n_chunks=n_chunks)

    out = pl.pallas_call(
        kernel,
        out_shape=jax.ShapeDtypeStruct((N_STATES_T, rows_pad, LANES), jnp.float32),
        grid=(rows_pad // rows_blk,),
        in_specs=[
            pl.BlockSpec((N_FEATS, rows_blk, LANES), lambda b: (0, b, 0)),
        ],
        out_specs=pl.BlockSpec((N_STATES_T, rows_blk, LANES), lambda b: (0, b, 0)),
        # TODO(synk): on v7x, pltpu.CORE_PARALLEL on this axis explicitly shards
        # across the 2 TensorCores; kept portable "parallel" here.
        compiler_params=pltpu.CompilerParams(
            dimension_semantics=("parallel",)),
    )(xr)

    out = out.reshape(N_STATES_T, b_pad)[:, :B]
    return jnp.transpose(out)  # (B, n_total)


def two_species_system_diab_forward(inputs):
    """Mirror of TwoSpeciesSystem_Diab.forward (energy output only; the module's
    calc_forces/calc_stress flags only register derivative names, no compute)."""
    E1 = inputs["energy_1"]
    E2 = inputs["energy_2"]
    C = inputs["couplings"]
    out = dict(inputs)
    out["energy"] = diab_eigenvalues(E1, E2, C)
    return out


def _reference_eigenvalues(E1, E2, C):
    # Pure-JAX reference reproducing the torch construction.
    diag = jnp.concatenate([E1, E2], axis=1)
    H = jax.vmap(jnp.diag)(diag)
    it = -1
    for i in range(N_STATES_T):
        for j in range(i + 1, N_STATES_T):
            it += 1
            H = H.at[:, i, j].set(C[:, it])
            H = H.at[:, j, i].set(C[:, it])  # UPLO='U': mirror upper triangle
    return jnp.linalg.eigvalsh(H)


if __name__ == "__main__":
    key = jax.random.PRNGKey(0)
    k1, k2, k3 = jax.random.split(key, 3)
    B = 200  # deliberately NOT a multiple of 128 to exercise the padding path
    E1 = jax.random.normal(k1, (B, N_STATES_1), jnp.float32)
    E2 = jax.random.normal(k2, (B, N_STATES_2), jnp.float32) + 2.0
    C = 0.1 * jax.random.normal(k3, (B, N_PAIRS), jnp.float32)

    inputs = {"energy_1": E1, "energy_2": E2, "couplings": C}
    out = two_species_system_diab_forward(inputs)
    eig = jax.block_until_ready(out["energy"])

    ref = _reference_eigenvalues(E1, E2, C)
    assert eig.shape == (B, N_STATES_T)
    max_err = float(jnp.max(jnp.abs(eig - ref)))
    assert jnp.allclose(eig, ref, atol=5e-3, rtol=5e-3), max_err
    print("KERNEL_OK")
</pallas_src>

<mosaic_0001>
module attributes {stable_mosaic.version = 11 : i64} {
  func.func @_diab_eigvals_kernel(%arg0: i32, %arg1: memref<10x16x128xf32, #tpu.memory_space<vmem>>, %arg2: memref<4x16x128xf32, #tpu.memory_space<vmem>>) attributes {dimension_semantics = [#tpu.dimension_semantics<parallel>], iteration_bounds = array<i64: 1>, scalar_prefetch = 0 : i64, scratch_operands = 0 : i64, tpu.core_type = #tpu.core_type<tc>, window_params = [{transform_indices = @transform_0, window_bounds = array<i64: 10, 16, 128>}, {transform_indices = @transform_1, window_bounds = array<i64: 4, 16, 128>}]} {
    %cst = arith.constant 0.000000e+00 : f32
    %0 = vector.broadcast %cst : f32 to vector<16x128xf32>
    %cst_0 = arith.constant 1.000000e+00 : f32
    %1 = vector.broadcast %cst_0 : f32 to vector<16x128xf32>
    %cst_1 = arith.constant -1.000000e+00 : f32
    %2 = vector.broadcast %cst_1 : f32 to vector<16x128xf32>
    %cst_2 = arith.constant 5.000000e-01 : f32
    %3 = vector.broadcast %cst_2 : f32 to vector<16x128xf32>
    %cst_3 = arith.constant 1.000000e-18 : f32
    %4 = vector.broadcast %cst_3 : f32 to vector<16x128xf32>
    %c0 = arith.constant 0 : index
    %c0_4 = arith.constant 0 : index
    %c0_5 = arith.constant 0 : index
    %5 = vector.load %arg1[%c0, %c0_4, %c0_5] : memref<10x16x128xf32, #tpu.memory_space<vmem>>, vector<1x16x128xf32>
    %6 = vector.shape_cast %5 : vector<1x16x128xf32> to vector<16x128xf32>
    %c1 = arith.constant 1 : index
    %c0_6 = arith.constant 0 : index
    %c0_7 = arith.constant 0 : index
    %7 = vector.load %arg1[%c1, %c0_6, %c0_7] : memref<10x16x128xf32, #tpu.memory_space<vmem>>, vector<1x16x128xf32>
    %8 = vector.shape_cast %7 : vector<1x16x128xf32> to vector<16x128xf32>
    %c2 = arith.constant 2 : index
    %c0_8 = arith.constant 0 : index
    %c0_9 = arith.constant 0 : index
    %9 = vector.load %arg1[%c2, %c0_8, %c0_9] : memref<10x16x128xf32, #tpu.memory_space<vmem>>, vector<1x16x128xf32>
    %10 = vector.shape_cast %9 : vector<1x16x128xf32> to vector<16x128xf32>
    %c3 = arith.constant 3 : index
    %c0_10 = arith.constant 0 : index
    %c0_11 = arith.constant 0 : index
    %11 = vector.load %arg1[%c3, %c0_10, %c0_11] : memref<10x16x128xf32, #tpu.memory_space<vmem>>, vector<1x16x128xf32>
    %12 = vector.shape_cast %11 : vector<1x16x128xf32> to vector<16x128xf32>
    %c4 = arith.constant 4 : index
    %c0_12 = arith.constant 0 : index
    %c0_13 = arith.constant 0 : index
    %13 = vector.load %arg1[%c4, %c0_12, %c0_13] : memref<10x16x128xf32, #tpu.memory_space<vmem>>, vector<1x16x128xf32>
    %14 = vector.shape_cast %13 : vector<1x16x128xf32> to vector<16x128xf32>
    %c5 = arith.constant 5 : index
    %c0_14 = arith.constant 0 : index
    %c0_15 = arith.constant 0 : index
    %15 = vector.load %arg1[%c5, %c0_14, %c0_15] : memref<10x16x128xf32, #tpu.memory_space<vmem>>, vector<1x16x128xf32>
    %16 = vector.shape_cast %15 : vector<1x16x128xf32> to vector<16x128xf32>
    %c6 = arith.constant 6 : index
    %c0_16 = arith.constant 0 : index
    %c0_17 = arith.constant 0 : index
    %17 = vector.load %arg1[%c6, %c0_16, %c0_17] : memref<10x16x128xf32, #tpu.memory_space<vmem>>, vector<1x16x128xf32>
    %18 = vector.shape_cast %17 : vector<1x16x128xf32> to vector<16x128xf32>
    %c7 = arith.constant 7 : index
    %c0_18 = arith.constant 0 : index
    %c0_19 = arith.constant 0 : index
    %19 = vector.load %arg1[%c7, %c0_18, %c0_19] : memref<10x16x128xf32, #tpu.memory_space<vmem>>, vector<1x16x128xf32>
    %20 = vector.shape_cast %19 : vector<1x16x128xf32> to vector<16x128xf32>
    %c8 = arith.constant 8 : index
    %c0_20 = arith.constant 0 : index
    %c0_21 = arith.constant 0 : index
    %21 = vector.load %arg1[%c8, %c0_20, %c0_21] : memref<10x16x128xf32, #tpu.memory_space<vmem>>, vector<1x16x128xf32>
    %22 = vector.shape_cast %21 : vector<1x16x128xf32> to vector<16x128xf32>
    %c9 = arith.constant 9 : index
    %c0_22 = arith.constant 0 : index
    %c0_23 = arith.constant 0 : index
    %23 = vector.load %arg1[%c9, %c0_22, %c0_23] : memref<10x16x128xf32, #tpu.memory_space<vmem>>, vector<1x16x128xf32>
    %24 = vector.shape_cast %23 : vector<1x16x128xf32> to vector<16x128xf32>
    %25 = arith.subf %8, %6 : vector<16x128xf32>
    %26 = arith.addf %14, %14 : vector<16x128xf32>
    %27 = arith.mulf %26, %26 : vector<16x128xf32>
    %28 = arith.mulf %25, %25 : vector<16x128xf32>
    %29 = arith.addf %28, %27 : vector<16x128xf32>
    %30 = math.sqrt %29 : vector<16x128xf32>
    %31 = arith.cmpf oge, %25, %0 : vector<16x128xf32>
    %32 = arith.select %31, %1, %2 : vector<16x128xi1>, vector<16x128xf32>
    %33 = math.absf %25 : vector<16x128xf32>
    %34 = arith.addf %33, %30 : vector<16x128xf32>
    %35 = arith.addf %34, %4 : vector<16x128xf32>
    %36 = arith.mulf %35, %35 : vector<16x128xf32>
    %37 = arith.addf %36, %27 : vector<16x128xf32>
    %38 = math.rsqrt %37 : vector<16x128xf32>
    %39 = arith.mulf %35, %38 : vector<16x128xf32>
    %40 = arith.mulf %26, %32 : vector<16x128xf32>
    %41 = arith.mulf %40, %38 : vector<16x128xf32>
    %42 = arith.addf %6, %8 : vector<16x128xf32>
    %43 = arith.mulf %32, %30 : vector<16x128xf32>
    %44 = arith.subf %42, %43 : vector<16x128xf32>
    %45 = arith.mulf %3, %44 : vector<16x128xf32>
    %46 = arith.addf %42, %43 : vector<16x128xf32>
    %47 = arith.mulf %3, %46 : vector<16x128xf32>
    %48 = arith.mulf %39, %16 : vector<16x128xf32>
    %49 = arith.mulf %41, %20 : vector<16x128xf32>
    %50 = arith.subf %48, %49 : vector<16x128xf32>
    %51 = arith.mulf %41, %16 : vector<16x128xf32>
    %52 = arith.mulf %39, %20 : vector<16x128xf32>
    %53 = arith.addf %51, %52 : vector<16x128xf32>
    %54 = arith.mulf %39, %18 : vector<16x128xf32>
    %55 = arith.mulf %41, %22 : vector<16x128xf32>
    %56 = arith.subf %54, %55 : vector<16x128xf32>
    %57 = arith.mulf %41, %18 : vector<16x128xf32>
    %58 = arith.mulf %39, %22 : vector<16x128xf32>
    %59 = arith.addf %57, %58 : vector<16x128xf32>
    %60 = arith.subf %10, %45 : vector<16x128xf32>
    %61 = arith.addf %50, %50 : vector<16x128xf32>
    %62 = arith.mulf %61, %61 : vector<16x128xf32>
    %63 = arith.mulf %60, %60 : vector<16x128xf32>
    %64 = arith.addf %63, %62 : vector<16x128xf32>
    %65 = math.sqrt %64 : vector<16x128xf32>
    %66 = arith.cmpf oge, %60, %0 : vector<16x128xf32>
    %67 = arith.select %66, %1, %2 : vector<16x128xi1>, vector<16x128xf32>
    %68 = math.absf %60 : vector<16x128xf32>
    %69 = arith.addf %68, %65 : vector<16x128xf32>
    %70 = arith.addf %69, %4 : vector<16x128xf32>
    %71 = arith.mulf %70, %70 : vector<16x128xf32>
    %72 = arith.addf %71, %62 : vector<16x128xf32>
    %73 = math.rsqrt %72 : vector<16x128xf32>
    %74 = arith.mulf %70, %73 : vector<16x128xf32>
    %75 = arith.mulf %61, %67 : vector<16x128xf32>
    %76 = arith.mulf %75, %73 : vector<16x128xf32>
    %77 = arith.addf %45, %10 : vector<16x128xf32>
    %78 = arith.mulf %67, %65 : vector<16x128xf32>
    %79 = arith.subf %77, %78 : vector<16x128xf32>
    %80 = arith.mulf %3, %79 : vector<16x128xf32>
    %81 = arith.addf %77, %78 : vector<16x128xf32>
    %82 = arith.mulf %3, %81 : vector<16x128xf32>
    %83 = arith.mulf %74, %0 : vector<16x128xf32>
    %84 = arith.mulf %76, %53 : vector<16x128xf32>
    %85 = arith.subf %83, %84 : vector<16x128xf32>
    %86 = arith.mulf %76, %0 : vector<16x128xf32>
    %87 = arith.mulf %74, %53 : vector<16x128xf32>
    %88 = arith.addf %86, %87 : vector<16x128xf32>
    %89 = arith.mulf %74, %56 : vector<16x128xf32>
    %90 = arith.mulf %76, %24 : vector<16x128xf32>
    %91 = arith.subf %89, %90 : vector<16x128xf32>
    %92 = arith.mulf %76, %56 : vector<16x128xf32>
    %93 = arith.mulf %74, %24 : vector<16x128xf32>
    %94 = arith.addf %92, %93 : vector<16x128xf32>
    %95 = arith.subf %12, %80 : vector<16x128xf32>
    %96 = arith.addf %91, %91 : vector<16x128xf32>
    %97 = arith.mulf %96, %96 : vector<16x128xf32>
    %98 = arith.mulf %95, %95 : vector<16x128xf32>
    %99 = arith.addf %98, %97 : vector<16x128xf32>
    %100 = math.sqrt %99 : vector<16x128xf32>
    %101 = arith.cmpf oge, %95, %0 : vector<16x128xf32>
    %102 = arith.select %101, %1, %2 : vector<16x128xi1>, vector<16x128xf32>
    %103 = math.absf %95 : vector<16x128xf32>
    %104 = arith.addf %103, %100 : vector<16x128xf32>
    %105 = arith.addf %104, %4 : vector<16x128xf32>
    %106 = arith.mulf %105, %105 : vector<16x128xf32>
    %107 = arith.addf %106, %97 : vector<16x128xf32>
    %108 = math.rsqrt %107 : vector<16x128xf32>
    %109 = arith.mulf %105, %108 : vector<16x128xf32>
    %110 = arith.mulf %96, %102 : vector<16x128xf32>
    %111 = arith.mulf %110, %108 : vector<16x128xf32>
    %112 = arith.addf %80, %12 : vector<16x128xf32>
    %113 = arith.mulf %102, %100 : vector<16x128xf32>
    %114 = arith.subf %112, %113 : vector<16x128xf32>
    %115 = arith.mulf %3, %114 : vector<16x128xf32>
    %116 = arith.addf %112, %113 : vector<16x128xf32>
    %117 = arith.mulf %3, %116 : vector<16x128xf32>
    %118 = arith.mulf %109, %85 : vector<16x128xf32>
    %119 = arith.mulf %111, %59 : vector<16x128xf32>
    %120 = arith.subf %118, %119 : vector<16x128xf32>
    %121 = arith.mulf %111, %85 : vector<16x128xf32>
    %122 = arith.mulf %109, %59 : vector<16x128xf32>
    %123 = arith.addf %121, %122 : vector<16x128xf32>
    %124 = arith.mulf %109, %0 : vector<16x128xf32>
    %125 = arith.mulf %111, %94 : vector<16x128xf32>
    %126 = arith.subf %124, %125 : vector<16x128xf32>
    %127 = arith.mulf %111, %0 : vector<16x128xf32>
    %128 = arith.mulf %109, %94 : vector<16x128xf32>
    %129 = arith.addf %127, %128 : vector<16x128xf32>
    %130 = arith.subf %82, %47 : vector<16x128xf32>
    %131 = arith.addf %88, %88 : vector<16x128xf32>
    %132 = arith.mulf %131, %131 : vector<16x128xf32>
    %133 = arith.mulf %130, %130 : vector<16x128xf32>
    %134 = arith.addf %133, %132 : vector<16x128xf32>
    %135 = math.sqrt %134 : vector<16x128xf32>
    %136 = arith.cmpf oge, %130, %0 : vector<16x128xf32>
    %137 = arith.select %136, %1, %2 : vector<16x128xi1>, vector<16x128xf32>
    %138 = math.absf %130 : vector<16x128xf32>
    %139 = arith.addf %138, %135 : vector<16x128xf32>
    %140 = arith.addf %139, %4 : vector<16x128xf32>
    %141 = arith.mulf %140, %140 : vector<16x128xf32>
    %142 = arith.addf %141, %132 : vector<16x128xf32>
    %143 = math.rsqrt %142 : vector<16x128xf32>
    %144 = arith.mulf %140, %143 : vector<16x128xf32>
    %145 = arith.mulf %131, %137 : vector<16x128xf32>
    %146 = arith.mulf %145, %143 : vector<16x128xf32>
    %147 = arith.addf %47, %82 : vector<16x128xf32>
    %148 = arith.mulf %137, %135 : vector<16x128xf32>
    %149 = arith.subf %147, %148 : vector<16x128xf32>
    %150 = arith.mulf %3, %149 : vector<16x128xf32>
    %151 = arith.addf %147, %148 : vector<16x128xf32>
    %152 = arith.mulf %3, %151 : vector<16x128xf32>
    %153 = arith.mulf %144, %120 : vector<16x128xf32>
    %154 = arith.mulf %146, %126 : vector<16x128xf32>
    %155 = arith.subf %153, %154 : vector<16x128xf32>
    %156 = arith.mulf %146, %120 : vector<16x128xf32>
    %157 = arith.mulf %144, %126 : vector<16x128xf32>
    %158 = arith.addf %156, %157 : vector<16x128xf32>
    %159 = arith.mulf %144, %123 : vector<16x128xf32>
    %160 = arith.mulf %146, %129 : vector<16x128xf32>
    %161 = arith.subf %159, %160 : vector<16x128xf32>
    %162 = arith.mulf %146, %123 : vector<16x128xf32>
    %163 = arith.mulf %144, %129 : vector<16x128xf32>
    %164 = arith.addf %162, %163 : vector<16x128xf32>
    %165 = arith.subf %117, %150 : vector<16x128xf32>
    %166 = arith.addf %161, %161 : vector<16x128xf32>
    %167 = arith.mulf %166, %166 : vector<16x128xf32>
    %168 = arith.mulf %165, %165 : vector<16x128xf32>
    %169 = arith.addf %168, %167 : vector<16x128xf32>
    %170 = math.sqrt %169 : vector<16x128xf32>
    %171 = arith.cmpf oge, %165, %0 : vector<16x128xf32>
    %172 = arith.select %171, %1, %2 : vector<16x128xi1>, vector<16x128xf32>
    %173 = math.absf %165 : vector<16x128xf32>
    %174 = arith.addf %173, %170 : vector<16x128xf32>
    %175 = arith.addf %174, %4 : vector<16x128xf32>
    %176 = arith.mulf %175, %175 : vector<16x128xf32>
    %177 = arith.addf %176, %167 : vector<16x128xf32>
    %178 = math.rsqrt %177 : vector<16x128xf32>
    %179 = arith.mulf %175, %178 : vector<16x128xf32>
    %180 = arith.mulf %166, %172 : vector<16x128xf32>
    %181 = arith.mulf %180, %178 : vector<16x128xf32>
    %182 = arith.addf %150, %117 : vector<16x128xf32>
    %183 = arith.mulf %172, %170 : vector<16x128xf32>
    %184 = arith.subf %182, %183 : vector<16x128xf32>
    %185 = arith.mulf %3, %184 : vector<16x128xf32>
    %186 = arith.addf %182, %183 : vector<16x128xf32>
    %187 = arith.mulf %3, %186 : vector<16x128xf32>
    %188 = arith.mulf %179, %155 : vector<16x128xf32>
    %189 = arith.mulf %181, %0 : vector<16x128xf32>
    %190 = arith.subf %188, %189 : vector<16x128xf32>
    %191 = arith.mulf %181, %155 : vector<16x128xf32>
    %192 = arith.mulf %179, %0 : vector<16x128xf32>
    %193 = arith.addf %191, %192 : vector<16x128xf32>
    %194 = arith.mulf %179, %0 : vector<16x128xf32>
    %195 = arith.mulf %181, %164 : vector<16x128xf32>
    %196 = arith.subf %194, %195 : vector<16x128xf32>
    %197 = arith.mulf %181, %0 : vector<16x128xf32>
    %198 = arith.mulf %179, %164 : vector<16x128xf32>
    %199 = arith.addf %197, %198 : vector<16x128xf32>
    %200 = arith.subf %187, %152 : vector<16x128xf32>
    %201 = arith.addf %199, %199 : vector<16x128xf32>
    %202 = arith.mulf %201, %201 : vector<16x128xf32>
    %203 = arith.mulf %200, %200 : vector<16x128xf32>
    %204 = arith.addf %203, %202 : vector<16x128xf32>
    %205 = math.sqrt %204 : vector<16x128xf32>
    %206 = arith.cmpf oge, %200, %0 : vector<16x128xf32>
    %207 = arith.select %206, %1, %2 : vector<16x128xi1>, vector<16x128xf32>
    %208 = math.absf %200 : vector<16x128xf32>
    %209 = arith.addf %208, %205 : vector<16x128xf32>
    %210 = arith.addf %209, %4 : vector<16x128xf32>
    %211 = arith.mulf %210, %210 : vector<16x128xf32>
    %212 = arith.addf %211, %202 : vector<16x128xf32>
    %213 = math.rsqrt %212 : vector<16x128xf32>
    %214 = arith.mulf %210, %213 : vector<16x128xf32>
    %215 = arith.mulf %201, %207 : vector<16x128xf32>
    %216 = arith.mulf %215, %213 : vector<16x128xf32>
    %217 = arith.addf %152, %187 : vector<16x128xf32>
    %218 = arith.mulf %207, %205 : vector<16x128xf32>
    %219 = arith.subf %217, %218 : vector<16x128xf32>
    %220 = arith.mulf %3, %219 : vector<16x128xf32>
    %221 = arith.addf %217, %218 : vector<16x128xf32>
    %222 = arith.mulf %3, %221 : vector<16x128xf32>
    %223 = arith.mulf %214, %158 : vector<16x128xf32>
    %224 = arith.mulf %216, %193 : vector<16x128xf32>
    %225 = arith.subf %223, %224 : vector<16x128xf32>
    %226 = arith.mulf %216, %158 : vector<16x128xf32>
    %227 = arith.mulf %214, %193 : vector<16x128xf32>
    %228 = arith.addf %226, %227 : vector<16x128xf32>
    %229 = arith.mulf %214, %196 : vector<16x128xf32>
    %230 = arith.mulf %216, %0 : vector<16x128xf32>
    %231 = arith.subf %229, %230 : vector<16x128xf32>
    %232 = arith.mulf %216, %196 : vector<16x128xf32>
    %233 = arith.mulf %214, %0 : vector<16x128xf32>
    %234 = arith.addf %232, %233 : vector<16x128xf32>
    %235 = arith.subf %185, %115 : vector<16x128xf32>
    %236 = arith.addf %190, %190 : vector<16x128xf32>
    %237 = arith.mulf %236, %236 : vector<16x128xf32>
    %238 = arith.mulf %235, %235 : vector<16x128xf32>
    %239 = arith.addf %238, %237 : vector<16x128xf32>
    %240 = math.sqrt %239 : vector<16x128xf32>
    %241 = arith.cmpf oge, %235, %0 : vector<16x128xf32>
    %242 = arith.select %241, %1, %2 : vector<16x128xi1>, vector<16x128xf32>
    %243 = math.absf %235 : vector<16x128xf32>
    %244 = arith.addf %243, %240 : vector<16x128xf32>
    %245 = arith.addf %244, %4 : vector<16x128xf32>
    %246 = arith.mulf %245, %245 : vector<16x128xf32>
    %247 = arith.addf %246, %237 : vector<16x128xf32>
    %248 = math.rsqrt %247 : vector<16x128xf32>
    %249 = arith.mulf %245, %248 : vector<16x128xf32>
    %250 = arith.mulf %236, %242 : vector<16x128xf32>
    %251 = arith.mulf %250, %248 : vector<16x128xf32>
    %252 = arith.addf %115, %185 : vector<16x128xf32>
    %253 = arith.mulf %242, %240 : vector<16x128xf32>
    %254 = arith.subf %252, %253 : vector<16x128xf32>
    %255 = arith.mulf %3, %254 : vector<16x128xf32>
    %256 = arith.addf %252, %253 : vector<16x128xf32>
    %257 = arith.mulf %3, %256 : vector<16x128xf32>
    %258 = arith.mulf %249, %225 : vector<16x128xf32>
    %259 = arith.mulf %251, %231 : vector<16x128xf32>
    %260 = arith.subf %258, %259 : vector<16x128xf32>
    %261 = arith.mulf %251, %225 : vector<16x128xf32>
    %262 = arith.mulf %249, %231 : vector<16x128xf32>
    %263 = arith.addf %261, %262 : vector<16x128xf32>
    %264 = arith.mulf %249, %228 : vector<16x128xf32>
    %265 = arith.mulf %251, %234 : vector<16x128xf32>
    %266 = arith.subf %264, %265 : vector<16x128xf32>
    %267 = arith.mulf %251, %228 : vector<16x128xf32>
    %268 = arith.mulf %249, %234 : vector<16x128xf32>
    %269 = arith.addf %267, %268 : vector<16x128xf32>
    %270 = arith.subf %220, %255 : vector<16x128xf32>
    %271 = arith.addf %260, %260 : vector<16x128xf32>
    %272 = arith.mulf %271, %271 : vector<16x128xf32>
    %273 = arith.mulf %270, %270 : vector<16x128xf32>
    %274 = arith.addf %273, %272 : vector<16x128xf32>
    %275 = math.sqrt %274 : vector<16x128xf32>
    %276 = arith.cmpf oge, %270, %0 : vector<16x128xf32>
    %277 = arith.select %276, %1, %2 : vector<16x128xi1>, vector<16x128xf32>
    %278 = math.absf %270 : vector<16x128xf32>
    %279 = arith.addf %278, %275 : vector<16x128xf32>
    %280 = arith.addf %279, %4 : vector<16x128xf32>
    %281 = arith.mulf %280, %280 : vector<16x128xf32>
    %282 = arith.addf %281, %272 : vector<16x128xf32>
    %283 = math.rsqrt %282 : vector<16x128xf32>
    %284 = arith.mulf %280, %283 : vector<16x128xf32>
    %285 = arith.mulf %271, %277 : vector<16x128xf32>
    %286 = arith.mulf %285, %283 : vector<16x128xf32>
    %287 = arith.addf %255, %220 : vector<16x128xf32>
    %288 = arith.mulf %277, %275 : vector<16x128xf32>
    %289 = arith.subf %287, %288 : vector<16x128xf32>
    %290 = arith.mulf %3, %289 : vector<16x128xf32>
    %291 = arith.addf %287, %288 : vector<16x128xf32>
    %292 = arith.mulf %3, %291 : vector<16x128xf32>
    %293 = arith.mulf %284, %0 : vector<16x128xf32>
    %294 = arith.mulf %286, %263 : vector<16x128xf32>
    %295 = arith.subf %293, %294 : vector<16x128xf32>
    %296 = arith.mulf %286, %0 : vector<16x128xf32>
    %297 = arith.mulf %284, %263 : vector<16x128xf32>
    %298 = arith.addf %296, %297 : vector<16x128xf32>
    %299 = arith.mulf %284, %266 : vector<16x128xf32>
    %300 = arith.mulf %286, %0 : vector<16x128xf32>
    %301 = arith.subf %299, %300 : vector<16x128xf32>
    %302 = arith.mulf %286, %266 : vector<16x128xf32>
    %303 = arith.mulf %284, %0 : vector<16x128xf32>
    %304 = arith.addf %302, %303 : vector<16x128xf32>
    %305 = arith.subf %222, %290 : vector<16x128xf32>
    %306 = arith.addf %301, %301 : vector<16x128xf32>
    %307 = arith.mulf %306, %306 : vector<16x128xf32>
    %308 = arith.mulf %305, %305 : vector<16x128xf32>
    %309 = arith.addf %308, %307 : vector<16x128xf32>
    %310 = math.sqrt %309 : vector<16x128xf32>
    %311 = arith.cmpf oge, %305, %0 : vector<16x128xf32>
    %312 = arith.select %311, %1, %2 : vector<16x128xi1>, vector<16x128xf32>
    %313 = math.absf %305 : vector<16x128xf32>
    %314 = arith.addf %313, %310 : vector<16x128xf32>
    %315 = arith.addf %314, %4 : vector<16x128xf32>
    %316 = arith.mulf %315, %315 : vector<16x128xf32>
    %317 = arith.addf %316, %307 : vector<16x128xf32>
    %318 = math.rsqrt %317 : vector<16x128xf32>
    %319 = arith.mulf %315, %318 : vector<16x128xf32>
    %320 = arith.mulf %306, %312 : vector<16x128xf32>
    %321 = arith.mulf %320, %318 : vector<16x128xf32>
    %322 = arith.addf %290, %222 : vector<16x128xf32>
    %323 = arith.mulf %312, %310 : vector<16x128xf32>
    %324 = arith.subf %322, %323 : vector<16x128xf32>
    %325 = arith.mulf %3, %324 : vector<16x128xf32>
    %326 = arith.addf %322, %323 : vector<16x128xf32>
    %327 = arith.mulf %3, %326 : vector<16x128xf32>
    %328 = arith.mulf %319, %295 : vector<16x128xf32>
    %329 = arith.mulf %321, %269 : vector<16x128xf32>
    %330 = arith.subf %328, %329 : vector<16x128xf32>
    %331 = arith.mulf %321, %295 : vector<16x128xf32>
    %332 = arith.mulf %319, %269 : vector<16x128xf32>
    %333 = arith.addf %331, %332 : vector<16x128xf32>
    %334 = arith.mulf %319, %0 : vector<16x128xf32>
    %335 = arith.mulf %321, %304 : vector<16x128xf32>
    %336 = arith.subf %334, %335 : vector<16x128xf32>
    %337 = arith.mulf %321, %0 : vector<16x128xf32>
    %338 = arith.mulf %319, %304 : vector<16x128xf32>
    %339 = arith.addf %337, %338 : vector<16x128xf32>
    %340 = arith.subf %292, %257 : vector<16x128xf32>
    %341 = arith.addf %298, %298 : vector<16x128xf32>
    %342 = arith.mulf %341, %341 : vector<16x128xf32>
    %343 = arith.mulf %340, %340 : vector<16x128xf32>
    %344 = arith.addf %343, %342 : vector<16x128xf32>
    %345 = math.sqrt %344 : vector<16x128xf32>
    %346 = arith.cmpf oge, %340, %0 : vector<16x128xf32>
    %347 = arith.select %346, %1, %2 : vector<16x128xi1>, vector<16x128xf32>
    %348 = math.absf %340 : vector<16x128xf32>
    %349 = arith.addf %348, %345 : vector<16x128xf32>
    %350 = arith.addf %349, %4 : vector<16x128xf32>
    %351 = arith.mulf %350, %350 : vector<16x128xf32>
    %352 = arith.addf %351, %342 : vector<16x128xf32>
    %353 = math.rsqrt %352 : vector<16x128xf32>
    %354 = arith.mulf %350, %353 : vector<16x128xf32>
    %355 = arith.mulf %341, %347 : vector<16x128xf32>
    %356 = arith.mulf %355, %353 : vector<16x128xf32>
    %357 = arith.addf %257, %292 : vector<16x128xf32>
    %358 = arith.mulf %347, %345 : vector<16x128xf32>
    %359 = arith.subf %357, %358 : vector<16x128xf32>
    %360 = arith.mulf %3, %359 : vector<16x128xf32>
    %361 = arith.addf %357, %358 : vector<16x128xf32>
    %362 = arith.mulf %3, %361 : vector<16x128xf32>
    %363 = arith.mulf %354, %330 : vector<16x128xf32>
    %364 = arith.mulf %356, %336 : vector<16x128xf32>
    %365 = arith.subf %363, %364 : vector<16x128xf32>
    %366 = arith.mulf %356, %330 : vector<16x128xf32>
    %367 = arith.mulf %354, %336 : vector<16x128xf32>
    %368 = arith.addf %366, %367 : vector<16x128xf32>
    %369 = arith.mulf %354, %333 : vector<16x128xf32>
    %370 = arith.mulf %356, %339 : vector<16x128xf32>
    %371 = arith.subf %369, %370 : vector<16x128xf32>
    %372 = arith.mulf %356, %333 : vector<16x128xf32>
    %373 = arith.mulf %354, %339 : vector<16x128xf32>
    %374 = arith.addf %372, %373 : vector<16x128xf32>
    %375 = arith.subf %327, %360 : vector<16x128xf32>
    %376 = arith.addf %371, %371 : vector<16x128xf32>
    %377 = arith.mulf %376, %376 : vector<16x128xf32>
    %378 = arith.mulf %375, %375 : vector<16x128xf32>
    %379 = arith.addf %378, %377 : vector<16x128xf32>
    %380 = math.sqrt %379 : vector<16x128xf32>
    %381 = arith.cmpf oge, %375, %0 : vector<16x128xf32>
    %382 = arith.select %381, %1, %2 : vector<16x128xi1>, vector<16x128xf32>
    %383 = math.absf %375 : vector<16x128xf32>
    %384 = arith.addf %383, %380 : vector<16x128xf32>
    %385 = arith.addf %384, %4 : vector<16x128xf32>
    %386 = arith.mulf %385, %385 : vector<16x128xf32>
    %387 = arith.addf %386, %377 : vector<16x128xf32>
    %388 = math.rsqrt %387 : vector<16x128xf32>
    %389 = arith.mulf %385, %388 : vector<16x128xf32>
    %390 = arith.mulf %376, %382 : vector<16x128xf32>
    %391 = arith.mulf %390, %388 : vector<16x128xf32>
    %392 = arith.addf %360, %327 : vector<16x128xf32>
    %393 = arith.mulf %382, %380 : vector<16x128xf32>
    %394 = arith.subf %392, %393 : vector<16x128xf32>
    %395 = arith.mulf %3, %394 : vector<16x128xf32>
    %396 = arith.addf %392, %393 : vector<16x128xf32>
    %397 = arith.mulf %3, %396 : vector<16x128xf32>
    %398 = arith.mulf %389, %365 : vector<16x128xf32>
    %399 = arith.mulf %391, %0 : vector<16x128xf32>
    %400 = arith.subf %398, %399 : vector<16x128xf32>
    %401 = arith.mulf %391, %365 : vector<16x128xf32>
    %402 = arith.mulf %389, %0 : vector<16x128xf32>
    %403 = arith.addf %401, %402 : vector<16x128xf32>
    %404 = arith.mulf %389, %0 : vector<16x128xf32>
    %405 = arith.mulf %391, %374 : vector<16x128xf32>
    %406 = arith.subf %404, %405 : vector<16x128xf32>
    %407 = arith.mulf %391, %0 : vector<16x128xf32>
    %408 = arith.mulf %389, %374 : vector<16x128xf32>
    %409 = arith.addf %407, %408 : vector<16x128xf32>
    %410 = arith.subf %397, %362 : vector<16x128xf32>
    %411 = arith.addf %409, %409 : vector<16x128xf32>
    %412 = arith.mulf %411, %411 : vector<16x128xf32>
    %413 = arith.mulf %410, %410 : vector<16x128xf32>
    %414 = arith.addf %413, %412 : vector<16x128xf32>
    %415 = math.sqrt %414 : vector<16x128xf32>
    %416 = arith.cmpf oge, %410, %0 : vector<16x128xf32>
    %417 = arith.select %416, %1, %2 : vector<16x128xi1>, vector<16x128xf32>
    %418 = math.absf %410 : vector<16x128xf32>
    %419 = arith.addf %418, %415 : vector<16x128xf32>
    %420 = arith.addf %419, %4 : vector<16x128xf32>
    %421 = arith.mulf %420, %420 : vector<16x128xf32>
    %422 = arith.addf %421, %412 : vector<16x128xf32>
    %423 = math.rsqrt %422 : vector<16x128xf32>
    %424 = arith.mulf %420, %423 : vector<16x128xf32>
    %425 = arith.mulf %411, %417 : vector<16x128xf32>
    %426 = arith.mulf %425, %423 : vector<16x128xf32>
    %427 = arith.addf %362, %397 : vector<16x128xf32>
    %428 = arith.mulf %417, %415 : vector<16x128xf32>
    %429 = arith.subf %427, %428 : vector<16x128xf32>
    %430 = arith.mulf %3, %429 : vector<16x128xf32>
    %431 = arith.addf %427, %428 : vector<16x128xf32>
    %432 = arith.mulf %3, %431 : vector<16x128xf32>
    %433 = arith.mulf %424, %368 : vector<16x128xf32>
    %434 = arith.mulf %426, %403 : vector<16x128xf32>
    %435 = arith.subf %433, %434 : vector<16x128xf32>
    %436 = arith.mulf %426, %368 : vector<16x128xf32>
    %437 = arith.mulf %424, %403 : vector<16x128xf32>
    %438 = arith.addf %436, %437 : vector<16x128xf32>
    %439 = arith.mulf %424, %406 : vector<16x128xf32>
    %440 = arith.mulf %426, %0 : vector<16x128xf32>
    %441 = arith.subf %439, %440 : vector<16x128xf32>
    %442 = arith.mulf %426, %406 : vector<16x128xf32>
    %443 = arith.mulf %424, %0 : vector<16x128xf32>
    %444 = arith.addf %442, %443 : vector<16x128xf32>
    %445 = arith.subf %395, %325 : vector<16x128xf32>
    %446 = arith.addf %400, %400 : vector<16x128xf32>
    %447 = arith.mulf %446, %446 : vector<16x128xf32>
    %448 = arith.mulf %445, %445 : vector<16x128xf32>
    %449 = arith.addf %448, %447 : vector<16x128xf32>
    %450 = math.sqrt %449 : vector<16x128xf32>
    %451 = arith.cmpf oge, %445, %0 : vector<16x128xf32>
    %452 = arith.select %451, %1, %2 : vector<16x128xi1>, vector<16x128xf32>
    %453 = math.absf %445 : vector<16x128xf32>
    %454 = arith.addf %453, %450 : vector<16x128xf32>
    %455 = arith.addf %454, %4 : vector<16x128xf32>
    %456 = arith.mulf %455, %455 : vector<16x128xf32>
    %457 = arith.addf %456, %447 : vector<16x128xf32>
    %458 = math.rsqrt %457 : vector<16x128xf32>
    %459 = arith.mulf %455, %458 : vector<16x128xf32>
    %460 = arith.mulf %446, %452 : vector<16x128xf32>
    %461 = arith.mulf %460, %458 : vector<16x128xf32>
    %462 = arith.addf %325, %395 : vector<16x128xf32>
    %463 = arith.mulf %452, %450 : vector<16x128xf32>
    %464 = arith.subf %462, %463 : vector<16x128xf32>
    %465 = arith.mulf %3, %464 : vector<16x128xf32>
    %466 = arith.addf %462, %463 : vector<16x128xf32>
    %467 = arith.mulf %3, %466 : vector<16x128xf32>
    %468 = arith.mulf %459, %435 : vector<16x128xf32>
    %469 = arith.mulf %461, %441 : vector<16x128xf32>
    %470 = arith.subf %468, %469 : vector<16x128xf32>
    %471 = arith.mulf %461, %435 : vector<16x128xf32>
    %472 = arith.mulf %459, %441 : vector<16x128xf32>
    %473 = arith.addf %471, %472 : vector<16x128xf32>
    %474 = arith.mulf %459, %438 : vector<16x128xf32>
    %475 = arith.mulf %461, %444 : vector<16x128xf32>
    %476 = arith.subf %474, %475 : vector<16x128xf32>
    %477 = arith.mulf %461, %438 : vector<16x128xf32>
    %478 = arith.mulf %459, %444 : vector<16x128xf32>
    %479 = arith.addf %477, %478 : vector<16x128xf32>
    %480 = arith.subf %430, %465 : vector<16x128xf32>
    %481 = arith.addf %470, %470 : vector<16x128xf32>
    %482 = arith.mulf %481, %481 : vector<16x128xf32>
    %483 = arith.mulf %480, %480 : vector<16x128xf32>
    %484 = arith.addf %483, %482 : vector<16x128xf32>
    %485 = math.sqrt %484 : vector<16x128xf32>
    %486 = arith.cmpf oge, %480, %0 : vector<16x128xf32>
    %487 = arith.select %486, %1, %2 : vector<16x128xi1>, vector<16x128xf32>
    %488 = math.absf %480 : vector<16x128xf32>
    %489 = arith.addf %488, %485 : vector<16x128xf32>
    %490 = arith.addf %489, %4 : vector<16x128xf32>
    %491 = arith.mulf %490, %490 : vector<16x128xf32>
    %492 = arith.addf %491, %482 : vector<16x128xf32>
    %493 = math.rsqrt %492 : vector<16x128xf32>
    %494 = arith.mulf %490, %493 : vector<16x128xf32>
    %495 = arith.mulf %481, %487 : vector<16x128xf32>
    %496 = arith.mulf %495, %493 : vector<16x128xf32>
    %497 = arith.addf %465, %430 : vector<16x128xf32>
    %498 = arith.mulf %487, %485 : vector<16x128xf32>
    %499 = arith.subf %497, %498 : vector<16x128xf32>
    %500 = arith.mulf %3, %499 : vector<16x128xf32>
    %501 = arith.addf %497, %498 : vector<16x128xf32>
    %502 = arith.mulf %3, %501 : vector<16x128xf32>
    %503 = arith.mulf %494, %0 : vector<16x128xf32>
    %504 = arith.mulf %496, %473 : vector<16x128xf32>
    %505 = arith.subf %503, %504 : vector<16x128xf32>
    %506 = arith.mulf %496, %0 : vector<16x128xf32>
    %507 = arith.mulf %494, %473 : vector<16x128xf32>
    %508 = arith.addf %506, %507 : vector<16x128xf32>
    %509 = arith.mulf %494, %476 : vector<16x128xf32>
    %510 = arith.mulf %496, %0 : vector<16x128xf32>
    %511 = arith.subf %509, %510 : vector<16x128xf32>
    %512 = arith.mulf %496, %476 : vector<16x128xf32>
    %513 = arith.mulf %494, %0 : vector<16x128xf32>
    %514 = arith.addf %512, %513 : vector<16x128xf32>
    %515 = arith.subf %432, %500 : vector<16x128xf32>
    %516 = arith.addf %511, %511 : vector<16x128xf32>
    %517 = arith.mulf %516, %516 : vector<16x128xf32>
    %518 = arith.mulf %515, %515 : vector<16x128xf32>
    %519 = arith.addf %518, %517 : vector<16x128xf32>
    %520 = math.sqrt %519 : vector<16x128xf32>
    %521 = arith.cmpf oge, %515, %0 : vector<16x128xf32>
    %522 = arith.select %521, %1, %2 : vector<16x128xi1>, vector<16x128xf32>
    %523 = math.absf %515 : vector<16x128xf32>
    %524 = arith.addf %523, %520 : vector<16x128xf32>
    %525 = arith.addf %524, %4 : vector<16x128xf32>
    %526 = arith.mulf %525, %525 : vector<16x128xf32>
    %527 = arith.addf %526, %517 : vector<16x128xf32>
    %528 = math.rsqrt %527 : vector<16x128xf32>
    %529 = arith.mulf %525, %528 : vector<16x128xf32>
    %530 = arith.mulf %516, %522 : vector<16x128xf32>
    %531 = arith.mulf %530, %528 : vector<16x128xf32>
    %532 = arith.addf %500, %432 : vector<16x128xf32>
    %533 = arith.mulf %522, %520 : vector<16x128xf32>
    %534 = arith.subf %532, %533 : vector<16x128xf32>
    %535 = arith.mulf %3, %534 : vector<16x128xf32>
    %536 = arith.addf %532, %533 : vector<16x128xf32>
    %537 = arith.mulf %3, %536 : vector<16x128xf32>
    %538 = arith.mulf %529, %505 : vector<16x128xf32>
    %539 = arith.mulf %531, %479 : vector<16x128xf32>
    %540 = arith.subf %538, %539 : vector<16x128xf32>
    %541 = arith.mulf %531, %505 : vector<16x128xf32>
    %542 = arith.mulf %529, %479 : vector<16x128xf32>
    %543 = arith.addf %541, %542 : vector<16x128xf32>
    %544 = arith.mulf %529, %0 : vector<16x128xf32>
    %545 = arith.mulf %531, %514 : vector<16x128xf32>
    %546 = arith.subf %544, %545 : vector<16x128xf32>
    %547 = arith.mulf %531, %0 : vector<16x128xf32>
    %548 = arith.mulf %529, %514 : vector<16x128xf32>
    %549 = arith.addf %547, %548 : vector<16x128xf32>
    %550 = arith.subf %502, %467 : vector<16x128xf32>
    %551 = arith.addf %508, %508 : vector<16x128xf32>
    %552 = arith.mulf %551, %551 : vector<16x128xf32>
    %553 = arith.mulf %550, %550 : vector<16x128xf32>
    %554 = arith.addf %553, %552 : vector<16x128xf32>
    %555 = math.sqrt %554 : vector<16x128xf32>
    %556 = arith.cmpf oge, %550, %0 : vector<16x128xf32>
    %557 = arith.select %556, %1, %2 : vector<16x128xi1>, vector<16x128xf32>
    %558 = math.absf %550 : vector<16x128xf32>
    %559 = arith.addf %558, %555 : vector<16x128xf32>
    %560 = arith.addf %559, %4 : vector<16x128xf32>
    %561 = arith.mulf %560, %560 : vector<16x128xf32>
    %562 = arith.addf %561, %552 : vector<16x128xf32>
    %563 = math.rsqrt %562 : vector<16x128xf32>
    %564 = arith.mulf %560, %563 : vector<16x128xf32>
    %565 = arith.mulf %551, %557 : vector<16x128xf32>
    %566 = arith.mulf %565, %563 : vector<16x128xf32>
    %567 = arith.addf %467, %502 : vector<16x128xf32>
    %568 = arith.mulf %557, %555 : vector<16x128xf32>
    %569 = arith.subf %567, %568 : vector<16x128xf32>
    %570 = arith.mulf %3, %569 : vector<16x128xf32>
    %571 = arith.addf %567, %568 : vector<16x128xf32>
    %572 = arith.mulf %3, %571 : vector<16x128xf32>
    %573 = arith.mulf %564, %540 : vector<16x128xf32>
    %574 = arith.mulf %566, %546 : vector<16x128xf32>
    %575 = arith.subf %573, %574 : vector<16x128xf32>
    %576 = arith.mulf %566, %540 : vector<16x128xf32>
    %577 = arith.mulf %564, %546 : vector<16x128xf32>
    %578 = arith.addf %576, %577 : vector<16x128xf32>
    %579 = arith.mulf %564, %543 : vector<16x128xf32>
    %580 = arith.mulf %566, %549 : vector<16x128xf32>
    %581 = arith.subf %579, %580 : vector<16x128xf32>
    %582 = arith.mulf %566, %543 : vector<16x128xf32>
    %583 = arith.mulf %564, %549 : vector<16x128xf32>
    %584 = arith.addf %582, %583 : vector<16x128xf32>
    %585 = arith.subf %537, %570 : vector<16x128xf32>
    %586 = arith.addf %581, %581 : vector<16x128xf32>
    %587 = arith.mulf %586, %586 : vector<16x128xf32>
    %588 = arith.mulf %585, %585 : vector<16x128xf32>
    %589 = arith.addf %588, %587 : vector<16x128xf32>
    %590 = math.sqrt %589 : vector<16x128xf32>
    %591 = arith.cmpf oge, %585, %0 : vector<16x128xf32>
    %592 = arith.select %591, %1, %2 : vector<16x128xi1>, vector<16x128xf32>
    %593 = math.absf %585 : vector<16x128xf32>
    %594 = arith.addf %593, %590 : vector<16x128xf32>
    %595 = arith.addf %594, %4 : vector<16x128xf32>
    %596 = arith.mulf %595, %595 : vector<16x128xf32>
    %597 = arith.addf %596, %587 : vector<16x128xf32>
    %598 = math.rsqrt %597 : vector<16x128xf32>
    %599 = arith.mulf %595, %598 : vector<16x128xf32>
    %600 = arith.mulf %586, %592 : vector<16x128xf32>
    %601 = arith.mulf %600, %598 : vector<16x128xf32>
    %602 = arith.addf %570, %537 : vector<16x128xf32>
    %603 = arith.mulf %592, %590 : vector<16x128xf32>
    %604 = arith.subf %602, %603 : vector<16x128xf32>
    %605 = arith.mulf %3, %604 : vector<16x128xf32>
    %606 = arith.addf %602, %603 : vector<16x128xf32>
    %607 = arith.mulf %3, %606 : vector<16x128xf32>
    %608 = arith.mulf %599, %575 : vector<16x128xf32>
    %609 = arith.mulf %601, %0 : vector<16x128xf32>
    %610 = arith.subf %608, %609 : vector<16x128xf32>
    %611 = arith.mulf %601, %575 : vector<16x128xf32>
    %612 = arith.mulf %599, %0 : vector<16x128xf32>
    %613 = arith.addf %611, %612 : vector<16x128xf32>
    %614 = arith.mulf %599, %0 : vector<16x128xf32>
    %615 = arith.mulf %601, %584 : vector<16x128xf32>
    %616 = arith.subf %614, %615 : vector<16x128xf32>
    %617 = arith.mulf %601, %0 : vector<16x128xf32>
    %618 = arith.mulf %599, %584 : vector<16x128xf32>
    %619 = arith.addf %617, %618 : vector<16x128xf32>
    %620 = arith.subf %607, %572 : vector<16x128xf32>
    %621 = arith.addf %619, %619 : vector<16x128xf32>
    %622 = arith.mulf %621, %621 : vector<16x128xf32>
    %623 = arith.mulf %620, %620 : vector<16x128xf32>
    %624 = arith.addf %623, %622 : vector<16x128xf32>
    %625 = math.sqrt %624 : vector<16x128xf32>
    %626 = arith.cmpf oge, %620, %0 : vector<16x128xf32>
    %627 = arith.select %626, %1, %2 : vector<16x128xi1>, vector<16x128xf32>
    %628 = math.absf %620 : vector<16x128xf32>
    %629 = arith.addf %628, %625 : vector<16x128xf32>
    %630 = arith.addf %629, %4 : vector<16x128xf32>
    %631 = arith.mulf %630, %630 : vector<16x128xf32>
    %632 = arith.addf %631, %622 : vector<16x128xf32>
    %633 = math.rsqrt %632 : vector<16x128xf32>
    %634 = arith.mulf %630, %633 : vector<16x128xf32>
    %635 = arith.mulf %621, %627 : vector<16x128xf32>
    %636 = arith.mulf %635, %633 : vector<16x128xf32>
    %637 = arith.addf %572, %607 : vector<16x128xf32>
    %638 = arith.mulf %627, %625 : vector<16x128xf32>
    %639 = arith.subf %637, %638 : vector<16x128xf32>
    %640 = arith.mulf %3, %639 : vector<16x128xf32>
    %641 = arith.addf %637, %638 : vector<16x128xf32>
    %642 = arith.mulf %3, %641 : vector<16x128xf32>
    %643 = arith.mulf %634, %578 : vector<16x128xf32>
    %644 = arith.mulf %636, %613 : vector<16x128xf32>
    %645 = arith.subf %643, %644 : vector<16x128xf32>
    %646 = arith.mulf %636, %578 : vector<16x128xf32>
    %647 = arith.mulf %634, %613 : vector<16x128xf32>
    %648 = arith.addf %646, %647 : vector<16x128xf32>
    %649 = arith.mulf %634, %616 : vector<16x128xf32>
    %650 = arith.mulf %636, %0 : vector<16x128xf32>
    %651 = arith.subf %649, %650 : vector<16x128xf32>
    %652 = arith.mulf %636, %616 : vector<16x128xf32>
    %653 = arith.mulf %634, %0 : vector<16x128xf32>
    %654 = arith.addf %652, %653 : vector<16x128xf32>
    %655 = arith.subf %605, %535 : vector<16x128xf32>
    %656 = arith.addf %610, %610 : vector<16x128xf32>
    %657 = arith.mulf %656, %656 : vector<16x128xf32>
    %658 = arith.mulf %655, %655 : vector<16x128xf32>
    %659 = arith.addf %658, %657 : vector<16x128xf32>
    %660 = math.sqrt %659 : vector<16x128xf32>
    %661 = arith.cmpf oge, %655, %0 : vector<16x128xf32>
    %662 = arith.select %661, %1, %2 : vector<16x128xi1>, vector<16x128xf32>
    %663 = math.absf %655 : vector<16x128xf32>
    %664 = arith.addf %663, %660 : vector<16x128xf32>
    %665 = arith.addf %664, %4 : vector<16x128xf32>
    %666 = arith.mulf %665, %665 : vector<16x128xf32>
    %667 = arith.addf %666, %657 : vector<16x128xf32>
    %668 = math.rsqrt %667 : vector<16x128xf32>
    %669 = arith.mulf %665, %668 : vector<16x128xf32>
    %670 = arith.mulf %656, %662 : vector<16x128xf32>
    %671 = arith.mulf %670, %668 : vector<16x128xf32>
    %672 = arith.addf %535, %605 : vector<16x128xf32>
    %673 = arith.mulf %662, %660 : vector<16x128xf32>
    %674 = arith.subf %672, %673 : vector<16x128xf32>
    %675 = arith.mulf %3, %674 : vector<16x128xf32>
    %676 = arith.addf %672, %673 : vector<16x128xf32>
    %677 = arith.mulf %3, %676 : vector<16x128xf32>
    %678 = arith.mulf %669, %645 : vector<16x128xf32>
    %679 = arith.mulf %671, %651 : vector<16x128xf32>
    %680 = arith.subf %678, %679 : vector<16x128xf32>
    %681 = arith.mulf %671, %645 : vector<16x128xf32>
    %682 = arith.mulf %669, %651 : vector<16x128xf32>
    %683 = arith.addf %681, %682 : vector<16x128xf32>
    %684 = arith.mulf %669, %648 : vector<16x128xf32>
    %685 = arith.mulf %671, %654 : vector<16x128xf32>
    %686 = arith.subf %684, %685 : vector<16x128xf32>
    %687 = arith.mulf %671, %648 : vector<16x128xf32>
    %688 = arith.mulf %669, %654 : vector<16x128xf32>
    %689 = arith.addf %687, %688 : vector<16x128xf32>
    %690 = arith.subf %640, %675 : vector<16x128xf32>
    %691 = arith.addf %680, %680 : vector<16x128xf32>
    %692 = arith.mulf %691, %691 : vector<16x128xf32>
    %693 = arith.mulf %690, %690 : vector<16x128xf32>
    %694 = arith.addf %693, %692 : vector<16x128xf32>
    %695 = math.sqrt %694 : vector<16x128xf32>
    %696 = arith.cmpf oge, %690, %0 : vector<16x128xf32>
    %697 = arith.select %696, %1, %2 : vector<16x128xi1>, vector<16x128xf32>
    %698 = math.absf %690 : vector<16x128xf32>
    %699 = arith.addf %698, %695 : vector<16x128xf32>
    %700 = arith.addf %699, %4 : vector<16x128xf32>
    %701 = arith.mulf %700, %700 : vector<16x128xf32>
    %702 = arith.addf %701, %692 : vector<16x128xf32>
    %703 = math.rsqrt %702 : vector<16x128xf32>
    %704 = arith.mulf %700, %703 : vector<16x128xf32>
    %705 = arith.mulf %691, %697 : vector<16x128xf32>
    %706 = arith.mulf %705, %703 : vector<16x128xf32>
    %707 = arith.addf %675, %640 : vector<16x128xf32>
    %708 = arith.mulf %697, %695 : vector<16x128xf32>
    %709 = arith.subf %707, %708 : vector<16x128xf32>
    %710 = arith.mulf %3, %709 : vector<16x128xf32>
    %711 = arith.addf %707, %708 : vector<16x128xf32>
    %712 = arith.mulf %3, %711 : vector<16x128xf32>
    %713 = arith.mulf %704, %0 : vector<16x128xf32>
    %714 = arith.mulf %706, %683 : vector<16x128xf32>
    %715 = arith.subf %713, %714 : vector<16x128xf32>
    %716 = arith.mulf %706, %0 : vector<16x128xf32>
    %717 = arith.mulf %704, %683 : vector<16x128xf32>
    %718 = arith.addf %716, %717 : vector<16x128xf32>
    %719 = arith.mulf %704, %686 : vector<16x128xf32>
    %720 = arith.mulf %706, %0 : vector<16x128xf32>
    %721 = arith.subf %719, %720 : vector<16x128xf32>
    %722 = arith.mulf %706, %686 : vector<16x128xf32>
    %723 = arith.mulf %704, %0 : vector<16x128xf32>
    %724 = arith.addf %722, %723 : vector<16x128xf32>
    %725 = arith.subf %642, %710 : vector<16x128xf32>
    %726 = arith.addf %721, %721 : vector<16x128xf32>
    %727 = arith.mulf %726, %726 : vector<16x128xf32>
    %728 = arith.mulf %725, %725 : vector<16x128xf32>
    %729 = arith.addf %728, %727 : vector<16x128xf32>
    %730 = math.sqrt %729 : vector<16x128xf32>
    %731 = arith.cmpf oge, %725, %0 : vector<16x128xf32>
    %732 = arith.select %731, %1, %2 : vector<16x128xi1>, vector<16x128xf32>
    %733 = math.absf %725 : vector<16x128xf32>
    %734 = arith.addf %733, %730 : vector<16x128xf32>
    %735 = arith.addf %734, %4 : vector<16x128xf32>
    %736 = arith.mulf %735, %735 : vector<16x128xf32>
    %737 = arith.addf %736, %727 : vector<16x128xf32>
    %738 = math.rsqrt %737 : vector<16x128xf32>
    %739 = arith.mulf %735, %738 : vector<16x128xf32>
    %740 = arith.mulf %726, %732 : vector<16x128xf32>
    %741 = arith.mulf %740, %738 : vector<16x128xf32>
    %742 = arith.addf %710, %642 : vector<16x128xf32>
    %743 = arith.mulf %732, %730 : vector<16x128xf32>
    %744 = arith.subf %742, %743 : vector<16x128xf32>
    %745 = arith.mulf %3, %744 : vector<16x128xf32>
    %746 = arith.addf %742, %743 : vector<16x128xf32>
    %747 = arith.mulf %3, %746 : vector<16x128xf32>
    %748 = arith.mulf %741, %715 : vector<16x128xf32>
    %749 = arith.mulf %739, %689 : vector<16x128xf32>
    %750 = arith.addf %748, %749 : vector<16x128xf32>
    %751 = arith.mulf %741, %0 : vector<16x128xf32>
    %752 = arith.mulf %739, %724 : vector<16x128xf32>
    %753 = arith.addf %751, %752 : vector<16x128xf32>
    %754 = arith.subf %712, %677 : vector<16x128xf32>
    %755 = arith.addf %718, %718 : vector<16x128xf32>
    %756 = arith.mulf %755, %755 : vector<16x128xf32>
    %757 = arith.mulf %754, %754 : vector<16x128xf32>
    %758 = arith.addf %757, %756 : vector<16x128xf32>
    %759 = math.sqrt %758 : vector<16x128xf32>
    %760 = arith.cmpf oge, %754, %0 : vector<16x128xf32>
    %761 = arith.select %760, %1, %2 : vector<16x128xi1>, vector<16x128xf32>
    %762 = math.absf %754 : vector<16x128xf32>
    %763 = arith.addf %762, %759 : vector<16x128xf32>
    %764 = arith.addf %763, %4 : vector<16x128xf32>
    %765 = arith.mulf %764, %764 : vector<16x128xf32>
    %766 = arith.addf %765, %756 : vector<16x128xf32>
    %767 = math.rsqrt %766 : vector<16x128xf32>
    %768 = arith.mulf %764, %767 : vector<16x128xf32>
    %769 = arith.mulf %755, %761 : vector<16x128xf32>
    %770 = arith.mulf %769, %767 : vector<16x128xf32>
    %771 = arith.addf %677, %712 : vector<16x128xf32>
    %772 = arith.mulf %761, %759 : vector<16x128xf32>
    %773 = arith.subf %771, %772 : vector<16x128xf32>
    %774 = arith.mulf %3, %773 : vector<16x128xf32>
    %775 = arith.addf %771, %772 : vector<16x128xf32>
    %776 = arith.mulf %3, %775 : vector<16x128xf32>
    %777 = arith.mulf %768, %750 : vector<16x128xf32>
    %778 = arith.mulf %770, %753 : vector<16x128xf32>
    %779 = arith.subf %777, %778 : vector<16x128xf32>
    %780 = arith.mulf %770, %750 : vector<16x128xf32>
    %781 = arith.mulf %768, %753 : vector<16x128xf32>
    %782 = arith.addf %780, %781 : vector<16x128xf32>
    %783 = arith.subf %747, %774 : vector<16x128xf32>
    %784 = arith.addf %779, %779 : vector<16x128xf32>
    %785 = arith.mulf %784, %784 : vector<16x128xf32>
    %786 = arith.mulf %783, %783 : vector<16x128xf32>
    %787 = arith.addf %786, %785 : vector<16x128xf32>
    %788 = math.sqrt %787 : vector<16x128xf32>
    %789 = arith.cmpf oge, %783, %0 : vector<16x128xf32>
    %790 = arith.select %789, %1, %2 : vector<16x128xi1>, vector<16x128xf32>
    %791 = math.absf %783 : vector<16x128xf32>
    %792 = arith.addf %791, %788 : vector<16x128xf32>
    %793 = arith.addf %792, %4 : vector<16x128xf32>
    %794 = arith.mulf %793, %793 : vector<16x128xf32>
    %795 = arith.addf %794, %785 : vector<16x128xf32>
    %796 = math.rsqrt %795 : vector<16x128xf32>
    %797 = arith.mulf %793, %796 : vector<16x128xf32>
    %798 = arith.mulf %784, %790 : vector<16x128xf32>
    %799 = arith.mulf %798, %796 : vector<16x128xf32>
    %800 = arith.addf %774, %747 : vector<16x128xf32>
    %801 = arith.mulf %790, %788 : vector<16x128xf32>
    %802 = arith.subf %800, %801 : vector<16x128xf32>
    %803 = arith.mulf %3, %802 : vector<16x128xf32>
    %804 = arith.addf %800, %801 : vector<16x128xf32>
    %805 = arith.mulf %3, %804 : vector<16x128xf32>
    %806 = arith.mulf %799, %0 : vector<16x128xf32>
    %807 = arith.mulf %797, %782 : vector<16x128xf32>
    %808 = arith.addf %806, %807 : vector<16x128xf32>
    %809 = arith.subf %805, %776 : vector<16x128xf32>
    %810 = arith.addf %808, %808 : vector<16x128xf32>
    %811 = arith.mulf %810, %810 : vector<16x128xf32>
    %812 = arith.mulf %809, %809 : vector<16x128xf32>
    %813 = arith.addf %812, %811 : vector<16x128xf32>
    %814 = math.sqrt %813 : vector<16x128xf32>
    %815 = arith.cmpf oge, %809, %0 : vector<16x128xf32>
    %816 = arith.select %815, %1, %2 : vector<16x128xi1>, vector<16x128xf32>
    %817 = arith.addf %776, %805 : vector<16x128xf32>
    %818 = arith.mulf %816, %814 : vector<16x128xf32>
    %819 = arith.subf %817, %818 : vector<16x128xf32>
    %820 = arith.mulf %3, %819 : vector<16x128xf32>
    %821 = arith.addf %817, %818 : vector<16x128xf32>
    %822 = arith.mulf %3, %821 : vector<16x128xf32>
    %823 = arith.minimumf %745, %803 : vector<16x128xf32>
    %824 = arith.maximumf %745, %803 : vector<16x128xf32>
    %825 = arith.minimumf %820, %822 : vector<16x128xf32>
    %826 = arith.maximumf %820, %822 : vector<16x128xf32>
    %827 = arith.minimumf %823, %825 : vector<16x128xf32>
    %828 = arith.maximumf %823, %825 : vector<16x128xf32>
    %829 = arith.minimumf %824, %826 : vector<16x128xf32>
    %830 = arith.maximumf %824, %826 : vector<16x128xf32>
    %831 = arith.minimumf %829, %828 : vector<16x128xf32>
    %832 = arith.maximumf %829, %828 : vector<16x128xf32>
    %c0_24 = arith.constant 0 : index
    %c0_25 = arith.constant 0 : index
    %c0_26 = arith.constant 0 : index
    %833 = vector.load %arg2[%c0_24, %c0_25, %c0_26] : memref<4x16x128xf32, #tpu.memory_space<vmem>>, vector<1x16x128xf32>
    %834 = vector.shape_cast %833 : vector<1x16x128xf32> to vector<16x128xf32>
    %835 = vector.shape_cast %827 : vector<16x128xf32> to vector<1x16x128xf32>
    tpu.vector_store %arg2[%c0_24, %c0_25, %c0_26], %835 {strides = array<i32>} : memref<4x16x128xf32, #tpu.memory_space<vmem>>, vector<1x16x128xf32>,
    %c1_27 = arith.constant 1 : index
    %c0_28 = arith.constant 0 : index
    %c0_29 = arith.constant 0 : index
    %836 = vector.load %arg2[%c1_27, %c0_28, %c0_29] : memref<4x16x128xf32, #tpu.memory_space<vmem>>, vector<1x16x128xf32>
    %837 = vector.shape_cast %836 : vector<1x16x128xf32> to vector<16x128xf32>
    %838 = vector.shape_cast %831 : vector<16x128xf32> to vector<1x16x128xf32>
    tpu.vector_store %arg2[%c1_27, %c0_28, %c0_29], %838 {strides = array<i32>} : memref<4x16x128xf32, #tpu.memory_space<vmem>>, vector<1x16x128xf32>,
    %c2_30 = arith.constant 2 : index
    %c0_31 = arith.constant 0 : index
    %c0_32 = arith.constant 0 : index
    %839 = vector.load %arg2[%c2_30, %c0_31, %c0_32] : memref<4x16x128xf32, #tpu.memory_space<vmem>>, vector<1x16x128xf32>
    %840 = vector.shape_cast %839 : vector<1x16x128xf32> to vector<16x128xf32>
    %841 = vector.shape_cast %832 : vector<16x128xf32> to vector<1x16x128xf32>
    tpu.vector_store %arg2[%c2_30, %c0_31, %c0_32], %841 {strides = array<i32>} : memref<4x16x128xf32, #tpu.memory_space<vmem>>, vector<1x16x128xf32>,
    %c3_33 = arith.constant 3 : index
    %c0_34 = arith.constant 0 : index
    %c0_35 = arith.constant 0 : index
    %842 = vector.load %arg2[%c3_33, %c0_34, %c0_35] : memref<4x16x128xf32, #tpu.memory_space<vmem>>, vector<1x16x128xf32>
    %843 = vector.shape_cast %842 : vector<1x16x128xf32> to vector<16x128xf32>
    %844 = vector.shape_cast %830 : vector<16x128xf32> to vector<1x16x128xf32>
    tpu.vector_store %arg2[%c3_33, %c0_34, %c0_35], %844 {strides = array<i32>} : memref<4x16x128xf32, #tpu.memory_space<vmem>>, vector<1x16x128xf32>,
    return
  }
  func.func @transform_0(%arg0: i32) -> (i32, i32, i32) {
    %c0_i32 = arith.constant 0 : i32
    %c0_i32_0 = arith.constant 0 : i32
    %c0_i32_1 = arith.constant 0 : i32
    return %c0_i32, %arg0, %c0_i32_0 : i32, i32, i32
  }
  func.func @transform_1(%arg0: i32) -> (i32, i32, i32) {
    %c0_i32 = arith.constant 0 : i32
    %c0_i32_0 = arith.constant 0 : i32
    %c0_i32_1 = arith.constant 0 : i32
    return %c0_i32, %arg0, %c0_i32_0 : i32, i32, i32
  }
}

</mosaic_0001>

<bundles_post_ra>
// kernel: tpu_custom_call.1
= control target key start
LH: loop header
LB: loop body
LE: loop exit
PB: predicated region body
PF: predicated region fallthrough
CT: control target
= control target key end

     0   :  { %6 = vsyncpa [#allocation3], 0  ;;  %s5012_s0 = inlined_call_operand.hbm [shape: f32[10,16,128], index: 0, kind: input, shape index: {}]   ;;  %s5013_s1 = inlined_call_operand.hbm [shape: f32[4,16,128], index: 1, kind: output, shape index: {}]  }
   0x1   :  { %7 = vsyncpa [#allocation4], 0  ;;  %s12_s8 = sshll.u32 %s5012_s0, 4  ;;  %s2863_s9 = smov [#allocation2]   ;;  %s13_s8 = int_to_ptr.hbm [resolvable:$true] %s12_s8 }
   0x2   :  { %s14_s10 = sshll.u32 %s2863_s9, 4  ;;  %s2864_s11 = smov 128   ;;  %s15_s10 = int_to_ptr.vmem [resolvable:$true] %s14_s10 }
   0x3   :  { %s2865_s12 = smov 8  }
   0x4   :  { %20 = dma.hbm_to_vmem [thread:$0]  %s13_s8, 2560, %s15_s10, [#allocation3], %s2864_s11, %s2864_s11, %s2865_s12  }
   0x5   :  { %2859 = dma.done.wait [#allocation3], 2560  }
   0x6   :  { %2860 = vsyncadd [#allocation3], 4294964736  ;;  %v25_v0 = vld [vmem:[#allocation2] sm:$0xff]  ;;  %v26_v1 = vld [vmem:[#allocation2 + $0x8] sm:$0xff]  ;;  %v2866_v37 = vmov -1.0   ;;  %s2867_s0 = smov [#allocation5]  }
   0x7   :  { %v28_v2 = vld [vmem:[#allocation2 + $0x10] sm:$0xff]  ;;  %v29_v3 = vld [vmem:[#allocation2 + $0x18] sm:$0xff]  ;;  %v37_v5 = vld [vmem:[#allocation2 + $0x40] sm:$0xff]  ;;  %s2603_s13 = sshll.u32 %s2867_s0, 4  ;;  %s2605_s16 = sshll.u32 %s5013_s1, 4  ;;  %s2604_s13 = int_to_ptr.vmem [resolvable:$true] %s2603_s13  ;;  %s2606_s16 = int_to_ptr.hbm [resolvable:$true] %s2605_s16 }
   0x8   :  { %v54_v4 = vsub.f32 %v28_v2, %v25_v0  ;;  %v55_v6 = vsub.f32 %v29_v3, %v26_v1  ;;  %v38_v7 = vld [vmem:[#allocation2 + $0x48] sm:$0xff]  ;;  %v2884_v8 = vadd.f32 %v37_v5, %v37_v5  ;;  %v128_v42 = vadd.f32 %v28_v2, %v25_v0 }
   0x9   :  { %v2886_v10 = vadd.f32 %v38_v7, %v38_v7  ;;  %v129_v45 = vadd.f32 %v29_v3, %v26_v1  ;;  %v2901_v7 = vld [vmem:[#allocation2 + $0x20] sm:$0xff] }
   0xa   :  { %v60_v9 = vmul.f32 %v54_v4, %v54_v4  ;;  %v61_v11 = vmul.f32 %v55_v6, %v55_v6  ;;  %v58_v12 = vmul.f32 %v2884_v8, %v2884_v8  ;;  %vm88_vm0 = vcmp.ge.f32.partialorder %v54_v4, 0.0 }
   0xb   :  { %v59_v13 = vmul.f32 %v2886_v10, %v2886_v10  ;;  %v92_v27 = vand.u32 2147483647, %v54_v4  ;;  %vm89_vm2 = vcmp.ge.f32.partialorder %v55_v6, 0.0  ;;  %v93_v33 = vand.u32 2147483647, %v55_v6 }
   0xc   :  { %v62_v14 = vadd.f32 %v60_v9, %v58_v12  ;;  %v90_v38 = vsel %vm88_vm0, 1.0, %v2866_v37  ;;  %v91_v39 = vsel %vm89_vm2, 1.0, %v2866_v37  ;;  %v2903_v9 = vld [vmem:[#allocation2 + $0x50] sm:$0xff] }
   0xd   :  { %v63_v15 = vadd.f32 %v61_v11, %v59_v13  ;;  %v124_v3 = vmul.f32 %v90_v38, %v2884_v8  ;;  %v125_v5 = vmul.f32 %v91_v39, %v2886_v10  ;;  %v2905_v11 = vld [vmem:[#allocation2 + $0x70] sm:$0xff]  ;;  %v2915_v8 = vld [vmem:[#allocation2 + $0x78] sm:$0xff] }
   0xe   :  { %2623 = vrsqrt.f32 %v62_v14  ;;  %vm71_vm1 = vcmp.eq.f32.partialorder %v62_v14, inf  ;;  %v74_v28 = vand.u32 2147483648, %v62_v14  ;;  %vm73_vm3 = vcmp.eq.f32.partialorder %v62_v14, 0.0 }
   0xf   :  { %2625 = vrsqrt.f32 %v63_v15  ;;  %vm83_vm4 = vcmp.eq.f32.partialorder %v63_v15, inf  ;;  %v86_v31 = vand.u32 2147483648, %v63_v15  ;;  %vm85_vm5 = vcmp.eq.f32.partialorder %v63_v15, 0.0 }
  0x14   :  { %v2624_v16 = vpop.eup %2623 }
  0x15   :  { %v2626_v17 = vpop.eup %2625  ;;  %v65_v18 = vmul.f32 %v2624_v16, %v62_v14 }
  0x16   :  { %v77_v19 = vmul.f32 %v2626_v17, %v63_v15 }
  0x17   :  { %v66_v20 = vmul.f32 %v2624_v16, %v65_v18 }
  0x18   :  { %v78_v21 = vmul.f32 %v2626_v17, %v77_v19 }
  0x19   :  { %v67_v22 = vmul.f32 0.5, %v66_v20 }
  0x1a   :  { %v79_v23 = vmul.f32 0.5, %v78_v21 }
  0x1b   :  { %v68_v24 = vsub.f32 1.5, %v67_v22 }
  0x1c   :  { %v80_v25 = vsub.f32 1.5, %v79_v23 }
  0x1d   :  { %v69_v26 = vmul.f32 %v2624_v16, %v68_v24  ;;  %v2913_v16 = vld [vmem:[#allocation2 + $0x58] sm:$0xff] }
  0x1e   :  { %v81_v29 = vmul.f32 %v2626_v17, %v80_v25 }
  0x1f   :  { %v70_v30 = vmul.f32 %v69_v26, %v62_v14 }
  0x20   :  { %v82_v32 = vmul.f32 %v81_v29, %v63_v15  ;;  %v2943_v29 = vld [vmem:[#allocation2 + $0x68] sm:$0xff] }
  0x21   :  { %v72_v34 = vsel %vm71_vm1, %v62_v14, %v70_v30  ;;  %v2945_v30 = vld [vmem:[#allocation2 + $0x80] sm:$0xff] }
  0x22   :  { %v75_v35 = vsel %vm73_vm3, %v74_v28, %v72_v34  ;;  %v84_v36 = vsel %vm83_vm4, %v63_v15, %v82_v32  ;;  %v2911_v15 = vld [vmem:[#allocation2 + $0x28] sm:$0xff] }
  0x23   :  { %v87_v40 = vsel %vm85_vm5, %v86_v31, %v84_v36  ;;  %v94_v41 = vadd.f32 %v92_v27, %v75_v35  ;;  %v130_v43 = vmul.f32 %v90_v38, %v75_v35  ;;  %v2941_v27 = vld [vmem:[#allocation2 + $0x60] sm:$0xff]  ;;  %v2947_v31 = vld [vmem:[#allocation2 + $0x88] sm:$0xff] }
  0x24   :  { %v95_v44 = vadd.f32 %v93_v33, %v87_v40  ;;  %v131_v46 = vmul.f32 %v91_v39, %v87_v40 }
  0x25   :  { %v96_v47 = vadd.f32 1e-18, %v94_v41  ;;  %v2895_v48 = vadd.f32 %v130_v43, %v128_v42  ;;  %v132_v0 = vsub.f32 %v128_v42, %v130_v43 }
  0x26   :  { %v97_v49 = vadd.f32 1e-18, %v95_v44  ;;  %v2897_v50 = vadd.f32 %v131_v46, %v129_v45  ;;  %v133_v1 = vsub.f32 %v129_v45, %v131_v46 }
  0x27   :  { %v98_v51 = vmul.f32 %v96_v47, %v96_v47 }
  0x28   :  { %v99_v52 = vmul.f32 %v97_v49, %v97_v49  ;;  %v2909_v14 = vmul.f32 0.5, %v133_v1 }
  0x29   :  { %v100_v53 = vadd.f32 %v98_v51, %v58_v12 }
  0x2a   :  { %v101_v54 = vadd.f32 %v99_v52, %v59_v13  ;;  %v2907_v13 = vmul.f32 0.5, %v132_v0  ;;  %v2939_v26 = vsub.f32 %v2911_v15, %v2909_v14 }
  0x2b   :  { %2627 = vrsqrt.f32 %v100_v53  ;;  %vm108_vm6 = vweird.f32 %v100_v53 }
  0x2c   :  { %2629 = vrsqrt.f32 %v101_v54  ;;  %vm118_vm8 = vweird.f32 %v101_v54  ;;  %v2935_v25 = vsub.f32 %v2901_v7, %v2907_v13  ;;  %v171_v41 = vmul.f32 %v2939_v26, %v2939_v26 }
  0x2d   :  { %vm199_vm1 = vcmp.ge.f32.partialorder %v2939_v26, 0.0 }
  0x2e   :  { %v170_v40 = vmul.f32 %v2935_v25, %v2935_v25  ;;  %vm198_vm0 = vcmp.ge.f32.partialorder %v2935_v25, 0.0 }
  0x31   :  { %v2628_v55 = vpop.eup %2627 }
  0x32   :  { %v2630_v56 = vpop.eup %2629  ;;  %v103_v57 = vmul.f32 %v2628_v55, %v100_v53  ;;  %vm109_vm7 = vweird.f32 %v2628_v55 }
  0x33   :  { %v113_v58 = vmul.f32 %v2630_v56, %v101_v54  ;;  %vm119_vm9 = vweird.f32 %v2630_v56  ;;  %vm110_vm10 = vmor %vm108_vm6, %vm109_vm7 }
  0x34   :  { %v104_v59 = vmul.f32 %v2628_v55, %v103_v57  ;;  %vm120_vm11 = vmor %vm118_vm8, %vm119_vm9 }
  0x35   :  { %v114_v60 = vmul.f32 %v2630_v56, %v113_v58 }
  0x36   :  { %v105_v61 = vmul.f32 0.5, %v104_v59 }
  0x37   :  { %v115_v62 = vmul.f32 0.5, %v114_v60 }
  0x38   :  { %v106_v63 = vsub.f32 1.5, %v105_v61 }
  0x39   :  { %v116_v2 = vsub.f32 1.5, %v115_v62 }
  0x3a   :  { %v107_v4 = vmul.f32 %v2628_v55, %v106_v63  ;;  %v202_v63 = vand.u32 2147483647, %v2935_v25 }
  0x3b   :  { %v117_v6 = vmul.f32 %v2630_v56, %v116_v2 }
  0x3c   :  { %v111_v12 = vsel %vm110_vm10, %v2628_v55, %v107_v4 }
  0x3d   :  { %v121_v17 = vsel %vm120_vm11, %v2630_v56, %v117_v6  ;;  %v2917_v10 = vmul.f32 %v111_v12, %v96_v47  ;;  %v2919_v18 = vmul.f32 %v124_v3, %v111_v12  ;;  %v203_v3 = vand.u32 2147483647, %v2939_v26 }
  0x3e   :  { %v2921_v19 = vmul.f32 %v121_v17, %v97_v49  ;;  %v2923_v20 = vmul.f32 %v125_v5, %v121_v17  ;;  %v238_v26 = vadd.f32 %v2907_v13, %v2901_v7 }
  0x3f   :  { %v140_v21 = vmul.f32 %v2917_v10, %v2903_v9  ;;  %v142_v22 = vmul.f32 %v2919_v18, %v2905_v11  ;;  %v158_v33 = vmul.f32 %v2919_v18, %v2941_v27  ;;  %v160_v35 = vmul.f32 %v2917_v10, %v2945_v30 }
  0x40   :  { %v141_v23 = vmul.f32 %v2921_v19, %v2913_v16  ;;  %v143_v24 = vmul.f32 %v2923_v20, %v2915_v8  ;;  %v159_v34 = vmul.f32 %v2923_v20, %v2943_v29  ;;  %v161_v36 = vmul.f32 %v2921_v19, %v2947_v31 }
  0x41   :  { %v144_v28 = vsub.f32 %v140_v21, %v142_v22  ;;  %v2965_v42 = vadd.f32 %v160_v35, %v158_v33  ;;  %v152_v7 = vmul.f32 %v2917_v10, %v2941_v27  ;;  %v154_v13 = vmul.f32 %v2919_v18, %v2945_v30 }
  0x42   :  { %v145_v32 = vsub.f32 %v141_v23, %v143_v24  ;;  %v2967_v43 = vadd.f32 %v161_v36, %v159_v34 }
  0x43   :  { %v2957_v38 = vadd.f32 %v144_v28, %v144_v28 }
  0x44   :  { %v2959_v39 = vadd.f32 %v145_v32, %v145_v32 }
  0x45   :  { %v168_v44 = vmul.f32 %v2957_v38, %v2957_v38 }
  0x46   :  { %v169_v45 = vmul.f32 %v2959_v39, %v2959_v39 }
  0x47   :  { %v172_v46 = vadd.f32 %v170_v40, %v168_v44  ;;  %v2978_v40 = vmul.f32 0.5, %v2895_v48  ;;  %v239_v48 = vadd.f32 %v2909_v14, %v2911_v15  ;;  %v153_v15 = vmul.f32 %v2921_v19, %v2943_v29 }
  0x48   :  { %v173_v47 = vadd.f32 %v171_v41, %v169_v45  ;;  %v146_v41 = vmul.f32 %v2919_v18, %v2903_v9 }
  0x49   :  { %2631 = vrsqrt.f32 %v172_v46  ;;  %vm181_vm12 = vcmp.eq.f32.partialorder %v172_v46, inf  ;;  %v184_v61 = vand.u32 2147483648, %v172_v46  ;;  %vm183_vm13 = vcmp.eq.f32.partialorder %v172_v46, 0.0 }
  0x4a   :  { %2633 = vrsqrt.f32 %v173_v47  ;;  %vm193_vm14 = vcmp.eq.f32.partialorder %v173_v47, inf  ;;  %v196_v1 = vand.u32 2147483648, %v173_v47  ;;  %vm195_vm15 = vcmp.eq.f32.partialorder %v173_v47, 0.0 }
  0x4f   :  { %v2632_v49 = vpop.eup %2631 }
  0x50   :  { %v2634_v51 = vpop.eup %2633  ;;  %v175_v52 = vmul.f32 %v2632_v49, %v172_v46 }
  0x51   :  { %v187_v53 = vmul.f32 %v2634_v51, %v173_v47 }
  0x52   :  { %v176_v54 = vmul.f32 %v2632_v49, %v175_v52 }
  0x53   :  { %v188_v55 = vmul.f32 %v2634_v51, %v187_v53 }
  0x54   :  { %v177_v56 = vmul.f32 0.5, %v176_v54  ;;  %v149_v54 = vmul.f32 %v2921_v19, %v2915_v8  ;;  %v3007_v19 = vmul.f32 0.5, %v2897_v50 }
  0x55   :  { %v189_v57 = vmul.f32 0.5, %v188_v55  ;;  %v155_v55 = vmul.f32 %v2923_v20, %v2947_v31 }
  0x56   :  { %v178_v58 = vsub.f32 1.5, %v177_v56 }
  0x57   :  { %v190_v59 = vsub.f32 1.5, %v189_v57 }
  0x58   :  { %v179_v60 = vmul.f32 %v2632_v49, %v178_v58 }
  0x59   :  { %v191_v62 = vmul.f32 %v2634_v51, %v190_v59 }
  0x5a   :  { %v180_v0 = vmul.f32 %v179_v60, %v172_v46 }
  0x5b   :  { %v192_v2 = vmul.f32 %v191_v62, %v173_v47  ;;  %v3019_v62 = vld [vmem:[#allocation2 + $0x30] sm:$0xff] }
  0x5c   :  { %v182_v4 = vsel %vm181_vm12, %v172_v46, %v180_v0 }
  0x5d   :  { %v185_v5 = vsel %vm183_vm13, %v184_v61, %v182_v4  ;;  %v194_v6 = vsel %vm193_vm14, %v173_v47, %v192_v2  ;;  %v201_v47 = vsel %vm199_vm1, 1.0, %v2866_v37  ;;  %v3029_v2 = vld [vmem:[#allocation2 + $0x38] sm:$0xff] }
  0x5e   :  { %v197_v12 = vsel %vm195_vm15, %v196_v1, %v194_v6  ;;  %v204_v17 = vadd.f32 %v202_v63, %v185_v5  ;;  %v235_v8 = vmul.f32 %v201_v47, %v2959_v39  ;;  %v3033_v4 = vld [vmem:[#allocation2 + $0x98] sm:$0xff] }
  0x5f   :  { %v205_v21 = vadd.f32 %v203_v3, %v197_v12  ;;  %v241_v9 = vmul.f32 %v201_v47, %v197_v12  ;;  %v3031_v3 = vld [vmem:[#allocation2 + $0x90] sm:$0xff] }
  0x60   :  { %v206_v22 = vadd.f32 1e-18, %v204_v17 }
  0x61   :  { %v207_v23 = vadd.f32 1e-18, %v205_v21  ;;  %v247_v59 = vadd.f32 %v241_v9, %v239_v48 }
  0x62   :  { %v208_v24 = vmul.f32 %v206_v22, %v206_v22 }
  0x63   :  { %v209_v28 = vmul.f32 %v207_v23, %v207_v23  ;;  %v3037_v6 = vmul.f32 0.5, %v247_v59 }
  0x64   :  { %v210_v32 = vadd.f32 %v208_v24, %v168_v44  ;;  %v148_v44 = vmul.f32 %v2917_v10, %v2905_v11  ;;  %v147_v11 = vmul.f32 %v2923_v20, %v2913_v16  ;;  %v243_v10 = vsub.f32 %v239_v48, %v241_v9 }
  0x65   :  { %v211_v33 = vadd.f32 %v209_v28, %v169_v45  ;;  %v200_v45 = vsel %vm198_vm0, 1.0, %v2866_v37  ;;  %v3011_v20 = vsub.f32 %v152_v7, %v154_v13 }
  0x66   :  { %2635 = vrsqrt.f32 %v210_v32  ;;  %v240_v51 = vmul.f32 %v200_v45, %v185_v5  ;;  %vm218_vm2 = vweird.f32 %v210_v32  ;;  %v234_v56 = vmul.f32 %v200_v45, %v2957_v38 }
  0x67   :  { %2637 = vrsqrt.f32 %v211_v33  ;;  %vm228_vm4 = vweird.f32 %v211_v33  ;;  %v3004_v27 = vadd.f32 %v148_v44, %v146_v41  ;;  %v3009_v29 = vadd.f32 %v149_v54, %v147_v11 }
  0x68   :  { %v242_v58 = vsub.f32 %v238_v26, %v240_v51  ;;  %v246_v30 = vadd.f32 %v240_v51, %v238_v26  ;;  %v3013_v38 = vsub.f32 %v153_v15, %v155_v55  ;;  %v3027_v1 = vmul.f32 0.5, %v243_v10 }
  0x6a   :  { %v3025_v50 = vmul.f32 0.5, %v242_v58  ;;  %v3035_v5 = vmul.f32 0.5, %v246_v30 }
  0x6c   :  { %v2636_v34 = vpop.eup %2635  ;;  %v3063_v41 = vsub.f32 %v3035_v5, %v2978_v40 }
  0x6d   :  { %v2638_v35 = vpop.eup %2637  ;;  %v213_v36 = vmul.f32 %v2636_v34, %v210_v32  ;;  %vm219_vm3 = vweird.f32 %v2636_v34 }
  0x6e   :  { %v223_v46 = vmul.f32 %v2638_v35, %v211_v33  ;;  %vm229_vm5 = vweird.f32 %v2638_v35  ;;  %vm220_vm6 = vmor %vm218_vm2, %vm219_vm3  ;;  %v3055_v33 = vsub.f32 %v3019_v62, %v3025_v50  ;;  %vm418_vm2 = vcmp.ge.f32.partialorder %v3063_v41, 0.0 }
  0x6f   :  { %v214_v49 = vmul.f32 %v2636_v34, %v213_v36  ;;  %vm230_vm7 = vmor %vm228_vm4, %vm229_vm5 }
  0x70   :  { %v224_v25 = vmul.f32 %v2638_v35, %v223_v46  ;;  %v3067_v46 = vsub.f32 %v3037_v6, %v3007_v19  ;;  %vm308_vm8 = vcmp.ge.f32.partialorder %v3055_v33, 0.0 }
  0x71   :  { %v215_v52 = vmul.f32 0.5, %v214_v49 }
  0x72   :  { %v225_v53 = vmul.f32 0.5, %v224_v25  ;;  %v280_v25 = vmul.f32 %v3055_v33, %v3055_v33  ;;  %v391_v9 = vmul.f32 %v3067_v46, %v3067_v46  ;;  %vm419_vm3 = vcmp.ge.f32.partialorder %v3067_v46, 0.0 }
  0x73   :  { %v216_v14 = vsub.f32 1.5, %v215_v52  ;;  %v390_v52 = vmul.f32 %v3063_v41, %v3063_v41 }
  0x74   :  { %v226_v16 = vsub.f32 1.5, %v225_v53 }
  0x75   :  { %v217_v57 = vmul.f32 %v2636_v34, %v216_v14 }
  0x76   :  { %v227_v18 = vmul.f32 %v2638_v35, %v226_v16 }
  0x77   :  { %v221_v31 = vsel %vm220_vm6, %v2636_v34, %v217_v57  ;;  %v3059_v34 = vsub.f32 %v3029_v2, %v3027_v1 }
  0x78   :  { %v231_v60 = vsel %vm230_vm7, %v2638_v35, %v227_v18  ;;  %v3015_v61 = vmul.f32 %v221_v31, %v206_v22  ;;  %v3017_v39 = vmul.f32 %v234_v56, %v221_v31  ;;  %v3115_v31 = vsel %vm308_vm8, 1.0, %v2866_v37 }
  0x79   :  { %v3021_v63 = vmul.f32 %v231_v60, %v207_v23  ;;  %v3023_v0 = vmul.f32 %v235_v8, %v231_v60  ;;  %v281_v26 = vmul.f32 %v3059_v34, %v3059_v34  ;;  %vm309_vm9 = vcmp.ge.f32.partialorder %v3059_v34, 0.0 }
  0x7a   :  { %v256_v12 = vmul.f32 0.0, %v3017_v39  ;;  %v258_v17 = vmul.f32 %v3015_v61, %v3004_v27  ;;  %v262_v23 = vmul.f32 %v3015_v61, %v3011_v20  ;;  %v264_v28 = vmul.f32 %v3017_v39, %v3031_v3 }
  0x7b   :  { %v257_v21 = vmul.f32 0.0, %v3023_v0  ;;  %v259_v22 = vmul.f32 %v3021_v63, %v3009_v29  ;;  %v263_v24 = vmul.f32 %v3021_v63, %v3013_v38  ;;  %v265_v32 = vmul.f32 %v3023_v0, %v3033_v4 }
  0x7c   :  { %v260_v35 = vadd.f32 %v258_v17, %v256_v12  ;;  %v266_v44 = vsub.f32 %v262_v23, %v264_v28  ;;  %v3119_v17 = vsel %vm309_vm9, 1.0, %v2866_v37 }
  0x7d   :  { %v261_v36 = vadd.f32 %v259_v22, %v257_v21  ;;  %v267_v45 = vsub.f32 %v263_v24, %v265_v32  ;;  %v312_v21 = vand.u32 2147483647, %v3055_v33  ;;  %v313_v24 = vand.u32 2147483647, %v3059_v34 }
  0x7e   :  { %v3069_v47 = vadd.f32 %v266_v44, %v266_v44  ;;  %v3077_v48 = vadd.f32 %v260_v35, %v260_v35  ;;  %v422_v32 = vand.u32 2147483647, %v3063_v41  ;;  %v423_v44 = vand.u32 2147483647, %v3067_v46 }
  0x7f   :  { %v3071_v49 = vadd.f32 %v267_v45, %v267_v45  ;;  %v3079_v51 = vadd.f32 %v261_v36, %v261_v36  ;;  %v271_v41 = vmul.f32 %v3021_v63, %v3033_v4 }
  0x80   :  { %v3087_v11 = vmul.f32 %v3069_v47, %v3069_v47  ;;  %v3095_v54 = vmul.f32 %v3077_v48, %v3077_v48 }
  0x81   :  { %v3091_v53 = vmul.f32 %v3071_v49, %v3071_v49  ;;  %v3099_v7 = vmul.f32 %v3079_v51, %v3079_v51 }
  0x82   :  { %v282_v13 = vadd.f32 %v280_v25, %v3087_v11  ;;  %v3104_v15 = vadd.f32 %v390_v52, %v3095_v54 }
  0x83   :  { %v283_v14 = vadd.f32 %v281_v26, %v3091_v53  ;;  %v3107_v55 = vadd.f32 %v391_v9, %v3099_v7 }
  0x84   :  { %2639 = vrsqrt.f32 %v282_v13  ;;  %vm291_vm10 = vcmp.eq.f32.partialorder %v282_v13, inf  ;;  %vm293_vm11 = vcmp.eq.f32.partialorder %v282_v13, 0.0  ;;  %v294_v45 = vand.u32 2147483648, %v282_v13 }
  0x85   :  { %2641 = vrsqrt.f32 %v283_v14  ;;  %vm303_vm12 = vcmp.eq.f32.partialorder %v283_v14, inf  ;;  %vm305_vm13 = vcmp.eq.f32.partialorder %v283_v14, 0.0  ;;  %vm401_vm14 = vcmp.eq.f32.partialorder %v3104_v15, inf }
  0x86   :  { %2643 = vrsqrt.f32 %v3104_v15  ;;  %vm403_vm15 = vcmp.eq.f32.partialorder %v3104_v15, 0.0  ;;  %vm413_vm0 = vcmp.eq.f32.partialorder %v3107_v55, inf  ;;  %vm415_vm1 = vcmp.eq.f32.partialorder %v3107_v55, 0.0 }
  0x87   :  { %2645 = vrsqrt.f32 %v3107_v55 }
  0x8a   :  { %v2640_v16 = vpop.eup %2639 }
  0x8b   :  { %v2642_v56 = vpop.eup %2641  ;;  %v285_v57 = vmul.f32 %v2640_v16, %v282_v13 }
  0x8c   :  { %v2644_v8 = vpop.eup %2643  ;;  %v297_v58 = vmul.f32 %v2642_v56, %v283_v14 }
  0x8d   :  { %v2646_v10 = vpop.eup %2645  ;;  %v286_v18 = vmul.f32 %v2640_v16, %v285_v57  ;;  %v395_v30 = vmul.f32 %v2644_v8, %v3104_v15  ;;  %v306_v57 = vand.u32 2147483648, %v283_v14 }
  0x8e   :  { %v298_v59 = vmul.f32 %v2642_v56, %v297_v58  ;;  %v407_v60 = vmul.f32 %v2646_v10, %v3107_v55 }
  0x8f   :  { %v287_v12 = vmul.f32 0.5, %v286_v18  ;;  %v396_v22 = vmul.f32 %v2644_v8, %v395_v30  ;;  %v404_v30 = vand.u32 2147483648, %v3104_v15 }
  0x90   :  { %v299_v23 = vmul.f32 0.5, %v298_v59  ;;  %v408_v28 = vmul.f32 %v2646_v10, %v407_v60 }
  0x91   :  { %v288_v35 = vsub.f32 1.5, %v287_v12  ;;  %v397_v36 = vmul.f32 0.5, %v396_v22 }
  0x92   :  { %v300_v25 = vsub.f32 1.5, %v299_v23  ;;  %v409_v26 = vmul.f32 0.5, %v408_v28 }
  0x93   :  { %v289_v52 = vmul.f32 %v2640_v16, %v288_v35  ;;  %v398_v33 = vsub.f32 1.5, %v397_v36 }
  0x94   :  { %v301_v9 = vmul.f32 %v2642_v56, %v300_v25  ;;  %v410_v34 = vsub.f32 1.5, %v409_v26  ;;  %v3133_v56 = vadd.f32 %v3025_v50, %v3019_v62 }
  0x95   :  { %v290_v58 = vmul.f32 %v289_v52, %v282_v13  ;;  %v399_v18 = vmul.f32 %v2644_v8, %v398_v33  ;;  %v416_v8 = vand.u32 2147483648, %v3107_v55 }
  0x96   :  { %v302_v59 = vmul.f32 %v301_v9, %v283_v14  ;;  %v411_v60 = vmul.f32 %v2646_v10, %v410_v34  ;;  %v3141_v10 = vadd.f32 %v3027_v1, %v3029_v2 }
  0x97   :  { %v292_v16 = vsel %vm291_vm10, %v282_v13, %v290_v58  ;;  %v400_v12 = vmul.f32 %v399_v18, %v3104_v15 }
  0x98   :  { %v295_v22 = vsel %vm293_vm11, %v294_v45, %v292_v16  ;;  %v304_v23 = vsel %vm303_vm12, %v283_v14, %v302_v59  ;;  %v412_v28 = vmul.f32 %v411_v60, %v3107_v55  ;;  %v253_v59 = vmul.f32 %v3023_v0, %v3009_v29 }
  0x99   :  { %v307_v35 = vsel %vm305_vm13, %v306_v57, %v304_v23  ;;  %v314_v36 = vadd.f32 %v312_v21, %v295_v22  ;;  %v3146_v62 = vmul.f32 %v3115_v31, %v295_v22  ;;  %v402_v50 = vsel %vm401_vm14, %v3104_v15, %v400_v12 }
  0x9a   :  { %v315_v13 = vadd.f32 %v313_v24, %v307_v35  ;;  %v3152_v45 = vmul.f32 %v3119_v17, %v307_v35  ;;  %v405_v1 = vsel %vm403_vm15, %v404_v30, %v402_v50  ;;  %v414_v2 = vsel %vm413_vm0, %v3107_v55, %v412_v28 }
  0x9b   :  { %v3159_v14 = vadd.f32 1e-18, %v314_v36  ;;  %v352_v21 = vsub.f32 %v3133_v56, %v3146_v62  ;;  %v417_v25 = vsel %vm415_vm1, %v416_v8, %v414_v2  ;;  %v424_v52 = vadd.f32 %v422_v32, %v405_v1 }
  0x9c   :  { %v3165_v26 = vadd.f32 1e-18, %v315_v13  ;;  %v353_v24 = vsub.f32 %v3141_v10, %v3152_v45  ;;  %v425_v9 = vadd.f32 %v423_v44, %v417_v25  ;;  %v250_v30 = vmul.f32 0.0, %v3015_v61 }
  0x9d   :  { %v318_v15 = vmul.f32 %v3159_v14, %v3159_v14  ;;  %v3174_v34 = vadd.f32 1e-18, %v424_v52  ;;  %v252_v44 = vmul.f32 %v3017_v39, %v3004_v27  ;;  %v268_v60 = vmul.f32 %v3017_v39, %v3011_v20 }
  0x9e   :  { %v319_v33 = vmul.f32 %v3165_v26, %v3165_v26  ;;  %v3177_v58 = vadd.f32 1e-18, %v425_v9  ;;  %v269_v12 = vmul.f32 %v3023_v0, %v3013_v38  ;;  %v270_v27 = vmul.f32 %v3015_v61, %v3031_v3 }
  0x9f   :  { %v320_v57 = vadd.f32 %v318_v15, %v3087_v11  ;;  %v428_v18 = vmul.f32 %v3174_v34, %v3174_v34  ;;  %v420_v29 = vsel %vm418_vm2, 1.0, %v2866_v37  ;;  %v3210_v39 = vadd.f32 %v3035_v5, %v2978_v40 }
  0xa0   :  { %v321_v55 = vadd.f32 %v319_v33, %v3091_v53  ;;  %v429_v32 = vmul.f32 %v3177_v58, %v3177_v58  ;;  %v251_v53 = vmul.f32 0.0, %v3021_v63  ;;  %v3212_v38 = vmul.f32 %v420_v29, %v405_v1 }
  0xa1   :  { %2647 = vrsqrt.f32 %v320_v57  ;;  %v3188_v11 = vadd.f32 %v428_v18, %v3095_v54  ;;  %v254_v61 = vsub.f32 %v250_v30, %v252_v44  ;;  %v3214_v63 = vadd.f32 %v270_v27, %v268_v60 }
  0xa2   :  { %2649 = vrsqrt.f32 %v321_v55  ;;  %v3196_v16 = vadd.f32 %v429_v32, %v3099_v7  ;;  %v255_v3 = vsub.f32 %v251_v53, %v253_v59  ;;  %v3216_v4 = vadd.f32 %v271_v41, %v269_v12 }
  0xa3   :  { %2651 = vrsqrt.f32 %v3188_v11  ;;  %v421_v7 = vsel %vm419_vm3, 1.0, %v2866_v37  ;;  %v344_v22 = vmul.f32 %v3115_v31, %v3069_v47  ;;  %v3223_v40 = vadd.f32 %v3037_v6, %v3007_v19 }
  0xa4   :  { %2653 = vrsqrt.f32 %v3196_v16  ;;  %v3225_v5 = vmul.f32 %v421_v7, %v417_v25  ;;  %v356_v35 = vadd.f32 %v3146_v62, %v3133_v56  ;;  %v357_v36 = vadd.f32 %v3152_v45, %v3141_v10 }
  0xa5   :  { %v462_v50 = vsub.f32 %v3210_v39, %v3212_v38  ;;  %vm328_vm4 = vweird.f32 %v320_v57  ;;  %vm338_vm6 = vweird.f32 %v321_v55  ;;  %v345_v2 = vmul.f32 %v3119_v17, %v3071_v49 }
  0xa6   :  { %v463_v15 = vsub.f32 %v3223_v40, %v3225_v5  ;;  %v3246_v33 = vmul.f32 0.5, %v356_v35  ;;  %v3251_v18 = vmul.f32 0.5, %v357_v36  ;;  %v454_v49 = vmul.f32 %v420_v29, %v3077_v48 }
  0xa7   :  { %v2648_v20 = vpop.eup %2647  ;;  %vm438_vm10 = vweird.f32 %v3188_v11  ;;  %vm448_vm11 = vweird.f32 %v3196_v16  ;;  %v455_v30 = vmul.f32 %v421_v7, %v3079_v51 }
  0xa8   :  { %v2650_v0 = vpop.eup %2649  ;;  %v323_v54 = vmul.f32 %v2648_v20, %v320_v57  ;;  %vm329_vm5 = vweird.f32 %v2648_v20  ;;  %v3249_v57 = vmul.f32 0.5, %v462_v50  ;;  %v3257_v60 = vmul.f32 0.5, %v463_v15 }
  0xa9   :  { %v333_v46 = vmul.f32 %v2650_v0, %v321_v55  ;;  %v3227_v23 = vpop.eup %2651  ;;  %vm339_vm7 = vweird.f32 %v2650_v0  ;;  %vm330_vm8 = vmor %vm328_vm4, %vm329_vm5 }
  0xaa   :  { %v324_v8 = vmul.f32 %v2648_v20, %v323_v54  ;;  %v3235_v13 = vpop.eup %2653  ;;  %v433_v19 = vmul.f32 %v3227_v23, %v3188_v11  ;;  %vm340_vm9 = vmor %vm338_vm6, %vm339_vm7  ;;  %v3262_v54 = vsub.f32 %v3246_v33, %v3249_v57  ;;  %vm439_vm12 = vweird.f32 %v3227_v23 }
  0xab   :  { %v334_v28 = vmul.f32 %v2650_v0, %v333_v46  ;;  %v443_v31 = vmul.f32 %v3235_v13, %v3196_v16  ;;  %vm449_vm13 = vweird.f32 %v3235_v13  ;;  %vm440_vm14 = vmor %vm438_vm10, %vm439_vm12 }
  0xac   :  { %v325_v47 = vmul.f32 0.5, %v324_v8  ;;  %v434_v25 = vmul.f32 %v3227_v23, %v433_v19  ;;  %vm450_vm15 = vmor %vm448_vm11, %vm449_vm13  ;;  %vm528_vm0 = vcmp.ge.f32.partialorder %v3262_v54, 0.0 }
  0xad   :  { %v335_v6 = vmul.f32 0.5, %v334_v28  ;;  %v444_v9 = vmul.f32 %v3235_v13, %v443_v31 }
  0xae   :  { %v326_v1 = vsub.f32 1.5, %v325_v47  ;;  %v435_v32 = vmul.f32 0.5, %v434_v25 }
  0xaf   :  { %v336_v52 = vsub.f32 1.5, %v335_v6  ;;  %v445_v59 = vmul.f32 0.5, %v444_v9 }
  0xb0   :  { %v327_v55 = vmul.f32 %v2648_v20, %v326_v1  ;;  %v436_v53 = vsub.f32 1.5, %v435_v32  ;;  %v3288_v32 = vsub.f32 %v3251_v18, %v3257_v60 }
  0xb1   :  { %v337_v17 = vmul.f32 %v2650_v0, %v336_v52 }
  0xb2   :  { %v331_v44 = vsel %vm330_vm8, %v2648_v20, %v327_v55  ;;  %v437_v8 = vmul.f32 %v3227_v23, %v436_v53  ;;  %vm529_vm1 = vcmp.ge.f32.partialorder %v3288_v32, 0.0 }
  0xb3   :  { %v341_v12 = vsel %vm340_vm9, %v2650_v0, %v337_v17  ;;  %v342_v27 = vmul.f32 %v331_v44, %v3159_v14  ;;  %v346_v41 = vmul.f32 %v344_v22, %v331_v44  ;;  %v446_v22 = vsub.f32 1.5, %v445_v59 }
  0xb4   :  { %v343_v48 = vmul.f32 %v341_v12, %v3165_v26  ;;  %v347_v29 = vmul.f32 %v345_v2, %v341_v12 }
  0xb5   :  { %v360_v51 = vmul.f32 %v342_v27, %v254_v61  ;;  %v362_v20 = vmul.f32 %v346_v41, %v2965_v42  ;;  %v366_v46 = vmul.f32 %v346_v41, %v254_v61  ;;  %v368_v0 = vmul.f32 %v342_v27, %v2965_v42 }
  0xb6   :  { %v361_v7 = vmul.f32 %v343_v48, %v255_v3  ;;  %v363_v14 = vmul.f32 %v347_v29, %v2967_v43  ;;  %v367_v28 = vmul.f32 %v347_v29, %v255_v3  ;;  %v369_v26 = vmul.f32 %v343_v48, %v2967_v43 }
  0xb7   :  { %v372_v35 = vmul.f32 0.0, %v342_v27  ;;  %v373_v36 = vmul.f32 0.0, %v343_v48  ;;  %v364_v50 = vsub.f32 %v360_v51, %v362_v20  ;;  %v370_v47 = vadd.f32 %v368_v0, %v366_v46 }
  0xb8   :  { %v374_v61 = vmul.f32 %v346_v41, %v3214_v63  ;;  %v375_v42 = vmul.f32 %v347_v29, %v3216_v4  ;;  %v378_v19 = vmul.f32 0.0, %v346_v41  ;;  %v379_v6 = vmul.f32 0.0, %v347_v29 }
  0xb9   :  { %v380_v31 = vmul.f32 %v342_v27, %v3214_v63  ;;  %v381_v1 = vmul.f32 %v343_v48, %v3216_v4  ;;  %v365_v43 = vsub.f32 %v361_v7, %v363_v14  ;;  %v441_v3 = vsel %vm440_vm14, %v3227_v23, %v437_v8 }
  0xba   :  { %v376_v11 = vsub.f32 %v372_v35, %v374_v61  ;;  %v447_v2 = vmul.f32 %v3235_v13, %v446_v22  ;;  %v377_v25 = vsub.f32 %v373_v36, %v375_v42  ;;  %v452_v52 = vmul.f32 %v441_v3, %v3174_v34 }
  0xbb   :  { %v382_v15 = vadd.f32 %v380_v31, %v378_v19  ;;  %v456_v9 = vmul.f32 %v454_v49, %v441_v3  ;;  %v371_v55 = vadd.f32 %v369_v26, %v367_v28  ;;  %v383_v63 = vadd.f32 %v381_v1, %v379_v6 }
  0xbc   :  { %v451_v4 = vsel %vm450_vm15, %v3235_v13, %v447_v2  ;;  %v470_v44 = vmul.f32 %v452_v52, %v364_v50  ;;  %v478_v59 = vmul.f32 %v452_v52, %v376_v11  ;;  %v482_v12 = vmul.f32 %v452_v52, %v370_v47 }
  0xbd   :  { %v453_v16 = vmul.f32 %v451_v4, %v3177_v58  ;;  %v457_v17 = vmul.f32 %v455_v30, %v451_v4  ;;  %v472_v23 = vmul.f32 %v456_v9, %v376_v11  ;;  %v476_v53 = vmul.f32 %v456_v9, %v364_v50 }
  0xbe   :  { %v484_v27 = vmul.f32 %v456_v9, %v382_v15  ;;  %v488_v30 = vmul.f32 %v456_v9, %v370_v47  ;;  %v490_v8 = vmul.f32 %v452_v52, %v382_v15  ;;  %v500_v26 = vmul.f32 %v3262_v54, %v3262_v54 }
  0xbf   :  { %v471_v41 = vmul.f32 %v453_v16, %v365_v43  ;;  %v473_v34 = vmul.f32 %v457_v17, %v377_v25  ;;  %v3291_v49 = vsub.f32 %v470_v44, %v472_v23  ;;  %v477_v48 = vmul.f32 %v457_v17, %v365_v43 }
  0xc0   :  { %v479_v29 = vmul.f32 %v453_v16, %v377_v25  ;;  %v3293_v13 = vadd.f32 %v478_v59, %v476_v53  ;;  %v483_v51 = vmul.f32 %v453_v16, %v371_v55  ;;  %v485_v20 = vmul.f32 %v457_v17, %v383_v63 }
  0xc1   :  { %v3295_v46 = vsub.f32 %v471_v41, %v473_v34  ;;  %v486_v58 = vsub.f32 %v482_v12, %v484_v27  ;;  %v489_v0 = vmul.f32 %v457_v17, %v371_v55  ;;  %v491_v22 = vmul.f32 %v453_v16, %v383_v63 }
  0xc2   :  { %v3297_v7 = vadd.f32 %v479_v29, %v477_v48  ;;  %v487_v14 = vsub.f32 %v483_v51, %v485_v20  ;;  %v3301_v35 = vadd.f32 %v490_v8, %v488_v30  ;;  %v501_v61 = vmul.f32 %v3288_v32, %v3288_v32 }
  0xc3   :  { %v496_v28 = vadd.f32 %v486_v58, %v486_v58  ;;  %v3303_v36 = vadd.f32 %v491_v22, %v489_v0  ;;  %v530_v15 = vsel %vm528_vm0, 1.0, %v2866_v37  ;;  %v531_v52 = vsel %vm529_vm1, 1.0, %v2866_v37 }
  0xc4   :  { %v497_v50 = vadd.f32 %v487_v14, %v487_v14  ;;  %v532_v53 = vand.u32 2147483647, %v3262_v54  ;;  %v533_v41 = vand.u32 2147483647, %v3288_v32  ;;  %v466_v34 = vadd.f32 %v3212_v38, %v3210_v39 }
  0xc5   :  { %v498_v42 = vmul.f32 %v496_v28, %v496_v28  ;;  %v3314_v4 = vmul.f32 %v530_v15, %v496_v28  ;;  %v568_v29 = vadd.f32 %v3249_v57, %v3246_v33  ;;  %v467_v51 = vadd.f32 %v3225_v5, %v3223_v40 }
  0xc6   :  { %v3307_v47 = vmul.f32 %v497_v50, %v497_v50  ;;  %v3316_v16 = vmul.f32 %v531_v52, %v497_v50  ;;  %v569_v58 = vadd.f32 %v3257_v60, %v3251_v18  ;;  %v3328_v22 = vmul.f32 0.5, %v466_v34 }
  0xc7   :  { %v502_v19 = vadd.f32 %v500_v26, %v498_v42  ;;  %v3330_v26 = vmul.f32 0.5, %v467_v51  ;;  %v3337_v18 = vmul.f32 0.5, %v352_v21  ;;  %v3342_v60 = vmul.f32 0.5, %v353_v24 }
  0xc8   :  { %v503_v6 = vadd.f32 %v501_v61, %v3307_v47 }
  0xc9   :  { %2655 = vrsqrt.f32 %v502_v19  ;;  %vm511_vm2 = vcmp.eq.f32.partialorder %v502_v19, inf  ;;  %v514_v44 = vand.u32 2147483648, %v502_v19  ;;  %vm513_vm3 = vcmp.eq.f32.partialorder %v502_v19, 0.0 }
  0xca   :  { %2657 = vrsqrt.f32 %v503_v6  ;;  %vm523_vm4 = vcmp.eq.f32.partialorder %v503_v6, inf  ;;  %v526_v12 = vand.u32 2147483648, %v503_v6  ;;  %vm525_vm5 = vcmp.eq.f32.partialorder %v503_v6, 0.0 }
  0xcf   :  { %v2656_v31 = vpop.eup %2655 }
  0xd0   :  { %v2658_v1 = vpop.eup %2657  ;;  %v505_v43 = vmul.f32 %v2656_v31, %v502_v19 }
  0xd1   :  { %v517_v11 = vmul.f32 %v2658_v1, %v503_v6 }
  0xd2   :  { %v506_v3 = vmul.f32 %v2656_v31, %v505_v43 }
  0xd3   :  { %v518_v2 = vmul.f32 %v2658_v1, %v517_v11 }
  0xd4   :  { %v507_v25 = vmul.f32 0.5, %v506_v3 }
  0xd5   :  { %v519_v9 = vmul.f32 0.5, %v518_v2 }
  0xd6   :  { %v508_v55 = vsub.f32 1.5, %v507_v25 }
  0xd7   :  { %v520_v63 = vsub.f32 1.5, %v519_v9 }
  0xd8   :  { %v509_v17 = vmul.f32 %v2656_v31, %v508_v55 }
  0xd9   :  { %v521_v23 = vmul.f32 %v2658_v1, %v520_v63 }
  0xda   :  { %v510_v59 = vmul.f32 %v509_v17, %v502_v19 }
  0xdb   :  { %v522_v27 = vmul.f32 %v521_v23, %v503_v6 }
  0xdc   :  { %v512_v48 = vsel %vm511_vm2, %v502_v19, %v510_v59 }
  0xdd   :  { %v515_v20 = vsel %vm513_vm3, %v514_v44, %v512_v48  ;;  %v524_v54 = vsel %vm523_vm4, %v503_v6, %v522_v27 }
  0xde   :  { %v527_v30 = vsel %vm525_vm5, %v526_v12, %v524_v54  ;;  %v534_v0 = vadd.f32 %v532_v53, %v515_v20  ;;  %v570_v14 = vmul.f32 %v530_v15, %v515_v20 }
  0xdf   :  { %v535_v8 = vadd.f32 %v533_v41, %v527_v30  ;;  %v571_v32 = vmul.f32 %v531_v52, %v527_v30 }
  0xe0   :  { %v536_v39 = vadd.f32 1e-18, %v534_v0  ;;  %v572_v38 = vsub.f32 %v568_v29, %v570_v14  ;;  %v576_v28 = vadd.f32 %v570_v14, %v568_v29 }
  0xe1   :  { %v537_v33 = vadd.f32 1e-18, %v535_v8  ;;  %v573_v57 = vsub.f32 %v569_v58, %v571_v32  ;;  %v577_v40 = vadd.f32 %v571_v32, %v569_v58 }
  0xe2   :  { %v538_v5 = vmul.f32 %v536_v39, %v536_v39  ;;  %v3332_v50 = vmul.f32 0.5, %v576_v28  ;;  %v3346_v31 = vmul.f32 0.5, %v572_v38 }
  0xe3   :  { %v539_v61 = vmul.f32 %v537_v33, %v537_v33  ;;  %v3344_v19 = vmul.f32 0.5, %v577_v40  ;;  %v3348_v1 = vmul.f32 0.5, %v573_v57 }
  0xe4   :  { %v540_v6 = vadd.f32 %v538_v5, %v498_v42  ;;  %v3352_v43 = vsub.f32 %v3332_v50, %v3328_v22  ;;  %v3361_v10 = vsub.f32 %v3346_v31, %v3337_v18 }
  0xe5   :  { %v541_v56 = vadd.f32 %v539_v61, %v3307_v47  ;;  %v3357_v62 = vsub.f32 %v3344_v19, %v3330_v26  ;;  %v3365_v45 = vsub.f32 %v3348_v1, %v3342_v60 }
  0xe6   :  { %2659 = vrsqrt.f32 %v540_v6  ;;  %vm548_vm6 = vweird.f32 %v540_v6  ;;  %vm634_vm12 = vcmp.ge.f32.partialorder %v3352_v43, 0.0 }
  0xe7   :  { %2661 = vrsqrt.f32 %v541_v56  ;;  %vm558_vm8 = vweird.f32 %v541_v56  ;;  %v717_v57 = vmul.f32 %v3365_v45, %v3365_v45  ;;  %v607_v5 = vmul.f32 %v3357_v62, %v3357_v62 }
  0xe8   :  { %vm635_vm13 = vcmp.ge.f32.partialorder %v3357_v62, 0.0 }
  0xec   :  { %v2660_v21 = vpop.eup %2659 }
  0xed   :  { %v2662_v24 = vpop.eup %2661  ;;  %v543_v42 = vmul.f32 %v2660_v21, %v540_v6  ;;  %vm549_vm7 = vweird.f32 %v2660_v21 }
  0xee   :  { %v553_v11 = vmul.f32 %v2662_v24, %v541_v56  ;;  %vm559_vm9 = vweird.f32 %v2662_v24  ;;  %vm550_vm10 = vmor %vm548_vm6, %vm549_vm7  ;;  %vm744_vm6 = vcmp.ge.f32.partialorder %v3361_v10, 0.0  ;;  %vm745_vm7 = vcmp.ge.f32.partialorder %v3365_v45, 0.0 }
  0xef   :  { %v544_v3 = vmul.f32 %v2660_v21, %v543_v42  ;;  %vm560_vm11 = vmor %vm558_vm8, %vm559_vm9 }
  0xf0   :  { %v554_v47 = vmul.f32 %v2662_v24, %v553_v11 }
  0xf1   :  { %v545_v2 = vmul.f32 0.5, %v544_v3 }
  0xf2   :  { %v555_v25 = vmul.f32 0.5, %v554_v47 }
  0xf3   :  { %v546_v15 = vsub.f32 1.5, %v545_v2 }
  0xf4   :  { %v556_v52 = vsub.f32 1.5, %v555_v25 }
  0xf5   :  { %v547_v9 = vmul.f32 %v2660_v21, %v546_v15 }
  0xf6   :  { %v557_v55 = vmul.f32 %v2662_v24, %v556_v52 }
  0xf7   :  { %v551_v63 = vsel %vm550_vm10, %v2660_v21, %v547_v9  ;;  %v636_v9 = vsel %vm634_vm12, 1.0, %v2866_v37 }
  0xf8   :  { %v561_v17 = vsel %vm560_vm11, %v2662_v24, %v557_v55  ;;  %v562_v44 = vmul.f32 %v551_v63, %v536_v39  ;;  %v566_v23 = vmul.f32 %v3314_v4, %v551_v63  ;;  %v637_v55 = vsel %vm635_vm13, 1.0, %v2866_v37 }
  0xf9   :  { %v563_v53 = vmul.f32 %v561_v17, %v537_v33  ;;  %v567_v59 = vmul.f32 %v3316_v16, %v561_v17  ;;  %v716_v33 = vmul.f32 %v3361_v10, %v3361_v10 }
  0xfa   :  { %v580_v12 = vmul.f32 %v562_v44, %v3291_v49  ;;  %v582_v27 = vmul.f32 0.0, %v566_v23  ;;  %v586_v41 = vmul.f32 %v566_v23, %v3291_v49  ;;  %v588_v34 = vmul.f32 0.0, %v562_v44 }
  0xfb   :  { %v581_v48 = vmul.f32 %v563_v53, %v3295_v46  ;;  %v583_v29 = vmul.f32 0.0, %v567_v59  ;;  %v587_v51 = vmul.f32 %v567_v59, %v3295_v46  ;;  %v589_v20 = vmul.f32 0.0, %v563_v53 }
  0xfc   :  { %v584_v54 = vsub.f32 %v580_v12, %v582_v27  ;;  %v3373_v58 = vadd.f32 %v588_v34, %v586_v41  ;;  %v592_v4 = vmul.f32 %v566_v23, %v3301_v35  ;;  %v593_v30 = vmul.f32 %v567_v59, %v3303_v36 }
  0xfd   :  { %v585_v16 = vsub.f32 %v581_v48, %v583_v29  ;;  %v3377_v0 = vadd.f32 %v589_v20, %v587_v51  ;;  %v596_v14 = vmul.f32 %v562_v44, %v3301_v35  ;;  %v597_v49 = vmul.f32 %v563_v53, %v3303_v36 }
  0xfe   :  { %v3381_v8 = vsub.f32 %v588_v34, %v592_v4  ;;  %v3383_v32 = vsub.f32 %v589_v20, %v593_v30  ;;  %v3385_v38 = vadd.f32 %v584_v54, %v584_v54  ;;  %v606_v36 = vmul.f32 %v3352_v43, %v3352_v43 }
  0xff   :  { %v598_v46 = vadd.f32 %v596_v14, %v582_v27  ;;  %v599_v39 = vadd.f32 %v597_v49, %v583_v29  ;;  %v3387_v28 = vadd.f32 %v585_v16, %v585_v16  ;;  %v638_v44 = vand.u32 2147483647, %v3352_v43 }
 0x100   :  { %v3399_v61 = vmul.f32 %v3385_v38, %v3385_v38  ;;  %v639_v23 = vand.u32 2147483647, %v3357_v62  ;;  %v748_v27 = vand.u32 2147483647, %v3361_v10  ;;  %v749_v41 = vand.u32 2147483647, %v3365_v45 }
 0x101   :  { %v602_v40 = vadd.f32 %v598_v46, %v598_v46  ;;  %v603_v35 = vadd.f32 %v599_v39, %v599_v39  ;;  %v3403_v6 = vmul.f32 %v3387_v28, %v3387_v28  ;;  %v747_v45 = vsel %vm745_vm7, 1.0, %v2866_v37 }
 0x102   :  { %v3410_v24 = vadd.f32 %v716_v33, %v3399_v61 }
 0x103   :  { %v3405_v56 = vmul.f32 %v602_v40, %v602_v40  ;;  %v3407_v21 = vmul.f32 %v603_v35, %v603_v35  ;;  %v3413_v42 = vadd.f32 %v717_v57, %v3403_v6  ;;  %v3445_v14 = vmul.f32 %v636_v9, %v602_v40 }
 0x104   :  { %2663 = vrsqrt.f32 %v3410_v24  ;;  %vm727_vm14 = vcmp.eq.f32.partialorder %v3410_v24, inf  ;;  %vm729_vm15 = vcmp.eq.f32.partialorder %v3410_v24, 0.0  ;;  %v730_v43 = vand.u32 2147483648, %v3410_v24 }
 0x105   :  { %v3416_v11 = vadd.f32 %v606_v36, %v3405_v56  ;;  %v3419_v3 = vadd.f32 %v607_v5, %v3407_v21  ;;  %v3447_v49 = vmul.f32 %v637_v55, %v603_v35  ;;  %vm739_vm4 = vcmp.eq.f32.partialorder %v3413_v42, inf }
 0x106   :  { %v674_v5 = vadd.f32 %v3332_v50, %v3328_v22  ;;  %vm741_vm5 = vcmp.eq.f32.partialorder %v3413_v42, 0.0 }
 0x107   :  { %2665 = vrsqrt.f32 %v3416_v11  ;;  %vm617_vm0 = vcmp.eq.f32.partialorder %v3416_v11, inf  ;;  %vm619_vm1 = vcmp.eq.f32.partialorder %v3416_v11, 0.0  ;;  %v620_v51 = vand.u32 2147483648, %v3416_v11 }
 0x108   :  { %2667 = vrsqrt.f32 %v3419_v3  ;;  %vm629_vm2 = vcmp.eq.f32.partialorder %v3419_v3, inf  ;;  %vm631_vm3 = vcmp.eq.f32.partialorder %v3419_v3, 0.0  ;;  %v632_v33 = vand.u32 2147483648, %v3419_v3 }
 0x109   :  { %2669 = vrsqrt.f32 %v3413_v42 }
 0x10a   :  { %v2664_v47 = vpop.eup %2663 }
 0x10b   :  { %v721_v25 = vmul.f32 %v2664_v47, %v3410_v24 }
 0x10d   :  { %v2666_v2 = vpop.eup %2665  ;;  %v722_v53 = vmul.f32 %v2664_v47, %v721_v25  ;;  %v675_v25 = vadd.f32 %v3344_v19, %v3330_v26  ;;  %v746_v19 = vsel %vm744_vm6, 1.0, %v2866_v37 }
 0x10e   :  { %v2668_v15 = vpop.eup %2667  ;;  %v611_v52 = vmul.f32 %v2666_v2, %v3416_v11 }
 0x10f   :  { %v2670_v63 = vpop.eup %2669  ;;  %v623_v17 = vmul.f32 %v2668_v15, %v3419_v3  ;;  %v723_v48 = vmul.f32 0.5, %v722_v53 }
 0x110   :  { %v612_v59 = vmul.f32 %v2666_v2, %v611_v52  ;;  %v733_v12 = vmul.f32 %v2670_v63, %v3413_v42 }
 0x111   :  { %v624_v34 = vmul.f32 %v2668_v15, %v623_v17  ;;  %v724_v54 = vsub.f32 1.5, %v723_v48 }
 0x112   :  { %v613_v29 = vmul.f32 0.5, %v612_v59  ;;  %v734_v62 = vmul.f32 %v2670_v63, %v733_v12 }
 0x113   :  { %v625_v20 = vmul.f32 0.5, %v624_v34  ;;  %v725_v46 = vmul.f32 %v2664_v47, %v724_v54  ;;  %v742_v47 = vand.u32 2147483648, %v3413_v42 }
 0x114   :  { %v614_v4 = vsub.f32 1.5, %v613_v29  ;;  %v735_v30 = vmul.f32 0.5, %v734_v62 }
 0x115   :  { %v626_v16 = vsub.f32 1.5, %v625_v20  ;;  %v726_v52 = vmul.f32 %v725_v46, %v3410_v24 }
 0x116   :  { %v615_v39 = vmul.f32 %v2666_v2, %v614_v4  ;;  %v736_v57 = vsub.f32 1.5, %v735_v30  ;;  %v780_v30 = vmul.f32 %v746_v19, %v3385_v38 }
 0x117   :  { %v627_v36 = vmul.f32 %v2668_v15, %v626_v16  ;;  %v728_v15 = vsel %vm727_vm14, %v3410_v24, %v726_v52  ;;  %v3509_v16 = vmul.f32 %v747_v45, %v3387_v28 }
 0x118   :  { %v616_v40 = vmul.f32 %v615_v39, %v3416_v11  ;;  %v737_v35 = vmul.f32 %v2670_v63, %v736_v57  ;;  %v731_v26 = vsel %vm729_vm15, %v730_v43, %v728_v15  ;;  %v784_v39 = vadd.f32 %v3346_v31, %v3337_v18 }
 0x119   :  { %v628_v2 = vmul.f32 %v627_v36, %v3419_v3  ;;  %v750_v17 = vadd.f32 %v748_v27, %v731_v26 }
 0x11a   :  { %v618_v22 = vsel %vm617_vm0, %v3416_v11, %v616_v40  ;;  %v738_v50 = vmul.f32 %v737_v35, %v3413_v42 }
 0x11b   :  { %v621_v63 = vsel %vm619_vm1, %v620_v51, %v618_v22  ;;  %v630_v10 = vsel %vm629_vm2, %v3419_v3, %v628_v2  ;;  %v3485_v29 = vadd.f32 1e-18, %v750_v17 }
 0x11c   :  { %v633_v53 = vsel %vm631_vm3, %v632_v33, %v630_v10  ;;  %v640_v59 = vadd.f32 %v638_v44, %v621_v63  ;;  %v676_v24 = vmul.f32 %v636_v9, %v621_v63  ;;  %v740_v12 = vsel %vm739_vm4, %v3413_v42, %v738_v50 }
 0x11d   :  { %v641_v34 = vadd.f32 %v639_v23, %v633_v53  ;;  %v677_v48 = vmul.f32 %v637_v55, %v633_v53  ;;  %v743_v11 = vsel %vm741_vm5, %v742_v47, %v740_v12  ;;  %v754_v23 = vmul.f32 %v3485_v29, %v3485_v29 }
 0x11e   :  { %v3487_v43 = vadd.f32 1e-18, %v640_v59  ;;  %v678_v62 = vsub.f32 %v674_v5, %v676_v24  ;;  %v3489_v27 = vadd.f32 %v676_v24, %v674_v5  ;;  %v751_v3 = vadd.f32 %v749_v41, %v743_v11 }
 0x11f   :  { %v3491_v51 = vadd.f32 1e-18, %v641_v34  ;;  %v679_v9 = vsub.f32 %v675_v25, %v677_v48  ;;  %v3493_v44 = vadd.f32 %v677_v48, %v675_v25  ;;  %v756_v54 = vadd.f32 %v754_v23, %v3399_v61 }
 0x120   :  { %v644_v42 = vmul.f32 %v3487_v43, %v3487_v43  ;;  %v3499_v55 = vadd.f32 1e-18, %v751_v3  ;;  %v785_v61 = vadd.f32 %v3348_v1, %v3342_v60  ;;  %v787_v57 = vmul.f32 %v747_v45, %v743_v11 }
 0x121   :  { %v645_v20 = vmul.f32 %v3491_v51, %v3491_v51  ;;  %2671 = vrsqrt.f32 %v756_v54  ;;  %v3517_v36 = vmul.f32 0.5, %v678_v62  ;;  %v3519_v38 = vmul.f32 0.5, %v679_v9 }
 0x122   :  { %v646_v41 = vadd.f32 %v644_v42, %v3405_v56  ;;  %v755_v4 = vmul.f32 %v3499_v55, %v3499_v55  ;;  %v786_v56 = vmul.f32 %v746_v19, %v731_v26  ;;  %v3523_v25 = vadd.f32 %v787_v57, %v785_v61 }
 0x123   :  { %v647_v46 = vadd.f32 %v645_v20, %v3407_v21  ;;  %v789_v21 = vsub.f32 %v785_v61, %v787_v57  ;;  %vm764_vm8 = vweird.f32 %v756_v54 }
 0x124   :  { %2673 = vrsqrt.f32 %v646_v41  ;;  %v757_v33 = vadd.f32 %v755_v4, %v3403_v6  ;;  %v788_v28 = vsub.f32 %v784_v39, %v786_v56  ;;  %v3521_v5 = vadd.f32 %v786_v56, %v784_v39 }
 0x125   :  { %2675 = vrsqrt.f32 %v647_v46  ;;  %v3527_v6 = vmul.f32 0.5, %v789_v21  ;;  %vm654_vm10 = vweird.f32 %v646_v41  ;;  %vm664_vm12 = vweird.f32 %v647_v46 }
 0x126   :  { %2677 = vrsqrt.f32 %v757_v33  ;;  %v3525_v31 = vmul.f32 0.5, %v788_v28  ;;  %vm774_vm15 = vweird.f32 %v757_v33 }
 0x127   :  { %v2672_v18 = vpop.eup %2671  ;;  %v3535_v47 = vsub.f32 %v3519_v38, %v3527_v6 }
 0x128   :  { %v759_v1 = vmul.f32 %v2672_v18, %v756_v54  ;;  %v3531_v35 = vsub.f32 %v3517_v36, %v3525_v31  ;;  %vm765_vm9 = vweird.f32 %v2672_v18 }
 0x129   :  { %vm766_vm14 = vmor %vm764_vm8, %vm765_vm9  ;;  %vm855_vm5 = vcmp.ge.f32.partialorder %v3535_v47, 0.0 }
 0x12a   :  { %v2674_v60 = vpop.eup %2673  ;;  %v760_v22 = vmul.f32 %v2672_v18, %v759_v1  ;;  %vm854_vm4 = vcmp.ge.f32.partialorder %v3531_v35, 0.0 }
 0x12b   :  { %v2676_v52 = vpop.eup %2675  ;;  %v649_v40 = vmul.f32 %v2674_v60, %v646_v41  ;;  %vm655_vm11 = vweird.f32 %v2674_v60 }
 0x12c   :  { %v2678_v2 = vpop.eup %2677  ;;  %v659_v15 = vmul.f32 %v2676_v52, %v647_v46  ;;  %v761_v63 = vmul.f32 0.5, %v760_v22  ;;  %vm665_vm13 = vweird.f32 %v2676_v52  ;;  %vm656_vm1 = vmor %vm654_vm10, %vm655_vm11 }
 0x12d   :  { %v650_v26 = vmul.f32 %v2674_v60, %v649_v40  ;;  %v769_v50 = vmul.f32 %v2678_v2, %v757_v33  ;;  %vm775_vm0 = vweird.f32 %v2678_v2  ;;  %vm666_vm2 = vmor %vm664_vm12, %vm665_vm13 }
 0x12e   :  { %v660_v19 = vmul.f32 %v2676_v52, %v659_v15  ;;  %v762_v53 = vsub.f32 1.5, %v761_v63  ;;  %vm776_vm3 = vmor %vm774_vm15, %vm775_vm0 }
 0x12f   :  { %v651_v10 = vmul.f32 0.5, %v650_v26  ;;  %v770_v45 = vmul.f32 %v2678_v2, %v769_v50 }
 0x130   :  { %v661_v17 = vmul.f32 0.5, %v660_v19  ;;  %v763_v34 = vmul.f32 %v2672_v18, %v762_v53 }
 0x131   :  { %v652_v59 = vsub.f32 1.5, %v651_v10  ;;  %v771_v24 = vmul.f32 0.5, %v770_v45 }
 0x132   :  { %v662_v12 = vsub.f32 1.5, %v661_v17  ;;  %v767_v3 = vsel %vm766_vm14, %v2672_v18, %v763_v34 }
 0x133   :  { %v653_v48 = vmul.f32 %v2674_v60, %v652_v59  ;;  %v772_v11 = vsub.f32 1.5, %v771_v24  ;;  %v778_v42 = vmul.f32 %v767_v3, %v3485_v29  ;;  %v782_v20 = vmul.f32 %v780_v30, %v767_v3 }
 0x134   :  { %v663_v62 = vmul.f32 %v2676_v52, %v662_v12 }
 0x135   :  { %v657_v9 = vsel %vm656_vm1, %v2674_v60, %v653_v48  ;;  %v773_v23 = vmul.f32 %v2678_v2, %v772_v11 }
 0x136   :  { %v667_v54 = vsel %vm666_vm2, %v2676_v52, %v663_v62  ;;  %v668_v41 = vmul.f32 %v657_v9, %v3487_v43  ;;  %v672_v4 = vmul.f32 %v3445_v14, %v657_v9 }
 0x137   :  { %v669_v46 = vmul.f32 %v667_v54, %v3491_v51  ;;  %v673_v39 = vmul.f32 %v3447_v49, %v667_v54  ;;  %v777_v33 = vsel %vm776_vm3, %v2678_v2, %v773_v23 }
 0x138   :  { %v686_v61 = vmul.f32 %v668_v41, %v3293_v13  ;;  %v688_v56 = vmul.f32 %v672_v4, %v3373_v58  ;;  %v692_v57 = vmul.f32 %v672_v4, %v3293_v13  ;;  %v694_v28 = vmul.f32 %v668_v41, %v3373_v58 }
 0x139   :  { %v687_v29 = vmul.f32 %v669_v46, %v3297_v7  ;;  %v689_v30 = vmul.f32 %v673_v39, %v3377_v0  ;;  %v693_v43 = vmul.f32 %v673_v39, %v3297_v7  ;;  %v695_v14 = vmul.f32 %v669_v46, %v3377_v0 }
 0x13a   :  { %v690_v51 = vsub.f32 %v686_v61, %v688_v56  ;;  %v696_v21 = vadd.f32 %v694_v28, %v692_v57  ;;  %v698_v49 = vmul.f32 %v668_v41, %v3381_v8  ;;  %v699_v18 = vmul.f32 %v669_v46, %v3383_v32 }
 0x13b   :  { %v691_v60 = vsub.f32 %v687_v29, %v689_v30  ;;  %v697_v1 = vadd.f32 %v695_v14, %v693_v43  ;;  %v700_v52 = vmul.f32 0.0, %v672_v4  ;;  %v701_v13 = vmul.f32 0.0, %v673_v39 }
 0x13c   :  { %v704_v58 = vmul.f32 %v672_v4, %v3381_v8  ;;  %v705_v40 = vmul.f32 %v673_v39, %v3383_v32  ;;  %v706_v2 = vmul.f32 0.0, %v668_v41  ;;  %v707_v15 = vmul.f32 0.0, %v669_v46 }
 0x13d   :  { %v702_v22 = vsub.f32 %v698_v49, %v700_v52  ;;  %v703_v7 = vsub.f32 %v699_v18, %v701_v13  ;;  %v779_v0 = vmul.f32 %v777_v33, %v3499_v55  ;;  %v783_v26 = vmul.f32 %v3509_v16, %v777_v33 }
 0x13e   :  { %v708_v50 = vadd.f32 %v706_v2, %v704_v58  ;;  %v709_v19 = vadd.f32 %v707_v15, %v705_v40  ;;  %v796_v63 = vmul.f32 %v778_v42, %v690_v51  ;;  %v802_v10 = vmul.f32 %v782_v20, %v690_v51 }
 0x13f   :  { %v797_v45 = vmul.f32 %v779_v0, %v691_v60  ;;  %v798_v17 = vmul.f32 %v782_v20, %v702_v22  ;;  %v799_v53 = vmul.f32 %v783_v26, %v703_v7  ;;  %v803_v59 = vmul.f32 %v783_v26, %v691_v60 }
 0x140   :  { %v804_v24 = vmul.f32 %v778_v42, %v702_v22  ;;  %v805_v8 = vmul.f32 %v779_v0, %v703_v7  ;;  %v808_v12 = vmul.f32 %v778_v42, %v696_v21  ;;  %v809_v32 = vmul.f32 %v779_v0, %v697_v1 }
 0x141   :  { %v800_v34 = vsub.f32 %v796_v63, %v798_v17  ;;  %v801_v48 = vsub.f32 %v797_v45, %v799_v53  ;;  %v810_v11 = vmul.f32 %v782_v20, %v708_v50  ;;  %v811_v62 = vmul.f32 %v783_v26, %v709_v19 }
 0x142   :  { %v3556_v3 = vadd.f32 %v804_v24, %v802_v10  ;;  %v3558_v55 = vadd.f32 %v805_v8, %v803_v59  ;;  %v814_v16 = vmul.f32 %v782_v20, %v696_v21  ;;  %v815_v9 = vmul.f32 %v783_v26, %v697_v1 }
 0x143   :  { %v3560_v23 = vsub.f32 %v808_v12, %v810_v11  ;;  %v3562_v54 = vsub.f32 %v809_v32, %v811_v62  ;;  %v816_v41 = vmul.f32 %v778_v42, %v708_v50  ;;  %v817_v4 = vmul.f32 %v779_v0, %v709_v19 }
 0x144   :  { %v822_v46 = vadd.f32 %v800_v34, %v800_v34  ;;  %v823_v39 = vadd.f32 %v801_v48, %v801_v48  ;;  %v826_v33 = vmul.f32 %v3531_v35, %v3531_v35  ;;  %v827_v61 = vmul.f32 %v3535_v47, %v3535_v47 }
 0x145   :  { %v3568_v56 = vadd.f32 %v816_v41, %v814_v16  ;;  %v3570_v57 = vadd.f32 %v817_v4, %v815_v9  ;;  %v856_v60 = vsel %vm854_vm4, 1.0, %v2866_v37  ;;  %v857_v1 = vsel %vm855_vm5, 1.0, %v2866_v37 }
 0x146   :  { %v824_v20 = vmul.f32 %v822_v46, %v822_v46  ;;  %v825_v28 = vmul.f32 %v823_v39, %v823_v39  ;;  %v3576_v40 = vmul.f32 %v856_v60, %v822_v46  ;;  %v3578_v2 = vmul.f32 %v857_v1, %v823_v39 }
 0x147   :  { %v858_v22 = vand.u32 2147483647, %v3531_v35  ;;  %v894_v26 = vadd.f32 %v3525_v31, %v3517_v36  ;;  %v895_v50 = vadd.f32 %v3527_v6, %v3519_v38  ;;  %v859_v45 = vand.u32 2147483647, %v3535_v47 }
 0x148   :  { %v828_v29 = vadd.f32 %v826_v33, %v824_v20  ;;  %v829_v30 = vadd.f32 %v827_v61, %v825_v28  ;;  %v3587_v36 = vmul.f32 0.5, %v3489_v27  ;;  %v3590_v34 = vmul.f32 0.5, %v3493_v44 }
 0x149   :  { %v3595_v9 = vmul.f32 0.5, %v3521_v5  ;;  %v3598_v41 = vmul.f32 0.5, %v3523_v25 }
 0x14a   :  { %2679 = vrsqrt.f32 %v828_v29  ;;  %vm837_vm6 = vcmp.eq.f32.partialorder %v828_v29, inf  ;;  %v840_v7 = vand.u32 2147483648, %v828_v29  ;;  %vm839_vm7 = vcmp.eq.f32.partialorder %v828_v29, 0.0 }
 0x14b   :  { %2681 = vrsqrt.f32 %v829_v30  ;;  %vm849_vm8 = vcmp.eq.f32.partialorder %v829_v30, inf  ;;  %v852_v63 = vand.u32 2147483648, %v829_v30  ;;  %vm851_vm9 = vcmp.eq.f32.partialorder %v829_v30, 0.0 }
 0x150   :  { %v2680_v42 = vpop.eup %2679 }
 0x151   :  { %v2682_v43 = vpop.eup %2681  ;;  %v831_v14 = vmul.f32 %v2680_v42, %v828_v29 }
 0x152   :  { %v843_v51 = vmul.f32 %v2682_v43, %v829_v30 }
 0x153   :  { %v832_v21 = vmul.f32 %v2680_v42, %v831_v14 }
 0x154   :  { %v844_v49 = vmul.f32 %v2682_v43, %v843_v51 }
 0x155   :  { %v833_v18 = vmul.f32 0.5, %v832_v21 }
 0x156   :  { %v845_v52 = vmul.f32 0.5, %v844_v49 }
 0x157   :  { %v834_v13 = vsub.f32 1.5, %v833_v18 }
 0x158   :  { %v846_v58 = vsub.f32 1.5, %v845_v52 }
 0x159   :  { %v835_v15 = vmul.f32 %v2680_v42, %v834_v13 }
 0x15a   :  { %v847_v0 = vmul.f32 %v2682_v43, %v846_v58 }
 0x15b   :  { %v836_v19 = vmul.f32 %v835_v15, %v828_v29 }
 0x15c   :  { %v848_v10 = vmul.f32 %v847_v0, %v829_v30 }
 0x15d   :  { %v838_v17 = vsel %vm837_vm6, %v828_v29, %v836_v19 }
 0x15e   :  { %v841_v53 = vsel %vm839_vm7, %v840_v7, %v838_v17  ;;  %v850_v59 = vsel %vm849_vm8, %v829_v30, %v848_v10 }
 0x15f   :  { %v853_v35 = vsel %vm851_vm9, %v852_v63, %v850_v59  ;;  %v860_v24 = vadd.f32 %v858_v22, %v841_v53  ;;  %v896_v8 = vmul.f32 %v856_v60, %v841_v53 }
 0x160   :  { %v861_v12 = vadd.f32 %v859_v45, %v853_v35  ;;  %v897_v32 = vmul.f32 %v857_v1, %v853_v35 }
 0x161   :  { %v862_v38 = vadd.f32 1e-18, %v860_v24  ;;  %v898_v31 = vsub.f32 %v894_v26, %v896_v8  ;;  %v902_v6 = vadd.f32 %v896_v8, %v894_v26 }
 0x162   :  { %v863_v48 = vadd.f32 1e-18, %v861_v12  ;;  %v899_v11 = vsub.f32 %v895_v50, %v897_v32  ;;  %v903_v47 = vadd.f32 %v897_v32, %v895_v50 }
 0x163   :  { %v864_v62 = vmul.f32 %v862_v38, %v862_v38  ;;  %v3592_v16 = vmul.f32 0.5, %v898_v31  ;;  %v3602_v39 = vmul.f32 0.5, %v902_v6 }
 0x164   :  { %v865_v27 = vmul.f32 %v863_v48, %v863_v48  ;;  %v3600_v4 = vmul.f32 0.5, %v899_v11  ;;  %v3604_v44 = vmul.f32 0.5, %v903_v47 }
 0x165   :  { %v866_v46 = vadd.f32 %v864_v62, %v824_v20  ;;  %v3608_v33 = vsub.f32 %v3587_v36, %v3592_v16  ;;  %v3616_v25 = vsub.f32 %v3602_v39, %v3595_v9 }
 0x166   :  { %v867_v61 = vadd.f32 %v865_v27, %v825_v28  ;;  %v3612_v5 = vsub.f32 %v3590_v34, %v3600_v4  ;;  %v3620_v20 = vsub.f32 %v3604_v44, %v3598_v41 }
 0x167   :  { %2683 = vrsqrt.f32 %v866_v46  ;;  %vm874_vm10 = vweird.f32 %v866_v46  ;;  %vm960_vm0 = vcmp.ge.f32.partialorder %v3608_v33, 0.0 }
 0x168   :  { %2685 = vrsqrt.f32 %v867_v61  ;;  %vm884_vm12 = vweird.f32 %v867_v61  ;;  %v933_v11 = vmul.f32 %v3612_v5, %v3612_v5  ;;  %vm961_vm1 = vcmp.ge.f32.partialorder %v3612_v5, 0.0 }
 0x16d   :  { %v2684_v29 = vpop.eup %2683 }
 0x16e   :  { %v2686_v30 = vpop.eup %2685  ;;  %v869_v42 = vmul.f32 %v2684_v29, %v866_v46  ;;  %vm875_vm11 = vweird.f32 %v2684_v29 }
 0x16f   :  { %v879_v43 = vmul.f32 %v2686_v30, %v867_v61  ;;  %vm885_vm13 = vweird.f32 %v2686_v30  ;;  %vm876_vm14 = vmor %vm874_vm10, %vm875_vm11  ;;  %vm1070_vm10 = vcmp.ge.f32.partialorder %v3616_v25, 0.0  ;;  %vm1071_vm11 = vcmp.ge.f32.partialorder %v3620_v20, 0.0 }
 0x170   :  { %v870_v14 = vmul.f32 %v2684_v29, %v869_v42  ;;  %vm886_vm15 = vmor %vm884_vm12, %vm885_vm13 }
 0x171   :  { %v880_v28 = vmul.f32 %v2686_v30, %v879_v43 }
 0x172   :  { %v871_v51 = vmul.f32 0.5, %v870_v14 }
 0x173   :  { %v881_v21 = vmul.f32 0.5, %v880_v28 }
 0x174   :  { %v872_v49 = vsub.f32 1.5, %v871_v51 }
 0x175   :  { %v882_v18 = vsub.f32 1.5, %v881_v21 }
 0x176   :  { %v873_v60 = vmul.f32 %v2684_v29, %v872_v49 }
 0x177   :  { %v883_v1 = vmul.f32 %v2686_v30, %v882_v18 }
 0x178   :  { %v877_v52 = vsel %vm876_vm14, %v2684_v29, %v873_v60  ;;  %v962_v60 = vsel %vm960_vm0, 1.0, %v2866_v37 }
 0x179   :  { %v887_v13 = vsel %vm886_vm15, %v2686_v30, %v883_v1  ;;  %v888_v58 = vmul.f32 %v877_v52, %v862_v38  ;;  %v892_v15 = vmul.f32 %v3576_v40, %v877_v52  ;;  %v963_v1 = vsel %vm961_vm1, 1.0, %v2866_v37 }
 0x17a   :  { %v889_v22 = vmul.f32 %v887_v13, %v863_v48  ;;  %v893_v7 = vmul.f32 %v3578_v2, %v887_v13  ;;  %v932_v48 = vmul.f32 %v3608_v33, %v3608_v33 }
 0x17b   :  { %v906_v0 = vmul.f32 0.0, %v888_v58  ;;  %v908_v26 = vmul.f32 %v892_v15, %v3556_v3  ;;  %v912_v50 = vmul.f32 0.0, %v892_v15  ;;  %v914_v19 = vmul.f32 %v888_v58, %v3556_v3 }
 0x17c   :  { %v907_v63 = vmul.f32 0.0, %v889_v22  ;;  %v909_v10 = vmul.f32 %v893_v7, %v3558_v55  ;;  %v913_v45 = vmul.f32 0.0, %v893_v7  ;;  %v915_v17 = vmul.f32 %v889_v22, %v3558_v55 }
 0x17d   :  { %v3628_v53 = vsub.f32 %v906_v0, %v908_v26  ;;  %v916_v59 = vadd.f32 %v914_v19, %v912_v50  ;;  %v918_v40 = vmul.f32 %v888_v58, %v3560_v23  ;;  %v919_v35 = vmul.f32 %v889_v22, %v3562_v54 }
 0x17e   :  { %v3632_v2 = vsub.f32 %v907_v63, %v909_v10  ;;  %v917_v24 = vadd.f32 %v915_v17, %v913_v45  ;;  %v922_v8 = vmul.f32 %v892_v15, %v3560_v23  ;;  %v923_v3 = vmul.f32 %v893_v7, %v3562_v54 }
 0x17f   :  { %v920_v12 = vsub.f32 %v918_v40, %v912_v50  ;;  %v921_v32 = vsub.f32 %v919_v35, %v913_v45  ;;  %v3644_v47 = vadd.f32 %v916_v59, %v916_v59  ;;  %v1042_v23 = vmul.f32 %v3616_v25, %v3616_v25 }
 0x180   :  { %v3636_v38 = vadd.f32 %v922_v8, %v906_v0  ;;  %v3638_v31 = vadd.f32 %v923_v3, %v907_v63  ;;  %v3646_v62 = vadd.f32 %v917_v24, %v917_v24  ;;  %v1043_v54 = vmul.f32 %v3620_v20, %v3620_v20 }
 0x181   :  { %v928_v55 = vadd.f32 %v920_v12, %v920_v12  ;;  %v929_v6 = vadd.f32 %v921_v32, %v921_v32  ;;  %v3658_v61 = vmul.f32 %v3644_v47, %v3644_v47  ;;  %v964_v58 = vand.u32 2147483647, %v3608_v33 }
 0x182   :  { %v3662_v29 = vmul.f32 %v3646_v62, %v3646_v62  ;;  %v965_v15 = vand.u32 2147483647, %v3612_v5  ;;  %v1074_v26 = vand.u32 2147483647, %v3616_v25  ;;  %v1075_v50 = vand.u32 2147483647, %v3620_v20 }
 0x183   :  { %v3652_v27 = vmul.f32 %v928_v55, %v928_v55  ;;  %v3654_v46 = vmul.f32 %v929_v6, %v929_v6  ;;  %v3671_v43 = vadd.f32 %v1042_v23, %v3658_v61  ;;  %v3698_v35 = vmul.f32 %v962_v60, %v928_v55 }
 0x184   :  { %v3674_v14 = vadd.f32 %v1043_v54, %v3662_v29  ;;  %v3700_v24 = vmul.f32 %v963_v1, %v929_v6 }
 0x185   :  { %v3665_v30 = vadd.f32 %v932_v48, %v3652_v27  ;;  %v3668_v42 = vadd.f32 %v933_v11, %v3654_v46  ;;  %vm1053_vm6 = vcmp.eq.f32.partialorder %v3671_v43, inf  ;;  %vm1055_vm7 = vcmp.eq.f32.partialorder %v3671_v43, 0.0 }
 0x186   :  { %v3706_v48 = vadd.f32 %v3592_v16, %v3587_v36  ;;  %v3710_v11 = vadd.f32 %v3600_v4, %v3590_v34  ;;  %v1056_v54 = vand.u32 2147483648, %v3671_v43  ;;  %vm1065_vm8 = vcmp.eq.f32.partialorder %v3674_v14, inf }
 0x187   :  { %2687 = vrsqrt.f32 %v3665_v30  ;;  %vm943_vm2 = vcmp.eq.f32.partialorder %v3665_v30, inf  ;;  %vm945_vm3 = vcmp.eq.f32.partialorder %v3665_v30, 0.0  ;;  %v946_v10 = vand.u32 2147483648, %v3665_v30 }
 0x188   :  { %2689 = vrsqrt.f32 %v3668_v42  ;;  %vm955_vm4 = vcmp.eq.f32.partialorder %v3668_v42, inf  ;;  %vm957_vm5 = vcmp.eq.f32.partialorder %v3668_v42, 0.0  ;;  %v958_v17 = vand.u32 2147483648, %v3668_v42 }
 0x189   :  { %2691 = vrsqrt.f32 %v3671_v43  ;;  %vm1067_vm9 = vcmp.eq.f32.partialorder %v3674_v14, 0.0  ;;  %v1068_v36 = vand.u32 2147483648, %v3674_v14 }
 0x18a   :  { %2693 = vrsqrt.f32 %v3674_v14 }
 0x18d   :  { %v2688_v28 = vpop.eup %2687 }
 0x18e   :  { %v2690_v51 = vpop.eup %2689  ;;  %v937_v21 = vmul.f32 %v2688_v28, %v3665_v30 }
 0x18f   :  { %v2692_v49 = vpop.eup %2691  ;;  %v949_v18 = vmul.f32 %v2690_v51, %v3668_v42 }
 0x190   :  { %v2694_v52 = vpop.eup %2693  ;;  %v938_v13 = vmul.f32 %v2688_v28, %v937_v21  ;;  %v1047_v22 = vmul.f32 %v2692_v49, %v3671_v43 }
 0x191   :  { %v950_v7 = vmul.f32 %v2690_v51, %v949_v18  ;;  %v1059_v0 = vmul.f32 %v2694_v52, %v3674_v14  ;;  %v1072_v18 = vsel %vm1070_vm10, 1.0, %v2866_v37 }
 0x192   :  { %v939_v19 = vmul.f32 0.5, %v938_v13  ;;  %v1048_v63 = vmul.f32 %v2692_v49, %v1047_v22 }
 0x193   :  { %v951_v33 = vmul.f32 0.5, %v950_v7  ;;  %v1060_v5 = vmul.f32 %v2694_v52, %v1059_v0 }
 0x194   :  { %v940_v45 = vsub.f32 1.5, %v939_v19  ;;  %v1049_v59 = vmul.f32 0.5, %v1048_v63 }
 0x195   :  { %v952_v40 = vsub.f32 1.5, %v951_v33  ;;  %v1061_v8 = vmul.f32 0.5, %v1060_v5 }
 0x196   :  { %v941_v3 = vmul.f32 %v2688_v28, %v940_v45  ;;  %v1050_v12 = vsub.f32 1.5, %v1049_v59 }
 0x197   :  { %v953_v32 = vmul.f32 %v2690_v51, %v952_v40  ;;  %v1062_v55 = vsub.f32 1.5, %v1061_v8  ;;  %v3770_v40 = vmul.f32 %v1072_v18, %v3644_v47 }
 0x198   :  { %v942_v6 = vmul.f32 %v941_v3, %v3665_v30  ;;  %v1051_v23 = vmul.f32 %v2692_v49, %v1050_v12 }
 0x199   :  { %v954_v28 = vmul.f32 %v953_v32, %v3668_v42  ;;  %v1063_v21 = vmul.f32 %v2694_v52, %v1062_v55 }
 0x19a   :  { %v944_v34 = vsel %vm943_vm2, %v3665_v30, %v942_v6  ;;  %v1052_v16 = vmul.f32 %v1051_v23, %v3671_v43 }
 0x19b   :  { %v947_v4 = vsel %vm945_vm3, %v946_v10, %v944_v34  ;;  %v956_v51 = vsel %vm955_vm4, %v3668_v42, %v954_v28  ;;  %v1064_v49 = vmul.f32 %v1063_v21, %v3674_v14  ;;  %v1073_v10 = vsel %vm1071_vm11, 1.0, %v2866_v37 }
 0x19c   :  { %v959_v52 = vsel %vm957_vm5, %v958_v17, %v956_v51  ;;  %v966_v13 = vadd.f32 %v964_v58, %v947_v4  ;;  %v3733_v22 = vmul.f32 %v962_v60, %v947_v4  ;;  %v1054_v25 = vsel %vm1053_vm6, %v3671_v43, %v1052_v16 }
 0x19d   :  { %v967_v30 = vadd.f32 %v965_v15, %v959_v52  ;;  %v3738_v7 = vmul.f32 %v963_v1, %v959_v52  ;;  %v1057_v0 = vsel %vm1055_vm7, %v1056_v54, %v1054_v25  ;;  %v1066_v19 = vsel %vm1065_vm8, %v3674_v14, %v1064_v49 }
 0x19e   :  { %v3745_v63 = vadd.f32 1e-18, %v966_v13  ;;  %v1004_v42 = vsub.f32 %v3706_v48, %v3733_v22  ;;  %v1008_v60 = vadd.f32 %v3733_v22, %v3706_v48  ;;  %v1069_v58 = vsel %vm1067_vm9, %v1068_v36, %v1066_v19 }
 0x19f   :  { %v3753_v1 = vadd.f32 1e-18, %v967_v30  ;;  %v1005_v43 = vsub.f32 %v3710_v11, %v3738_v7  ;;  %v1009_v15 = vadd.f32 %v3738_v7, %v3710_v11  ;;  %v1076_v5 = vadd.f32 %v1074_v26, %v1057_v0 }
 0x1a0   :  { %v970_v33 = vmul.f32 %v3745_v63, %v3745_v63  ;;  %v1077_v45 = vadd.f32 %v1075_v50, %v1069_v58  ;;  %v3773_v8 = vmul.f32 %v1073_v10, %v3646_v62  ;;  %v1110_v26 = vadd.f32 %v3602_v39, %v3595_v9 }
 0x1a1   :  { %v971_v14 = vmul.f32 %v3753_v1, %v3753_v1  ;;  %v3767_v59 = vadd.f32 1e-18, %v1076_v5  ;;  %v1111_v50 = vadd.f32 %v3604_v44, %v3598_v41  ;;  %v1112_v12 = vmul.f32 %v1072_v18, %v1057_v0 }
 0x1a2   :  { %v972_v17 = vadd.f32 %v970_v33, %v3652_v27  ;;  %v3776_v3 = vadd.f32 1e-18, %v1077_v45  ;;  %v1113_v62 = vmul.f32 %v1073_v10, %v1069_v58  ;;  %v3786_v32 = vmul.f32 0.5, %v1008_v60 }
 0x1a3   :  { %v973_v20 = vadd.f32 %v971_v14, %v3654_v46  ;;  %v1080_v27 = vmul.f32 %v3767_v59, %v3767_v59  ;;  %v1114_v55 = vsub.f32 %v1110_v26, %v1112_v12  ;;  %v3791_v9 = vadd.f32 %v1112_v12, %v1110_v26 }
 0x1a4   :  { %2695 = vrsqrt.f32 %v972_v17  ;;  %v1081_v47 = vmul.f32 %v3776_v3, %v3776_v3  ;;  %v3793_v39 = vmul.f32 0.5, %v1009_v15  ;;  %v1115_v44 = vsub.f32 %v1111_v50, %v1113_v62 }
 0x1a5   :  { %2697 = vrsqrt.f32 %v973_v20  ;;  %v3789_v46 = vadd.f32 %v1080_v27, %v3658_v61  ;;  %v3798_v6 = vadd.f32 %v1113_v62, %v1111_v50  ;;  %v3801_v23 = vmul.f32 0.5, %v1114_v55 }
 0x1a6   :  { %v3796_v41 = vadd.f32 %v1081_v47, %v3662_v29  ;;  %v3804_v54 = vmul.f32 0.5, %v1115_v44  ;;  %vm980_vm12 = vweird.f32 %v972_v17  ;;  %vm990_vm14 = vweird.f32 %v973_v20 }
 0x1a7   :  { %2699 = vrsqrt.f32 %v3789_v46  ;;  %v3808_v28 = vsub.f32 %v3786_v32, %v3801_v23  ;;  %vm1090_vm2 = vweird.f32 %v3789_v46 }
 0x1a8   :  { %2701 = vrsqrt.f32 %v3796_v41  ;;  %v3812_v29 = vsub.f32 %v3793_v39, %v3804_v54  ;;  %vm1100_vm4 = vweird.f32 %v3796_v41 }
 0x1a9   :  { %vm1180_vm8 = vcmp.ge.f32.partialorder %v3808_v28, 0.0 }
 0x1aa   :  { %v2696_v61 = vpop.eup %2695  ;;  %vm1181_vm9 = vcmp.ge.f32.partialorder %v3812_v29, 0.0 }
 0x1ab   :  { %v2698_v21 = vpop.eup %2697  ;;  %v975_v36 = vmul.f32 %v2696_v61, %v972_v17  ;;  %vm981_vm13 = vweird.f32 %v2696_v61 }
 0x1ac   :  { %v985_v34 = vmul.f32 %v2698_v21, %v973_v20  ;;  %vm991_vm15 = vweird.f32 %v2698_v21  ;;  %vm982_vm0 = vmor %vm980_vm12, %vm981_vm13 }
 0x1ad   :  { %v976_v16 = vmul.f32 %v2696_v61, %v975_v36  ;;  %v2700_v4 = vpop.eup %2699  ;;  %vm992_vm1 = vmor %vm990_vm14, %vm991_vm15 }
 0x1ae   :  { %v986_v51 = vmul.f32 %v2698_v21, %v985_v34  ;;  %v3814_v49 = vpop.eup %2701  ;;  %v1085_v52 = vmul.f32 %v2700_v4, %v3789_v46  ;;  %vm1091_vm3 = vweird.f32 %v2700_v4 }
 0x1af   :  { %v977_v18 = vmul.f32 0.5, %v976_v16  ;;  %v1095_v25 = vmul.f32 %v3814_v49, %v3796_v41  ;;  %vm1101_vm5 = vweird.f32 %v3814_v49  ;;  %vm1092_vm6 = vmor %vm1090_vm2, %vm1091_vm3 }
 0x1b0   :  { %v987_v13 = vmul.f32 0.5, %v986_v51  ;;  %v1086_v0 = vmul.f32 %v2700_v4, %v1085_v52  ;;  %vm1102_vm7 = vmor %vm1100_vm4, %vm1101_vm5 }
 0x1b1   :  { %v978_v30 = vsub.f32 1.5, %v977_v18  ;;  %v1096_v60 = vmul.f32 %v3814_v49, %v1095_v25 }
 0x1b2   :  { %v988_v19 = vsub.f32 1.5, %v987_v13  ;;  %v1087_v15 = vmul.f32 0.5, %v1086_v0 }
 0x1b3   :  { %v979_v58 = vmul.f32 %v2696_v61, %v978_v30  ;;  %v1097_v33 = vmul.f32 0.5, %v1096_v60 }
 0x1b4   :  { %v989_v10 = vmul.f32 %v2698_v21, %v988_v19  ;;  %v1088_v14 = vsub.f32 1.5, %v1087_v15 }
 0x1b5   :  { %v983_v5 = vsel %vm982_vm0, %v2696_v61, %v979_v58  ;;  %v1098_v12 = vsub.f32 1.5, %v1097_v33 }
 0x1b6   :  { %v993_v45 = vsel %vm992_vm1, %v2698_v21, %v989_v10  ;;  %v994_v17 = vmul.f32 %v983_v5, %v3745_v63  ;;  %v998_v20 = vmul.f32 %v3698_v35, %v983_v5  ;;  %v1089_v27 = vmul.f32 %v2700_v4, %v1088_v14 }
 0x1b7   :  { %v995_v26 = vmul.f32 %v993_v45, %v3753_v1  ;;  %v999_v50 = vmul.f32 %v3700_v24, %v993_v45  ;;  %v1099_v30 = vmul.f32 %v3814_v49, %v1098_v12 }
 0x1b8   :  { %v1012_v47 = vmul.f32 %v994_v17, %v3628_v53  ;;  %v1014_v62 = vmul.f32 %v998_v20, %v3568_v56  ;;  %v1018_v55 = vmul.f32 %v998_v20, %v3628_v53  ;;  %v1020_v44 = vmul.f32 %v994_v17, %v3568_v56 }
 0x1b9   :  { %v1013_v63 = vmul.f32 %v995_v26, %v3632_v2  ;;  %v1015_v35 = vmul.f32 %v999_v50, %v3570_v57  ;;  %v1019_v61 = vmul.f32 %v999_v50, %v3632_v2  ;;  %v1021_v1 = vmul.f32 %v995_v26, %v3570_v57 }
 0x1ba   :  { %v1016_v21 = vsub.f32 %v1012_v47, %v1014_v62  ;;  %v1022_v24 = vadd.f32 %v1020_v44, %v1018_v55  ;;  %v1024_v36 = vmul.f32 0.0, %v994_v17  ;;  %v1025_v34 = vmul.f32 0.0, %v995_v26 }
 0x1bb   :  { %v1017_v16 = vsub.f32 %v1013_v63, %v1015_v35  ;;  %v1023_v53 = vadd.f32 %v1021_v1, %v1019_v61  ;;  %v1026_v56 = vmul.f32 %v998_v20, %v3636_v38  ;;  %v1027_v51 = vmul.f32 %v999_v50, %v3638_v31 }
 0x1bc   :  { %v1030_v18 = vmul.f32 0.0, %v998_v20  ;;  %v1031_v52 = vmul.f32 0.0, %v999_v50  ;;  %v1032_v2 = vmul.f32 %v994_v17, %v3636_v38  ;;  %v1033_v57 = vmul.f32 %v995_v26, %v3638_v31 }
 0x1bd   :  { %v1028_v13 = vsub.f32 %v1024_v36, %v1026_v56  ;;  %v1029_v46 = vsub.f32 %v1025_v34, %v1027_v51  ;;  %v1093_v25 = vsel %vm1092_vm6, %v2700_v4, %v1089_v27  ;;  %v1103_v38 = vsel %vm1102_vm7, %v3814_v49, %v1099_v30 }
 0x1be   :  { %v1034_v0 = vadd.f32 %v1032_v2, %v1030_v18  ;;  %v1035_v19 = vadd.f32 %v1033_v57, %v1031_v52  ;;  %v1104_v60 = vmul.f32 %v1093_v25, %v3767_v59  ;;  %v1108_v58 = vmul.f32 %v3770_v40, %v1093_v25 }
 0x1bf   :  { %v1105_v31 = vmul.f32 %v1103_v38, %v3776_v3  ;;  %v1109_v15 = vmul.f32 %v3773_v8, %v1103_v38  ;;  %v1152_v35 = vmul.f32 %v3808_v28, %v3808_v28  ;;  %v1153_v36 = vmul.f32 %v3812_v29, %v3812_v29 }
 0x1c0   :  { %v1122_v10 = vmul.f32 %v1104_v60, %v1016_v21  ;;  %v1124_v41 = vmul.f32 %v1108_v58, %v1028_v13  ;;  %v1128_v33 = vmul.f32 %v1108_v58, %v1016_v21  ;;  %v1130_v5 = vmul.f32 %v1104_v60, %v1028_v13 }
 0x1c1   :  { %v1134_v14 = vmul.f32 %v1104_v60, %v1022_v24  ;;  %v1136_v4 = vmul.f32 %v1108_v58, %v1034_v0  ;;  %v1123_v45 = vmul.f32 %v1105_v31, %v1017_v16  ;;  %v1125_v17 = vmul.f32 %v1109_v15, %v1029_v46 }
 0x1c2   :  { %v3852_v20 = vsub.f32 %v1122_v10, %v1124_v41  ;;  %v1129_v26 = vmul.f32 %v1109_v15, %v1017_v16  ;;  %v1131_v59 = vmul.f32 %v1105_v31, %v1029_v46  ;;  %v3854_v50 = vadd.f32 %v1130_v5, %v1128_v33 }
 0x1c3   :  { %v1135_v40 = vmul.f32 %v1105_v31, %v1023_v53  ;;  %v1137_v49 = vmul.f32 %v1109_v15, %v1035_v19  ;;  %v3856_v27 = vsub.f32 %v1123_v45, %v1125_v17  ;;  %v1138_v3 = vsub.f32 %v1134_v14, %v1136_v4 }
 0x1c4   :  { %v1140_v8 = vmul.f32 %v1108_v58, %v1022_v24  ;;  %v1141_v12 = vmul.f32 %v1109_v15, %v1023_v53  ;;  %v3858_v47 = vadd.f32 %v1131_v59, %v1129_v26  ;;  %v1142_v55 = vmul.f32 %v1104_v60, %v1034_v0 }
 0x1c5   :  { %v1139_v62 = vsub.f32 %v1135_v40, %v1137_v49  ;;  %v1143_v44 = vmul.f32 %v1105_v31, %v1035_v19  ;;  %v1148_v63 = vadd.f32 %v1138_v3, %v1138_v3  ;;  %v1182_v46 = vsel %vm1180_vm8, 1.0, %v2866_v37 }
 0x1c6   :  { %v3862_v61 = vadd.f32 %v1142_v55, %v1140_v8  ;;  %v1183_v25 = vsel %vm1181_vm9, 1.0, %v2866_v37  ;;  %v1184_v31 = vand.u32 2147483647, %v3808_v28  ;;  %v1220_v41 = vadd.f32 %v3801_v23, %v3786_v32 }
 0x1c7   :  { %v3864_v1 = vadd.f32 %v1143_v44, %v1141_v12  ;;  %v1149_v21 = vadd.f32 %v1139_v62, %v1139_v62  ;;  %v1150_v34 = vmul.f32 %v1148_v63, %v1148_v63  ;;  %v3872_v60 = vmul.f32 %v1182_v46, %v1148_v63 }
 0x1c8   :  { %v1221_v33 = vadd.f32 %v3804_v54, %v3793_v39  ;;  %v1185_v45 = vand.u32 2147483647, %v3812_v29  ;;  %v3883_v32 = vmul.f32 0.5, %v3791_v9  ;;  %v3886_v12 = vmul.f32 0.5, %v3798_v6 }
 0x1c9   :  { %v1151_v24 = vmul.f32 %v1149_v21, %v1149_v21  ;;  %v1154_v16 = vadd.f32 %v1152_v35, %v1150_v34  ;;  %v3874_v58 = vmul.f32 %v1183_v25, %v1149_v21  ;;  %v3893_v35 = vmul.f32 0.5, %v1004_v42 }
 0x1ca   :  { %v3898_v9 = vmul.f32 0.5, %v1005_v43 }
 0x1cb   :  { %v1155_v53 = vadd.f32 %v1153_v36, %v1151_v24  ;;  %2703 = vrsqrt.f32 %v1154_v16  ;;  %vm1163_vm10 = vcmp.eq.f32.partialorder %v1154_v16, inf  ;;  %v1166_v15 = vand.u32 2147483648, %v1154_v16 }
 0x1cc   :  { %vm1165_vm11 = vcmp.eq.f32.partialorder %v1154_v16, 0.0 }
 0x1cd   :  { %2705 = vrsqrt.f32 %v1155_v53  ;;  %vm1175_vm12 = vcmp.eq.f32.partialorder %v1155_v53, inf  ;;  %v1178_v14 = vand.u32 2147483648, %v1155_v53  ;;  %vm1177_vm13 = vcmp.eq.f32.partialorder %v1155_v53, 0.0 }
 0x1d1   :  { %v2704_v56 = vpop.eup %2703 }
 0x1d2   :  { %v1157_v18 = vmul.f32 %v2704_v56, %v1154_v16 }
 0x1d3   :  { %v2706_v51 = vpop.eup %2705 }
 0x1d4   :  { %v1169_v52 = vmul.f32 %v2706_v51, %v1155_v53  ;;  %v1158_v2 = vmul.f32 %v2704_v56, %v1157_v18 }
 0x1d6   :  { %v1170_v57 = vmul.f32 %v2706_v51, %v1169_v52  ;;  %v1159_v13 = vmul.f32 0.5, %v1158_v2 }
 0x1d8   :  { %v1171_v30 = vmul.f32 0.5, %v1170_v57  ;;  %v1160_v0 = vsub.f32 1.5, %v1159_v13 }
 0x1da   :  { %v1172_v19 = vsub.f32 1.5, %v1171_v30  ;;  %v1161_v38 = vmul.f32 %v2704_v56, %v1160_v0 }
 0x1dc   :  { %v1173_v10 = vmul.f32 %v2706_v51, %v1172_v19  ;;  %v1162_v5 = vmul.f32 %v1161_v38, %v1154_v16 }
 0x1de   :  { %v1174_v4 = vmul.f32 %v1173_v10, %v1155_v53  ;;  %v1164_v17 = vsel %vm1163_vm10, %v1154_v16, %v1162_v5 }
 0x1df   :  { %v1167_v26 = vsel %vm1165_vm11, %v1166_v15, %v1164_v17 }
 0x1e0   :  { %v1176_v59 = vsel %vm1175_vm12, %v1155_v53, %v1174_v4  ;;  %v1186_v40 = vadd.f32 %v1184_v31, %v1167_v26  ;;  %v1222_v49 = vmul.f32 %v1182_v46, %v1167_v26 }
 0x1e1   :  { %v1179_v28 = vsel %vm1177_vm13, %v1178_v14, %v1176_v59 }
 0x1e2   :  { %v1187_v3 = vadd.f32 %v1185_v45, %v1179_v28  ;;  %v1223_v8 = vmul.f32 %v1183_v25, %v1179_v28  ;;  %v1188_v39 = vadd.f32 1e-18, %v1186_v40  ;;  %v1224_v23 = vsub.f32 %v1220_v41, %v1222_v49 }
 0x1e3   :  { %v1228_v54 = vadd.f32 %v1222_v49, %v1220_v41 }
 0x1e4   :  { %v1189_v62 = vadd.f32 1e-18, %v1187_v3  ;;  %v1225_v55 = vsub.f32 %v1221_v33, %v1223_v8  ;;  %v1229_v29 = vadd.f32 %v1223_v8, %v1221_v33  ;;  %v1190_v44 = vmul.f32 %v1188_v39, %v1188_v39 }
 0x1e5   :  { %v3888_v63 = vmul.f32 0.5, %v1228_v54  ;;  %v3902_v16 = vmul.f32 0.5, %v1224_v23 }
 0x1e6   :  { %v1191_v21 = vmul.f32 %v1189_v62, %v1189_v62  ;;  %v3900_v36 = vmul.f32 0.5, %v1229_v29  ;;  %v1192_v6 = vadd.f32 %v1190_v44, %v1150_v34  ;;  %v3904_v53 = vmul.f32 0.5, %v1225_v55 }
 0x1e7   :  { %v3908_v56 = vsub.f32 %v3888_v63, %v3883_v32  ;;  %v3916_v11 = vsub.f32 %v3902_v16, %v3893_v35 }
 0x1e8   :  { %v1193_v48 = vadd.f32 %v1191_v21, %v1151_v24  ;;  %v3912_v22 = vsub.f32 %v3900_v36, %v3886_v12  ;;  %2707 = vrsqrt.f32 %v1192_v6  ;;  %v3920_v7 = vsub.f32 %v3904_v53, %v3898_v9 }
 0x1e9   :  { %vm1200_vm14 = vweird.f32 %v1192_v6  ;;  %vm1286_vm4 = vcmp.ge.f32.partialorder %v3908_v56, 0.0 }
 0x1ea   :  { %2709 = vrsqrt.f32 %v1193_v48  ;;  %vm1210_vm0 = vweird.f32 %v1193_v48  ;;  %v1369_v55 = vmul.f32 %v3920_v7, %v3920_v7  ;;  %v1259_v44 = vmul.f32 %v3912_v22, %v3912_v22 }
 0x1eb   :  { %vm1287_vm5 = vcmp.ge.f32.partialorder %v3912_v22, 0.0 }
 0x1ee   :  { %v2708_v42 = vpop.eup %2707 }
 0x1ef   :  { %v1195_v34 = vmul.f32 %v2708_v42, %v1192_v6  ;;  %vm1201_vm15 = vweird.f32 %v2708_v42 }
 0x1f0   :  { %v2710_v43 = vpop.eup %2709  ;;  %vm1202_vm2 = vmor %vm1200_vm14, %vm1201_vm15  ;;  %vm1396_vm14 = vcmp.ge.f32.partialorder %v3916_v11, 0.0  ;;  %vm1397_vm15 = vcmp.ge.f32.partialorder %v3920_v7, 0.0 }
 0x1f1   :  { %v1205_v51 = vmul.f32 %v2710_v43, %v1193_v48  ;;  %v1196_v18 = vmul.f32 %v2708_v42, %v1195_v34  ;;  %vm1211_vm1 = vweird.f32 %v2710_v43 }
 0x1f2   :  { %vm1212_vm3 = vmor %vm1210_vm0, %vm1211_vm1 }
 0x1f3   :  { %v1206_v24 = vmul.f32 %v2710_v43, %v1205_v51  ;;  %v1197_v52 = vmul.f32 0.5, %v1196_v18 }
 0x1f5   :  { %v1207_v2 = vmul.f32 0.5, %v1206_v24  ;;  %v1198_v57 = vsub.f32 1.5, %v1197_v52 }
 0x1f7   :  { %v1208_v13 = vsub.f32 1.5, %v1207_v2  ;;  %v1199_v46 = vmul.f32 %v2708_v42, %v1198_v57 }
 0x1f9   :  { %v1209_v25 = vmul.f32 %v2710_v43, %v1208_v13  ;;  %v1203_v30 = vsel %vm1202_vm2, %v2708_v42, %v1199_v46  ;;  %v1288_v46 = vsel %vm1286_vm4, 1.0, %v2866_v37 }
 0x1fa   :  { %v1214_v19 = vmul.f32 %v1203_v30, %v1188_v39  ;;  %v1218_v38 = vmul.f32 %v3872_v60, %v1203_v30 }
 0x1fb   :  { %v1213_v0 = vsel %vm1212_vm3, %v2710_v43, %v1209_v25  ;;  %v1289_v25 = vsel %vm1287_vm5, 1.0, %v2866_v37 }
 0x1fc   :  { %v1215_v31 = vmul.f32 %v1213_v0, %v1189_v62  ;;  %v1219_v15 = vmul.f32 %v3874_v58, %v1213_v0  ;;  %v1232_v10 = vmul.f32 %v1214_v19, %v3852_v20  ;;  %v1234_v41 = vmul.f32 0.0, %v1218_v38 }
 0x1fd   :  { %v1238_v33 = vmul.f32 %v1218_v38, %v3852_v20  ;;  %v1240_v5 = vmul.f32 0.0, %v1214_v19  ;;  %v1244_v60 = vmul.f32 %v1218_v38, %v3862_v61  ;;  %v1248_v49 = vmul.f32 %v1214_v19, %v3862_v61 }
 0x1fe   :  { %v1233_v14 = vmul.f32 %v1215_v31, %v3856_v27  ;;  %v1235_v4 = vmul.f32 0.0, %v1219_v15  ;;  %v1239_v45 = vmul.f32 %v1219_v15, %v3856_v27  ;;  %v1241_v17 = vmul.f32 0.0, %v1215_v31 }
 0x1ff   :  { %v1236_v26 = vsub.f32 %v1232_v10, %v1234_v41  ;;  %v3928_v59 = vadd.f32 %v1240_v5, %v1238_v33  ;;  %v1245_v28 = vmul.f32 %v1219_v15, %v3864_v1  ;;  %v1249_v20 = vmul.f32 %v1215_v31, %v3864_v1 }
 0x200   :  { %v1237_v58 = vsub.f32 %v1233_v14, %v1235_v4  ;;  %v3932_v40 = vadd.f32 %v1241_v17, %v1239_v45  ;;  %v3936_v3 = vsub.f32 %v1240_v5, %v1244_v60  ;;  %v1250_v27 = vadd.f32 %v1248_v49, %v1234_v41 }
 0x201   :  { %v3938_v8 = vsub.f32 %v1241_v17, %v1245_v28  ;;  %v1251_v39 = vadd.f32 %v1249_v20, %v1235_v4  ;;  %v3940_v23 = vadd.f32 %v1236_v26, %v1236_v26  ;;  %v1368_v62 = vmul.f32 %v3916_v11, %v3916_v11 }
 0x202   :  { %v3942_v54 = vadd.f32 %v1237_v58, %v1237_v58  ;;  %v1254_v29 = vadd.f32 %v1250_v27, %v1250_v27  ;;  %v1258_v1 = vmul.f32 %v3908_v56, %v3908_v56  ;;  %v1290_v19 = vand.u32 2147483647, %v3908_v56 }
 0x203   :  { %v1255_v61 = vadd.f32 %v1251_v39, %v1251_v39  ;;  %v3954_v21 = vmul.f32 %v3940_v23, %v3940_v23  ;;  %v1291_v38 = vand.u32 2147483647, %v3912_v22  ;;  %v1400_v41 = vand.u32 2147483647, %v3916_v11 }
 0x204   :  { %v3958_v6 = vmul.f32 %v3942_v54, %v3942_v54  ;;  %v3960_v48 = vmul.f32 %v1254_v29, %v1254_v29  ;;  %v1401_v33 = vand.u32 2147483647, %v3920_v7  ;;  %v4000_v49 = vmul.f32 %v1288_v46, %v1254_v29 }
 0x205   :  { %v3962_v42 = vmul.f32 %v1255_v61, %v1255_v61  ;;  %v3965_v43 = vadd.f32 %v1368_v62, %v3954_v21  ;;  %v4002_v20 = vmul.f32 %v1289_v25, %v1255_v61  ;;  %v1399_v7 = vsel %vm1397_vm15, 1.0, %v2866_v37 }
 0x206   :  { %v3968_v34 = vadd.f32 %v1369_v55, %v3958_v6  ;;  %v3971_v51 = vadd.f32 %v1258_v1, %v3960_v48 }
 0x207   :  { %v3974_v18 = vadd.f32 %v1259_v44, %v3962_v42  ;;  %2711 = vrsqrt.f32 %v3965_v43  ;;  %vm1379_vm6 = vcmp.eq.f32.partialorder %v3965_v43, inf  ;;  %vm1381_vm7 = vcmp.eq.f32.partialorder %v3965_v43, 0.0 }
 0x208   :  { %2713 = vrsqrt.f32 %v3971_v51  ;;  %vm1269_vm8 = vcmp.eq.f32.partialorder %v3971_v51, inf  ;;  %v1382_v56 = vand.u32 2147483648, %v3965_v43  ;;  %vm1271_vm9 = vcmp.eq.f32.partialorder %v3971_v51, 0.0 }
 0x209   :  { %2715 = vrsqrt.f32 %v3974_v18  ;;  %v1272_v45 = vand.u32 2147483648, %v3971_v51  ;;  %vm1281_vm10 = vcmp.eq.f32.partialorder %v3974_v18, inf  ;;  %vm1283_vm11 = vcmp.eq.f32.partialorder %v3974_v18, 0.0 }
 0x20a   :  { %2717 = vrsqrt.f32 %v3968_v34  ;;  %v1284_v62 = vand.u32 2147483648, %v3974_v18  ;;  %vm1391_vm12 = vcmp.eq.f32.partialorder %v3968_v34, inf  ;;  %v1326_v44 = vadd.f32 %v3888_v63, %v3883_v32 }
 0x20b   :  { %vm1393_vm13 = vcmp.eq.f32.partialorder %v3968_v34, 0.0 }
 0x20d   :  { %v2712_v24 = vpop.eup %2711 }
 0x20e   :  { %v2714_v52 = vpop.eup %2713  ;;  %v1373_v2 = vmul.f32 %v2712_v24, %v3965_v43 }
 0x20f   :  { %v2716_v57 = vpop.eup %2715  ;;  %v1263_v13 = vmul.f32 %v2714_v52, %v3971_v51 }
 0x210   :  { %v2718_v30 = vpop.eup %2717  ;;  %v1275_v0 = vmul.f32 %v2716_v57, %v3974_v18  ;;  %v1374_v31 = vmul.f32 %v2712_v24, %v1373_v2  ;;  %v1327_v2 = vadd.f32 %v3900_v36, %v3886_v12  ;;  %v1398_v36 = vsel %vm1396_vm14, 1.0, %v2866_v37 }
 0x211   :  { %v1264_v15 = vmul.f32 %v2714_v52, %v1263_v13  ;;  %v1385_v10 = vmul.f32 %v2718_v30, %v3968_v34 }
 0x212   :  { %v1276_v5 = vmul.f32 %v2716_v57, %v1275_v0  ;;  %v1375_v14 = vmul.f32 0.5, %v1374_v31 }
 0x213   :  { %v1265_v4 = vmul.f32 0.5, %v1264_v15  ;;  %v1386_v22 = vmul.f32 %v2718_v30, %v1385_v10 }
 0x214   :  { %v1277_v17 = vmul.f32 0.5, %v1276_v5  ;;  %v1376_v26 = vsub.f32 1.5, %v1375_v14 }
 0x215   :  { %v1266_v60 = vsub.f32 1.5, %v1265_v4  ;;  %v1387_v28 = vmul.f32 0.5, %v1386_v22 }
 0x216   :  { %v1278_v58 = vsub.f32 1.5, %v1277_v17  ;;  %v1377_v27 = vmul.f32 %v2712_v24, %v1376_v26  ;;  %v1394_v24 = vand.u32 2147483648, %v3968_v34 }
 0x217   :  { %v1267_v39 = vmul.f32 %v2714_v52, %v1266_v60  ;;  %v1388_v55 = vsub.f32 1.5, %v1387_v28  ;;  %v1432_v28 = vmul.f32 %v1398_v36, %v3940_v23 }
 0x218   :  { %v1279_v1 = vmul.f32 %v2716_v57, %v1278_v58  ;;  %v1378_v13 = vmul.f32 %v1377_v27, %v3965_v43  ;;  %v4064_v58 = vmul.f32 %v1399_v7, %v3942_v54 }
 0x219   :  { %v1268_v29 = vmul.f32 %v1267_v39, %v3971_v51  ;;  %v1389_v61 = vmul.f32 %v2718_v30, %v1388_v55  ;;  %v1436_v39 = vadd.f32 %v3902_v16, %v3893_v35 }
 0x21a   :  { %v1280_v52 = vmul.f32 %v1279_v1, %v3974_v18  ;;  %v1380_v57 = vsel %vm1379_vm6, %v3965_v43, %v1378_v13 }
 0x21b   :  { %v1270_v32 = vsel %vm1269_vm8, %v3971_v51, %v1268_v29  ;;  %v1383_v12 = vsel %vm1381_vm7, %v1382_v56, %v1380_v57  ;;  %v1390_v63 = vmul.f32 %v1389_v61, %v3968_v34 }
 0x21c   :  { %v1273_v30 = vsel %vm1271_vm9, %v1272_v45, %v1270_v32  ;;  %v1282_v11 = vsel %vm1281_vm10, %v3974_v18, %v1280_v52  ;;  %v1402_v0 = vadd.f32 %v1400_v41, %v1383_v12 }
 0x21d   :  { %v1285_v31 = vsel %vm1283_vm11, %v1284_v62, %v1282_v11  ;;  %v1292_v15 = vadd.f32 %v1290_v19, %v1273_v30  ;;  %v1328_v43 = vmul.f32 %v1288_v46, %v1273_v30  ;;  %v1392_v10 = vsel %vm1391_vm12, %v3968_v34, %v1390_v63 }
 0x21e   :  { %v1293_v5 = vadd.f32 %v1291_v38, %v1285_v31  ;;  %v1329_v14 = vmul.f32 %v1289_v25, %v1285_v31  ;;  %v1395_v51 = vsel %vm1393_vm13, %v1394_v24, %v1392_v10  ;;  %v4040_v4 = vadd.f32 1e-18, %v1402_v0 }
 0x21f   :  { %v4042_v56 = vadd.f32 1e-18, %v1292_v15  ;;  %v1330_v22 = vsub.f32 %v1326_v44, %v1328_v43  ;;  %v4044_v41 = vadd.f32 %v1328_v43, %v1326_v44  ;;  %v1403_v18 = vadd.f32 %v1401_v33, %v1395_v51 }
 0x220   :  { %v4046_v45 = vadd.f32 1e-18, %v1293_v5  ;;  %v1331_v46 = vsub.f32 %v1327_v2, %v1329_v14  ;;  %v4048_v19 = vadd.f32 %v1329_v14, %v1327_v2  ;;  %v1406_v38 = vmul.f32 %v4040_v4, %v4040_v4 }
 0x221   :  { %v1296_v34 = vmul.f32 %v4042_v56, %v4042_v56  ;;  %v4054_v25 = vadd.f32 1e-18, %v1403_v18  ;;  %v1439_v55 = vmul.f32 %v1399_v7, %v1395_v51  ;;  %v4072_v1 = vmul.f32 0.5, %v1330_v22 }
 0x222   :  { %v1297_v17 = vmul.f32 %v4046_v45, %v4046_v45  ;;  %v1408_v26 = vadd.f32 %v1406_v38, %v3954_v21  ;;  %v1437_v21 = vadd.f32 %v3904_v53, %v3898_v9  ;;  %v4074_v23 = vmul.f32 0.5, %v1331_v46 }
 0x223   :  { %v1298_v33 = vadd.f32 %v1296_v34, %v3960_v48  ;;  %v1407_v60 = vmul.f32 %v4054_v25, %v4054_v25  ;;  %v1438_v48 = vmul.f32 %v1398_v36, %v1383_v12 }
 0x224   :  { %v1299_v27 = vadd.f32 %v1297_v17, %v3962_v42  ;;  %2719 = vrsqrt.f32 %v1408_v26  ;;  %v1441_v42 = vsub.f32 %v1437_v21, %v1439_v55  ;;  %v4078_v2 = vadd.f32 %v1439_v55, %v1437_v21 }
 0x225   :  { %2721 = vrsqrt.f32 %v1298_v33  ;;  %v1409_v62 = vadd.f32 %v1407_v60, %v3958_v6  ;;  %v1440_v54 = vsub.f32 %v1436_v39, %v1438_v48  ;;  %v4076_v44 = vadd.f32 %v1438_v48, %v1436_v39 }
 0x226   :  { %2723 = vrsqrt.f32 %v1299_v27  ;;  %v4082_v6 = vmul.f32 0.5, %v1441_v42  ;;  %vm1416_vm0 = vweird.f32 %v1408_v26  ;;  %vm1306_vm2 = vweird.f32 %v1298_v33 }
 0x227   :  { %2725 = vrsqrt.f32 %v1409_v62  ;;  %v4080_v16 = vmul.f32 0.5, %v1440_v54  ;;  %vm1316_vm4 = vweird.f32 %v1299_v27  ;;  %vm1426_vm7 = vweird.f32 %v1409_v62 }
 0x228   :  { %v4090_v24 = vsub.f32 %v4074_v23, %v4082_v6 }
 0x229   :  { %v4086_v61 = vsub.f32 %v4072_v1, %v4080_v16 }
 0x22a   :  { %v2720_v35 = vpop.eup %2719  ;;  %vm1507_vm13 = vcmp.ge.f32.partialorder %v4090_v24, 0.0 }
 0x22b   :  { %v2722_v9 = vpop.eup %2721  ;;  %v1411_v53 = vmul.f32 %v2720_v35, %v1408_v26  ;;  %vm1417_vm1 = vweird.f32 %v2720_v35  ;;  %vm1506_vm12 = vcmp.ge.f32.partialorder %v4086_v61, 0.0 }
 0x22c   :  { %v2724_v13 = vpop.eup %2723  ;;  %v1301_v29 = vmul.f32 %v2722_v9, %v1298_v33  ;;  %vm1307_vm3 = vweird.f32 %v2722_v9  ;;  %vm1418_vm6 = vmor %vm1416_vm0, %vm1417_vm1 }
 0x22d   :  { %v2726_v52 = vpop.eup %2725  ;;  %v1311_v57 = vmul.f32 %v2724_v13, %v1299_v27  ;;  %v1412_v32 = vmul.f32 %v2720_v35, %v1411_v53  ;;  %vm1317_vm5 = vweird.f32 %v2724_v13  ;;  %vm1308_vm9 = vmor %vm1306_vm2, %vm1307_vm3 }
 0x22e   :  { %v1302_v12 = vmul.f32 %v2722_v9, %v1301_v29  ;;  %v1421_v63 = vmul.f32 %v2726_v52, %v1409_v62  ;;  %vm1427_vm8 = vweird.f32 %v2726_v52  ;;  %vm1318_vm10 = vmor %vm1316_vm4, %vm1317_vm5 }
 0x22f   :  { %v1312_v36 = vmul.f32 %v2724_v13, %v1311_v57  ;;  %v1413_v30 = vmul.f32 0.5, %v1412_v32  ;;  %vm1428_vm11 = vmor %vm1426_vm7, %vm1427_vm8 }
 0x230   :  { %v1303_v11 = vmul.f32 0.5, %v1302_v12  ;;  %v1422_v7 = vmul.f32 %v2726_v52, %v1421_v63 }
 0x231   :  { %v1313_v0 = vmul.f32 0.5, %v1312_v36  ;;  %v1414_v31 = vsub.f32 1.5, %v1413_v30 }
 0x232   :  { %v1304_v15 = vsub.f32 1.5, %v1303_v11  ;;  %v1423_v43 = vmul.f32 0.5, %v1422_v7 }
 0x233   :  { %v1314_v10 = vsub.f32 1.5, %v1313_v0  ;;  %v1415_v5 = vmul.f32 %v2720_v35, %v1414_v31 }
 0x234   :  { %v1305_v14 = vmul.f32 %v2722_v9, %v1304_v15  ;;  %v1424_v51 = vsub.f32 1.5, %v1423_v43 }
 0x235   :  { %v1315_v22 = vmul.f32 %v2724_v13, %v1314_v10  ;;  %v1419_v18 = vsel %vm1418_vm6, %v2720_v35, %v1415_v5 }
 0x236   :  { %v1309_v46 = vsel %vm1308_vm9, %v2722_v9, %v1305_v14  ;;  %v1425_v38 = vmul.f32 %v2726_v52, %v1424_v51  ;;  %v1430_v34 = vmul.f32 %v1419_v18, %v4040_v4  ;;  %v1434_v17 = vmul.f32 %v1432_v28, %v1419_v18 }
 0x237   :  { %v1319_v26 = vsel %vm1318_vm10, %v2724_v13, %v1315_v22  ;;  %v1320_v33 = vmul.f32 %v1309_v46, %v4042_v56  ;;  %v1324_v60 = vmul.f32 %v4000_v49, %v1309_v46 }
 0x238   :  { %v1321_v27 = vmul.f32 %v1319_v26, %v4046_v45  ;;  %v1325_v39 = vmul.f32 %v4002_v20, %v1319_v26  ;;  %v1429_v62 = vsel %vm1428_vm11, %v2726_v52, %v1425_v38 }
 0x239   :  { %v1338_v21 = vmul.f32 %v1320_v33, %v3854_v50  ;;  %v1340_v48 = vmul.f32 %v1324_v60, %v3928_v59  ;;  %v1344_v55 = vmul.f32 %v1324_v60, %v3854_v50  ;;  %v1346_v54 = vmul.f32 %v1320_v33, %v3928_v59 }
 0x23a   :  { %v1339_v4 = vmul.f32 %v1321_v27, %v3858_v47  ;;  %v1341_v28 = vmul.f32 %v1325_v39, %v3932_v40  ;;  %v1345_v56 = vmul.f32 %v1325_v39, %v3858_v47  ;;  %v1347_v49 = vmul.f32 %v1321_v27, %v3932_v40 }
 0x23b   :  { %v1342_v45 = vsub.f32 %v1338_v21, %v1340_v48  ;;  %v1348_v42 = vadd.f32 %v1346_v54, %v1344_v55  ;;  %v1350_v20 = vmul.f32 %v1320_v33, %v3936_v3  ;;  %v1351_v35 = vmul.f32 %v1321_v27, %v3938_v8 }
 0x23c   :  { %v1343_v9 = vsub.f32 %v1339_v4, %v1341_v28  ;;  %v1349_v53 = vadd.f32 %v1347_v49, %v1345_v56  ;;  %v1352_v13 = vmul.f32 0.0, %v1324_v60  ;;  %v1353_v50 = vmul.f32 0.0, %v1325_v39 }
 0x23d   :  { %v1356_v59 = vmul.f32 %v1324_v60, %v3936_v3  ;;  %v1357_v29 = vmul.f32 %v1325_v39, %v3938_v8  ;;  %v1358_v52 = vmul.f32 0.0, %v1320_v33  ;;  %v1359_v57 = vmul.f32 0.0, %v1321_v27 }
 0x23e   :  { %v1354_v32 = vsub.f32 %v1350_v20, %v1352_v13  ;;  %v1355_v47 = vsub.f32 %v1351_v35, %v1353_v50  ;;  %v1431_v40 = vmul.f32 %v1429_v62, %v4054_v25  ;;  %v1435_v12 = vmul.f32 %v4064_v58, %v1429_v62 }
 0x23f   :  { %v1360_v63 = vadd.f32 %v1358_v52, %v1356_v59  ;;  %v1361_v36 = vadd.f32 %v1359_v57, %v1357_v29  ;;  %v1448_v30 = vmul.f32 %v1430_v34, %v1342_v45  ;;  %v1454_v11 = vmul.f32 %v1434_v17, %v1342_v45 }
 0x240   :  { %v1449_v7 = vmul.f32 %v1431_v40, %v1343_v9  ;;  %v1450_v0 = vmul.f32 %v1434_v17, %v1354_v32  ;;  %v1451_v31 = vmul.f32 %v1435_v12, %v1355_v47  ;;  %v1455_v15 = vmul.f32 %v1435_v12, %v1343_v9 }
 0x241   :  { %v1456_v43 = vmul.f32 %v1430_v34, %v1354_v32  ;;  %v1457_v3 = vmul.f32 %v1431_v40, %v1355_v47  ;;  %v1460_v10 = vmul.f32 %v1430_v34, %v1348_v42  ;;  %v1461_v8 = vmul.f32 %v1431_v40, %v1349_v53 }
 0x242   :  { %v1452_v5 = vsub.f32 %v1448_v30, %v1450_v0  ;;  %v1453_v14 = vsub.f32 %v1449_v7, %v1451_v31  ;;  %v1462_v51 = vmul.f32 %v1434_v17, %v1360_v63  ;;  %v1463_v22 = vmul.f32 %v1435_v12, %v1361_v36 }
 0x243   :  { %v4111_v18 = vadd.f32 %v1456_v43, %v1454_v11  ;;  %v4113_v25 = vadd.f32 %v1457_v3, %v1455_v15  ;;  %v1466_v58 = vmul.f32 %v1434_v17, %v1348_v42  ;;  %v1467_v46 = vmul.f32 %v1435_v12, %v1349_v53 }
 0x244   :  { %v4115_v38 = vsub.f32 %v1460_v10, %v1462_v51  ;;  %v4117_v26 = vsub.f32 %v1461_v8, %v1463_v22  ;;  %v1468_v33 = vmul.f32 %v1430_v34, %v1360_v63  ;;  %v1469_v60 = vmul.f32 %v1431_v40, %v1361_v36 }
 0x245   :  { %v1474_v27 = vadd.f32 %v1452_v5, %v1452_v5  ;;  %v1475_v39 = vadd.f32 %v1453_v14, %v1453_v14  ;;  %v1478_v62 = vmul.f32 %v4086_v61, %v4086_v61  ;;  %v1479_v21 = vmul.f32 %v4090_v24, %v4090_v24 }
 0x246   :  { %v4123_v48 = vadd.f32 %v1468_v33, %v1466_v58  ;;  %v4125_v55 = vadd.f32 %v1469_v60, %v1467_v46  ;;  %v1508_v9 = vsel %vm1506_vm12, 1.0, %v2866_v37  ;;  %v1509_v53 = vsel %vm1507_vm13, 1.0, %v2866_v37 }
 0x247   :  { %v1476_v17 = vmul.f32 %v1474_v27, %v1474_v27  ;;  %v1477_v54 = vmul.f32 %v1475_v39, %v1475_v39  ;;  %v4131_v29 = vmul.f32 %v1508_v9, %v1474_v27  ;;  %v4133_v52 = vmul.f32 %v1509_v53, %v1475_v39 }
 0x248   :  { %v1510_v32 = vand.u32 2147483647, %v4086_v61  ;;  %v1546_v12 = vadd.f32 %v4080_v16, %v4072_v1  ;;  %v1547_v63 = vadd.f32 %v4082_v6, %v4074_v23  ;;  %v1511_v7 = vand.u32 2147483647, %v4090_v24 }
 0x249   :  { %v1480_v4 = vadd.f32 %v1478_v62, %v1476_v17  ;;  %v1481_v28 = vadd.f32 %v1479_v21, %v1477_v54  ;;  %v4142_v1 = vmul.f32 0.5, %v4044_v41  ;;  %v4145_v5 = vmul.f32 0.5, %v4048_v19 }
 0x24a   :  { %v4150_v46 = vmul.f32 0.5, %v4076_v44  ;;  %v4153_v33 = vmul.f32 0.5, %v4078_v2 }
 0x24b   :  { %2727 = vrsqrt.f32 %v1480_v4  ;;  %vm1489_vm14 = vcmp.eq.f32.partialorder %v1480_v4, inf  ;;  %v1492_v47 = vand.u32 2147483648, %v1480_v4  ;;  %vm1491_vm15 = vcmp.eq.f32.partialorder %v1480_v4, 0.0 }
 0x24c   :  { %2729 = vrsqrt.f32 %v1481_v28  ;;  %vm1501_vm0 = vcmp.eq.f32.partialorder %v1481_v28, inf  ;;  %v1504_v30 = vand.u32 2147483648, %v1481_v28  ;;  %vm1503_vm1 = vcmp.eq.f32.partialorder %v1481_v28, 0.0 }
 0x251   :  { %v2728_v34 = vpop.eup %2727 }
 0x252   :  { %v2730_v56 = vpop.eup %2729  ;;  %v1483_v49 = vmul.f32 %v2728_v34, %v1480_v4 }
 0x253   :  { %v1495_v45 = vmul.f32 %v2730_v56, %v1481_v28 }
 0x254   :  { %v1484_v42 = vmul.f32 %v2728_v34, %v1483_v49 }
 0x255   :  { %v1496_v20 = vmul.f32 %v2730_v56, %v1495_v45 }
 0x256   :  { %v1485_v35 = vmul.f32 0.5, %v1484_v42 }
 0x257   :  { %v1497_v13 = vmul.f32 0.5, %v1496_v20 }
 0x258   :  { %v1486_v50 = vsub.f32 1.5, %v1485_v35 }
 0x259   :  { %v1498_v59 = vsub.f32 1.5, %v1497_v13 }
 0x25a   :  { %v1487_v57 = vmul.f32 %v2728_v34, %v1486_v50 }
 0x25b   :  { %v1499_v40 = vmul.f32 %v2730_v56, %v1498_v59 }
 0x25c   :  { %v1488_v36 = vmul.f32 %v1487_v57, %v1480_v4 }
 0x25d   :  { %v1500_v11 = vmul.f32 %v1499_v40, %v1481_v28 }
 0x25e   :  { %v1490_v0 = vsel %vm1489_vm14, %v1480_v4, %v1488_v36 }
 0x25f   :  { %v1493_v31 = vsel %vm1491_vm15, %v1492_v47, %v1490_v0  ;;  %v1502_v15 = vsel %vm1501_vm0, %v1481_v28, %v1500_v11 }
 0x260   :  { %v1505_v61 = vsel %vm1503_vm1, %v1504_v30, %v1502_v15  ;;  %v1512_v43 = vadd.f32 %v1510_v32, %v1493_v31  ;;  %v1548_v3 = vmul.f32 %v1508_v9, %v1493_v31 }
 0x261   :  { %v1513_v10 = vadd.f32 %v1511_v7, %v1505_v61  ;;  %v1549_v8 = vmul.f32 %v1509_v53, %v1505_v61 }
 0x262   :  { %v1514_v23 = vadd.f32 1e-18, %v1512_v43  ;;  %v1550_v16 = vsub.f32 %v1546_v12, %v1548_v3  ;;  %v1554_v6 = vadd.f32 %v1548_v3, %v1546_v12 }
 0x263   :  { %v1515_v14 = vadd.f32 1e-18, %v1513_v10  ;;  %v1551_v51 = vsub.f32 %v1547_v63, %v1549_v8  ;;  %v1555_v24 = vadd.f32 %v1549_v8, %v1547_v63 }
 0x264   :  { %v1516_v22 = vmul.f32 %v1514_v23, %v1514_v23  ;;  %v4147_v58 = vmul.f32 0.5, %v1550_v16  ;;  %v4157_v39 = vmul.f32 0.5, %v1554_v6 }
 0x265   :  { %v1517_v41 = vmul.f32 %v1515_v14, %v1515_v14  ;;  %v4155_v60 = vmul.f32 0.5, %v1551_v51  ;;  %v4159_v19 = vmul.f32 0.5, %v1555_v24 }
 0x266   :  { %v1518_v27 = vadd.f32 %v1516_v22, %v1476_v17  ;;  %v4163_v62 = vsub.f32 %v4142_v1, %v4147_v58  ;;  %v4171_v2 = vsub.f32 %v4157_v39, %v4150_v46 }
 0x267   :  { %v1519_v21 = vadd.f32 %v1517_v41, %v1477_v54  ;;  %v4167_v44 = vsub.f32 %v4145_v5, %v4155_v60  ;;  %v4175_v17 = vsub.f32 %v4159_v19, %v4153_v33 }
 0x268   :  { %2731 = vrsqrt.f32 %v1518_v27  ;;  %vm1526_vm2 = vweird.f32 %v1518_v27  ;;  %vm1612_vm8 = vcmp.ge.f32.partialorder %v4163_v62, 0.0 }
 0x269   :  { %2733 = vrsqrt.f32 %v1519_v21  ;;  %vm1536_vm4 = vweird.f32 %v1519_v21  ;;  %v1585_v51 = vmul.f32 %v4167_v44, %v4167_v44  ;;  %vm1613_vm9 = vcmp.ge.f32.partialorder %v4167_v44, 0.0 }
 0x26e   :  { %v2732_v4 = vpop.eup %2731 }
 0x26f   :  { %v2734_v28 = vpop.eup %2733  ;;  %v1521_v34 = vmul.f32 %v2732_v4, %v1518_v27  ;;  %vm1527_vm3 = vweird.f32 %v2732_v4 }
 0x270   :  { %v1531_v56 = vmul.f32 %v2734_v28, %v1519_v21  ;;  %vm1537_vm5 = vweird.f32 %v2734_v28  ;;  %vm1528_vm6 = vmor %vm1526_vm2, %vm1527_vm3  ;;  %vm1722_vm2 = vcmp.ge.f32.partialorder %v4171_v2, 0.0  ;;  %vm1723_vm3 = vcmp.ge.f32.partialorder %v4175_v17, 0.0 }
 0x271   :  { %v1522_v49 = vmul.f32 %v2732_v4, %v1521_v34  ;;  %vm1538_vm7 = vmor %vm1536_vm4, %vm1537_vm5 }
 0x272   :  { %v1532_v54 = vmul.f32 %v2734_v28, %v1531_v56 }
 0x273   :  { %v1523_v45 = vmul.f32 0.5, %v1522_v49 }
 0x274   :  { %v1533_v42 = vmul.f32 0.5, %v1532_v54 }
 0x275   :  { %v1524_v20 = vsub.f32 1.5, %v1523_v45 }
 0x276   :  { %v1534_v35 = vsub.f32 1.5, %v1533_v42 }
 0x277   :  { %v1525_v9 = vmul.f32 %v2732_v4, %v1524_v20 }
 0x278   :  { %v1535_v53 = vmul.f32 %v2734_v28, %v1534_v35 }
 0x279   :  { %v1529_v13 = vsel %vm1528_vm6, %v2732_v4, %v1525_v9  ;;  %v1614_v9 = vsel %vm1612_vm8, 1.0, %v2866_v37 }
 0x27a   :  { %v1539_v50 = vsel %vm1538_vm7, %v2734_v28, %v1535_v53  ;;  %v1540_v59 = vmul.f32 %v1529_v13, %v1514_v23  ;;  %v1544_v57 = vmul.f32 %v4131_v29, %v1529_v13  ;;  %v1615_v53 = vsel %vm1613_vm9, 1.0, %v2866_v37 }
 0x27b   :  { %v1541_v32 = vmul.f32 %v1539_v50, %v1515_v14  ;;  %v1545_v47 = vmul.f32 %v4133_v52, %v1539_v50  ;;  %v1584_v14 = vmul.f32 %v4163_v62, %v4163_v62 }
 0x27c   :  { %v1558_v40 = vmul.f32 0.0, %v1540_v59  ;;  %v1560_v12 = vmul.f32 %v1544_v57, %v4111_v18  ;;  %v1564_v63 = vmul.f32 0.0, %v1544_v57  ;;  %v1566_v36 = vmul.f32 %v1540_v59, %v4111_v18 }
 0x27d   :  { %v1559_v30 = vmul.f32 0.0, %v1541_v32  ;;  %v1561_v11 = vmul.f32 %v1545_v47, %v4113_v25  ;;  %v1565_v7 = vmul.f32 0.0, %v1545_v47  ;;  %v1567_v0 = vmul.f32 %v1541_v32, %v4113_v25 }
 0x27e   :  { %v4183_v31 = vsub.f32 %v1558_v40, %v1560_v12  ;;  %v1568_v15 = vadd.f32 %v1566_v36, %v1564_v63  ;;  %v1570_v29 = vmul.f32 %v1540_v59, %v4115_v38  ;;  %v1571_v61 = vmul.f32 %v1541_v32, %v4117_v26 }
 0x27f   :  { %v4187_v52 = vsub.f32 %v1559_v30, %v1561_v11  ;;  %v1569_v43 = vadd.f32 %v1567_v0, %v1565_v7  ;;  %v1574_v3 = vmul.f32 %v1544_v57, %v4115_v38  ;;  %v1575_v18 = vmul.f32 %v1545_v47, %v4117_v26 }
 0x280   :  { %v1572_v10 = vsub.f32 %v1570_v29, %v1564_v63  ;;  %v1573_v8 = vsub.f32 %v1571_v61, %v1565_v7  ;;  %v4199_v24 = vadd.f32 %v1568_v15, %v1568_v15  ;;  %v1694_v38 = vmul.f32 %v4171_v2, %v4171_v2 }
 0x281   :  { %v4191_v23 = vadd.f32 %v1574_v3, %v1558_v40  ;;  %v4193_v16 = vadd.f32 %v1575_v18, %v1559_v30  ;;  %v4201_v22 = vadd.f32 %v1569_v43, %v1569_v43  ;;  %v1695_v26 = vmul.f32 %v4175_v17, %v4175_v17 }
 0x282   :  { %v1580_v25 = vadd.f32 %v1572_v10, %v1572_v10  ;;  %v1581_v6 = vadd.f32 %v1573_v8, %v1573_v8  ;;  %v4213_v21 = vmul.f32 %v4199_v24, %v4199_v24  ;;  %v1616_v59 = vand.u32 2147483647, %v4163_v62 }
 0x283   :  { %v4217_v4 = vmul.f32 %v4201_v22, %v4201_v22  ;;  %v1617_v57 = vand.u32 2147483647, %v4167_v44  ;;  %v1726_v12 = vand.u32 2147483647, %v4171_v2  ;;  %v1727_v63 = vand.u32 2147483647, %v4175_v17 }
 0x284   :  { %v4207_v41 = vmul.f32 %v1580_v25, %v1580_v25  ;;  %v4209_v27 = vmul.f32 %v1581_v6, %v1581_v6  ;;  %v4226_v56 = vadd.f32 %v1694_v38, %v4213_v21  ;;  %v4253_v61 = vmul.f32 %v1614_v9, %v1580_v25 }
 0x285   :  { %v4229_v49 = vadd.f32 %v1695_v26, %v4217_v4  ;;  %v4255_v43 = vmul.f32 %v1615_v53, %v1581_v6 }
 0x286   :  { %v4220_v28 = vadd.f32 %v1584_v14, %v4207_v41  ;;  %v4223_v34 = vadd.f32 %v1585_v51, %v4209_v27  ;;  %vm1705_vm14 = vcmp.eq.f32.partialorder %v4226_v56, inf  ;;  %vm1707_vm15 = vcmp.eq.f32.partialorder %v4226_v56, 0.0 }
 0x287   :  { %v4261_v14 = vadd.f32 %v4147_v58, %v4142_v1  ;;  %v4265_v51 = vadd.f32 %v4155_v60, %v4145_v5  ;;  %v1708_v26 = vand.u32 2147483648, %v4226_v56  ;;  %vm1717_vm0 = vcmp.eq.f32.partialorder %v4229_v49, inf }
 0x288   :  { %2735 = vrsqrt.f32 %v4220_v28  ;;  %vm1595_vm10 = vcmp.eq.f32.partialorder %v4220_v28, inf  ;;  %vm1597_vm11 = vcmp.eq.f32.partialorder %v4220_v28, 0.0  ;;  %v1598_v11 = vand.u32 2147483648, %v4220_v28 }
 0x289   :  { %2737 = vrsqrt.f32 %v4223_v34  ;;  %vm1607_vm12 = vcmp.eq.f32.partialorder %v4223_v34, inf  ;;  %vm1609_vm13 = vcmp.eq.f32.partialorder %v4223_v34, 0.0  ;;  %v1610_v0 = vand.u32 2147483648, %v4223_v34 }
 0x28a   :  { %2739 = vrsqrt.f32 %v4226_v56  ;;  %vm1719_vm1 = vcmp.eq.f32.partialorder %v4229_v49, 0.0  ;;  %v1720_v1 = vand.u32 2147483648, %v4229_v49 }
 0x28b   :  { %2741 = vrsqrt.f32 %v4229_v49 }
 0x28e   :  { %v2736_v54 = vpop.eup %2735 }
 0x28f   :  { %v2738_v45 = vpop.eup %2737  ;;  %v1589_v42 = vmul.f32 %v2736_v54, %v4220_v28 }
 0x290   :  { %v2740_v20 = vpop.eup %2739  ;;  %v1601_v35 = vmul.f32 %v2738_v45, %v4223_v34 }
 0x291   :  { %v2742_v13 = vpop.eup %2741  ;;  %v1590_v50 = vmul.f32 %v2736_v54, %v1589_v42  ;;  %v1699_v32 = vmul.f32 %v2740_v20, %v4226_v56 }
 0x292   :  { %v1602_v47 = vmul.f32 %v2738_v45, %v1601_v35  ;;  %v1711_v40 = vmul.f32 %v2742_v13, %v4229_v49  ;;  %v1724_v35 = vsel %vm1722_vm2, 1.0, %v2866_v37 }
 0x293   :  { %v1591_v36 = vmul.f32 0.5, %v1590_v50  ;;  %v1700_v30 = vmul.f32 %v2740_v20, %v1699_v32 }
 0x294   :  { %v1603_v62 = vmul.f32 0.5, %v1602_v47  ;;  %v1712_v44 = vmul.f32 %v2742_v13, %v1711_v40 }
 0x295   :  { %v1592_v7 = vsub.f32 1.5, %v1591_v36  ;;  %v1701_v15 = vmul.f32 0.5, %v1700_v30 }
 0x296   :  { %v1604_v29 = vsub.f32 1.5, %v1603_v62  ;;  %v1713_v3 = vmul.f32 0.5, %v1712_v44 }
 0x297   :  { %v1593_v18 = vmul.f32 %v2736_v54, %v1592_v7  ;;  %v1702_v10 = vsub.f32 1.5, %v1701_v15 }
 0x298   :  { %v1605_v8 = vmul.f32 %v2738_v45, %v1604_v29  ;;  %v1714_v25 = vsub.f32 1.5, %v1713_v3  ;;  %v4325_v29 = vmul.f32 %v1724_v35, %v4199_v24 }
 0x299   :  { %v1594_v6 = vmul.f32 %v1593_v18, %v4220_v28  ;;  %v1703_v38 = vmul.f32 %v2740_v20, %v1702_v10 }
 0x29a   :  { %v1606_v54 = vmul.f32 %v1605_v8, %v4223_v34  ;;  %v1715_v42 = vmul.f32 %v2742_v13, %v1714_v25 }
 0x29b   :  { %v1596_v5 = vsel %vm1595_vm10, %v4220_v28, %v1594_v6  ;;  %v1704_v58 = vmul.f32 %v1703_v38, %v4226_v56 }
 0x29c   :  { %v1599_v60 = vsel %vm1597_vm11, %v1598_v11, %v1596_v5  ;;  %v1608_v45 = vsel %vm1607_vm12, %v4223_v34, %v1606_v54  ;;  %v1716_v20 = vmul.f32 %v1715_v42, %v4229_v49  ;;  %v1725_v11 = vsel %vm1723_vm3, 1.0, %v2866_v37 }
 0x29d   :  { %v1611_v13 = vsel %vm1609_vm13, %v1610_v0, %v1608_v45  ;;  %v1618_v50 = vadd.f32 %v1616_v59, %v1599_v60  ;;  %v4288_v32 = vmul.f32 %v1614_v9, %v1599_v60  ;;  %v1706_v2 = vsel %vm1705_vm14, %v4226_v56, %v1704_v58 }
 0x29e   :  { %v1619_v28 = vadd.f32 %v1617_v57, %v1611_v13  ;;  %v4293_v47 = vmul.f32 %v1615_v53, %v1611_v13  ;;  %v1709_v40 = vsel %vm1707_vm15, %v1708_v26, %v1706_v2  ;;  %v1718_v36 = vsel %vm1717_vm0, %v4229_v49, %v1716_v20 }
 0x29f   :  { %v4300_v30 = vadd.f32 1e-18, %v1618_v50  ;;  %v1656_v34 = vsub.f32 %v4261_v14, %v4288_v32  ;;  %v1660_v9 = vadd.f32 %v4288_v32, %v4261_v14  ;;  %v1721_v59 = vsel %vm1719_vm1, %v1720_v1, %v1718_v36 }
 0x2a0   :  { %v4308_v53 = vadd.f32 1e-18, %v1619_v28  ;;  %v1657_v56 = vsub.f32 %v4265_v51, %v4293_v47  ;;  %v1661_v57 = vadd.f32 %v4293_v47, %v4265_v51  ;;  %v1728_v44 = vadd.f32 %v1726_v12, %v1709_v40 }
 0x2a1   :  { %v1622_v62 = vmul.f32 %v4300_v30, %v4300_v30  ;;  %v1729_v7 = vadd.f32 %v1727_v63, %v1721_v59  ;;  %v4328_v3 = vmul.f32 %v1725_v11, %v4201_v22  ;;  %v1762_v12 = vadd.f32 %v4157_v39, %v4150_v46 }
 0x2a2   :  { %v1623_v49 = vmul.f32 %v4308_v53, %v4308_v53  ;;  %v4322_v15 = vadd.f32 1e-18, %v1728_v44  ;;  %v1763_v63 = vadd.f32 %v4159_v19, %v4153_v33  ;;  %v1764_v10 = vmul.f32 %v1724_v35, %v1709_v40 }
 0x2a3   :  { %v1624_v0 = vadd.f32 %v1622_v62, %v4207_v41  ;;  %v4331_v18 = vadd.f32 1e-18, %v1729_v7  ;;  %v1765_v22 = vmul.f32 %v1725_v11, %v1721_v59  ;;  %v4341_v8 = vmul.f32 0.5, %v1660_v9 }
 0x2a4   :  { %v1625_v17 = vadd.f32 %v1623_v49, %v4209_v27  ;;  %v1732_v41 = vmul.f32 %v4322_v15, %v4322_v15  ;;  %v1766_v25 = vsub.f32 %v1762_v12, %v1764_v10  ;;  %v4346_v46 = vadd.f32 %v1764_v10, %v1762_v12 }
 0x2a5   :  { %2743 = vrsqrt.f32 %v1624_v0  ;;  %v1733_v24 = vmul.f32 %v4331_v18, %v4331_v18  ;;  %v4348_v39 = vmul.f32 0.5, %v1661_v57  ;;  %v1767_v19 = vsub.f32 %v1763_v63, %v1765_v22 }
 0x2a6   :  { %2745 = vrsqrt.f32 %v1625_v17  ;;  %v4344_v27 = vadd.f32 %v1732_v41, %v4213_v21  ;;  %v4353_v6 = vadd.f32 %v1765_v22, %v1763_v63  ;;  %v4356_v38 = vmul.f32 0.5, %v1766_v25 }
 0x2a7   :  { %v4351_v33 = vadd.f32 %v1733_v24, %v4217_v4  ;;  %v4359_v26 = vmul.f32 0.5, %v1767_v19  ;;  %vm1632_vm4 = vweird.f32 %v1624_v0  ;;  %vm1642_vm6 = vweird.f32 %v1625_v17 }
 0x2a8   :  { %2747 = vrsqrt.f32 %v4344_v27  ;;  %v4363_v54 = vsub.f32 %v4341_v8, %v4356_v38  ;;  %vm1742_vm10 = vweird.f32 %v4344_v27 }
 0x2a9   :  { %2749 = vrsqrt.f32 %v4351_v33  ;;  %v4367_v4 = vsub.f32 %v4348_v39, %v4359_v26  ;;  %vm1752_vm12 = vweird.f32 %v4351_v33 }
 0x2aa   :  { %vm1832_vm0 = vcmp.ge.f32.partialorder %v4363_v54, 0.0 }
 0x2ab   :  { %v2744_v21 = vpop.eup %2743  ;;  %vm1833_vm1 = vcmp.ge.f32.partialorder %v4367_v4, 0.0 }
 0x2ac   :  { %v2746_v42 = vpop.eup %2745  ;;  %v1627_v1 = vmul.f32 %v2744_v21, %v1624_v0  ;;  %vm1633_vm5 = vweird.f32 %v2744_v21 }
 0x2ad   :  { %v1637_v5 = vmul.f32 %v2746_v42, %v1625_v17  ;;  %vm1643_vm7 = vweird.f32 %v2746_v42  ;;  %vm1634_vm8 = vmor %vm1632_vm4, %vm1633_vm5 }
 0x2ae   :  { %v1628_v58 = vmul.f32 %v2744_v21, %v1627_v1  ;;  %v2748_v60 = vpop.eup %2747  ;;  %vm1644_vm9 = vmor %vm1642_vm6, %vm1643_vm7 }
 0x2af   :  { %v1638_v45 = vmul.f32 %v2746_v42, %v1637_v5  ;;  %v4369_v20 = vpop.eup %2749  ;;  %v1737_v13 = vmul.f32 %v2748_v60, %v4344_v27  ;;  %vm1743_vm11 = vweird.f32 %v2748_v60 }
 0x2b0   :  { %v1629_v35 = vmul.f32 0.5, %v1628_v58  ;;  %v1747_v2 = vmul.f32 %v4369_v20, %v4351_v33  ;;  %vm1753_vm13 = vweird.f32 %v4369_v20  ;;  %vm1744_vm14 = vmor %vm1742_vm10, %vm1743_vm11 }
 0x2b1   :  { %v1639_v50 = vmul.f32 0.5, %v1638_v45  ;;  %v1738_v40 = vmul.f32 %v2748_v60, %v1737_v13  ;;  %vm1754_vm15 = vmor %vm1752_vm12, %vm1753_vm13 }
 0x2b2   :  { %v1630_v28 = vsub.f32 1.5, %v1629_v35  ;;  %v1748_v9 = vmul.f32 %v4369_v20, %v1747_v2 }
 0x2b3   :  { %v1640_v36 = vsub.f32 1.5, %v1639_v50  ;;  %v1739_v57 = vmul.f32 0.5, %v1738_v40 }
 0x2b4   :  { %v1631_v59 = vmul.f32 %v2744_v21, %v1630_v28  ;;  %v1749_v62 = vmul.f32 0.5, %v1748_v9 }
 0x2b5   :  { %v1641_v11 = vmul.f32 %v2746_v42, %v1640_v36  ;;  %v1740_v49 = vsub.f32 1.5, %v1739_v57 }
 0x2b6   :  { %v1635_v44 = vsel %vm1634_vm8, %v2744_v21, %v1631_v59  ;;  %v1750_v10 = vsub.f32 1.5, %v1749_v62 }
 0x2b7   :  { %v1645_v7 = vsel %vm1644_vm9, %v2746_v42, %v1641_v11  ;;  %v1646_v0 = vmul.f32 %v1635_v44, %v4300_v30  ;;  %v1650_v17 = vmul.f32 %v4253_v61, %v1635_v44  ;;  %v1741_v41 = vmul.f32 %v2748_v60, %v1740_v49 }
 0x2b8   :  { %v1647_v12 = vmul.f32 %v1645_v7, %v4308_v53  ;;  %v1651_v63 = vmul.f32 %v4255_v43, %v1645_v7  ;;  %v1751_v28 = vmul.f32 %v4369_v20, %v1750_v10 }
 0x2b9   :  { %v1664_v24 = vmul.f32 %v1646_v0, %v4183_v31  ;;  %v1666_v22 = vmul.f32 %v1650_v17, %v4123_v48  ;;  %v1670_v25 = vmul.f32 %v1650_v17, %v4183_v31  ;;  %v1672_v19 = vmul.f32 %v1646_v0, %v4123_v48 }
 0x2ba   :  { %v1665_v30 = vmul.f32 %v1647_v12, %v4187_v52  ;;  %v1667_v61 = vmul.f32 %v1651_v63, %v4125_v55  ;;  %v1671_v21 = vmul.f32 %v1651_v63, %v4187_v52  ;;  %v1673_v53 = vmul.f32 %v1647_v12, %v4125_v55 }
 0x2bb   :  { %v1668_v42 = vsub.f32 %v1664_v24, %v1666_v22  ;;  %v1674_v43 = vadd.f32 %v1672_v19, %v1670_v25  ;;  %v1676_v1 = vmul.f32 0.0, %v1646_v0  ;;  %v1677_v5 = vmul.f32 0.0, %v1647_v12 }
 0x2bc   :  { %v1669_v58 = vsub.f32 %v1665_v30, %v1667_v61  ;;  %v1675_v31 = vadd.f32 %v1673_v53, %v1671_v21  ;;  %v1678_v48 = vmul.f32 %v1650_v17, %v4191_v23  ;;  %v1679_v45 = vmul.f32 %v1651_v63, %v4193_v16 }
 0x2bd   :  { %v1682_v35 = vmul.f32 0.0, %v1650_v17  ;;  %v1683_v13 = vmul.f32 0.0, %v1651_v63  ;;  %v1684_v52 = vmul.f32 %v1646_v0, %v4191_v23  ;;  %v1685_v55 = vmul.f32 %v1647_v12, %v4193_v16 }
 0x2be   :  { %v1680_v50 = vsub.f32 %v1676_v1, %v1678_v48  ;;  %v1681_v27 = vsub.f32 %v1677_v5, %v1679_v45  ;;  %v1745_v2 = vsel %vm1744_vm14, %v2748_v60, %v1741_v41  ;;  %v1755_v23 = vsel %vm1754_vm15, %v4369_v20, %v1751_v28 }
 0x2bf   :  { %v1686_v40 = vadd.f32 %v1684_v52, %v1682_v35  ;;  %v1687_v36 = vadd.f32 %v1685_v55, %v1683_v13  ;;  %v1756_v9 = vmul.f32 %v1745_v2, %v4322_v15  ;;  %v1760_v59 = vmul.f32 %v4325_v29, %v1745_v2 }
 0x2c0   :  { %v1757_v16 = vmul.f32 %v1755_v23, %v4331_v18  ;;  %v1761_v57 = vmul.f32 %v4328_v3, %v1755_v23  ;;  %v1804_v61 = vmul.f32 %v4363_v54, %v4363_v54  ;;  %v1805_v1 = vmul.f32 %v4367_v4, %v4367_v4 }
 0x2c1   :  { %v1774_v11 = vmul.f32 %v1756_v9, %v1668_v42  ;;  %v1776_v33 = vmul.f32 %v1760_v59, %v1680_v50  ;;  %v1780_v62 = vmul.f32 %v1760_v59, %v1668_v42  ;;  %v1782_v44 = vmul.f32 %v1756_v9, %v1680_v50 }
 0x2c2   :  { %v1786_v49 = vmul.f32 %v1756_v9, %v1674_v43  ;;  %v1788_v60 = vmul.f32 %v1760_v59, %v1686_v40  ;;  %v1775_v7 = vmul.f32 %v1757_v16, %v1669_v58  ;;  %v1777_v0 = vmul.f32 %v1761_v57, %v1681_v27 }
 0x2c3   :  { %v4407_v17 = vsub.f32 %v1774_v11, %v1776_v33  ;;  %v1781_v12 = vmul.f32 %v1761_v57, %v1669_v58  ;;  %v1783_v15 = vmul.f32 %v1757_v16, %v1681_v27  ;;  %v4409_v63 = vadd.f32 %v1782_v44, %v1780_v62 }
 0x2c4   :  { %v1787_v29 = vmul.f32 %v1757_v16, %v1675_v31  ;;  %v1789_v20 = vmul.f32 %v1761_v57, %v1687_v36  ;;  %v4411_v41 = vsub.f32 %v1775_v7, %v1777_v0  ;;  %v1790_v18 = vsub.f32 %v1786_v49, %v1788_v60 }
 0x2c5   :  { %v1792_v3 = vmul.f32 %v1760_v59, %v1674_v43  ;;  %v1793_v10 = vmul.f32 %v1761_v57, %v1675_v31  ;;  %v4413_v24 = vadd.f32 %v1783_v15, %v1781_v12  ;;  %v1794_v25 = vmul.f32 %v1756_v9, %v1686_v40 }
 0x2c6   :  { %v1791_v22 = vsub.f32 %v1787_v29, %v1789_v20  ;;  %v1795_v19 = vmul.f32 %v1757_v16, %v1687_v36  ;;  %v1800_v30 = vadd.f32 %v1790_v18, %v1790_v18  ;;  %v1834_v27 = vsel %vm1832_vm0, 1.0, %v2866_v37 }
 0x2c7   :  { %v4417_v21 = vadd.f32 %v1794_v25, %v1792_v3  ;;  %v1835_v2 = vsel %vm1833_vm1, 1.0, %v2866_v37  ;;  %v1836_v16 = vand.u32 2147483647, %v4363_v54  ;;  %v1872_v33 = vadd.f32 %v4356_v38, %v4341_v8 }
 0x2c8   :  { %v4419_v53 = vadd.f32 %v1795_v19, %v1793_v10  ;;  %v1801_v42 = vadd.f32 %v1791_v22, %v1791_v22  ;;  %v1802_v5 = vmul.f32 %v1800_v30, %v1800_v30  ;;  %v4427_v9 = vmul.f32 %v1834_v27, %v1800_v30 }
 0x2c9   :  { %v1873_v62 = vadd.f32 %v4359_v26, %v4348_v39  ;;  %v1837_v7 = vand.u32 2147483647, %v4367_v4  ;;  %v4438_v8 = vmul.f32 0.5, %v4346_v46  ;;  %v4441_v10 = vmul.f32 0.5, %v4353_v6 }
 0x2ca   :  { %v1803_v43 = vmul.f32 %v1801_v42, %v1801_v42  ;;  %v1806_v58 = vadd.f32 %v1804_v61, %v1802_v5  ;;  %v4429_v59 = vmul.f32 %v1835_v2, %v1801_v42  ;;  %v4448_v61 = vmul.f32 0.5, %v1656_v34 }
 0x2cb   :  { %v4453_v46 = vmul.f32 0.5, %v1657_v56 }
 0x2cc   :  { %v1807_v31 = vadd.f32 %v1805_v1, %v1803_v43  ;;  %2751 = vrsqrt.f32 %v1806_v58  ;;  %vm1815_vm2 = vcmp.eq.f32.partialorder %v1806_v58, inf  ;;  %v1818_v57 = vand.u32 2147483648, %v1806_v58 }
 0x2cd   :  { %vm1817_vm3 = vcmp.eq.f32.partialorder %v1806_v58, 0.0 }
 0x2ce   :  { %2753 = vrsqrt.f32 %v1807_v31  ;;  %vm1827_vm4 = vcmp.eq.f32.partialorder %v1807_v31, inf  ;;  %v1830_v49 = vand.u32 2147483648, %v1807_v31  ;;  %vm1829_vm5 = vcmp.eq.f32.partialorder %v1807_v31, 0.0 }
 0x2d2   :  { %v2752_v48 = vpop.eup %2751 }
 0x2d3   :  { %v1809_v35 = vmul.f32 %v2752_v48, %v1806_v58 }
 0x2d4   :  { %v2754_v45 = vpop.eup %2753 }
 0x2d5   :  { %v1821_v13 = vmul.f32 %v2754_v45, %v1807_v31  ;;  %v1810_v52 = vmul.f32 %v2752_v48, %v1809_v35 }
 0x2d7   :  { %v1822_v55 = vmul.f32 %v2754_v45, %v1821_v13  ;;  %v1811_v50 = vmul.f32 0.5, %v1810_v52 }
 0x2d9   :  { %v1823_v28 = vmul.f32 0.5, %v1822_v55  ;;  %v1812_v40 = vsub.f32 1.5, %v1811_v50 }
 0x2db   :  { %v1824_v36 = vsub.f32 1.5, %v1823_v28  ;;  %v1813_v23 = vmul.f32 %v2752_v48, %v1812_v40 }
 0x2dd   :  { %v1825_v11 = vmul.f32 %v2754_v45, %v1824_v36  ;;  %v1814_v44 = vmul.f32 %v1813_v23, %v1806_v58 }
 0x2df   :  { %v1826_v60 = vmul.f32 %v1825_v11, %v1807_v31  ;;  %v1816_v0 = vsel %vm1815_vm2, %v1806_v58, %v1814_v44 }
 0x2e0   :  { %v1819_v12 = vsel %vm1817_vm3, %v1818_v57, %v1816_v0 }
 0x2e1   :  { %v1828_v15 = vsel %vm1827_vm4, %v1807_v31, %v1826_v60  ;;  %v1838_v29 = vadd.f32 %v1836_v16, %v1819_v12  ;;  %v1874_v20 = vmul.f32 %v1834_v27, %v1819_v12 }
 0x2e2   :  { %v1831_v54 = vsel %vm1829_vm5, %v1830_v49, %v1828_v15 }
 0x2e3   :  { %v1839_v18 = vadd.f32 %v1837_v7, %v1831_v54  ;;  %v1875_v3 = vmul.f32 %v1835_v2, %v1831_v54  ;;  %v1840_v39 = vadd.f32 1e-18, %v1838_v29  ;;  %v1876_v38 = vsub.f32 %v1872_v33, %v1874_v20 }
 0x2e4   :  { %v1880_v26 = vadd.f32 %v1874_v20, %v1872_v33 }
 0x2e5   :  { %v1841_v22 = vadd.f32 1e-18, %v1839_v18  ;;  %v1877_v25 = vsub.f32 %v1873_v62, %v1875_v3  ;;  %v1881_v4 = vadd.f32 %v1875_v3, %v1873_v62  ;;  %v1842_v19 = vmul.f32 %v1840_v39, %v1840_v39 }
 0x2e6   :  { %v4443_v30 = vmul.f32 0.5, %v1880_v26  ;;  %v4457_v58 = vmul.f32 0.5, %v1876_v38 }
 0x2e7   :  { %v1843_v42 = vmul.f32 %v1841_v22, %v1841_v22  ;;  %v4455_v1 = vmul.f32 0.5, %v1881_v4  ;;  %v1844_v6 = vadd.f32 %v1842_v19, %v1802_v5  ;;  %v4459_v31 = vmul.f32 0.5, %v1877_v25 }
 0x2e8   :  { %v4463_v48 = vsub.f32 %v4443_v30, %v4438_v8  ;;  %v4471_v51 = vsub.f32 %v4457_v58, %v4448_v61 }
 0x2e9   :  { %v1845_v14 = vadd.f32 %v1843_v42, %v1803_v43  ;;  %v4467_v32 = vsub.f32 %v4455_v1, %v4441_v10  ;;  %2755 = vrsqrt.f32 %v1844_v6  ;;  %v4475_v47 = vsub.f32 %v4459_v31, %v4453_v46 }
 0x2ea   :  { %vm1852_vm6 = vweird.f32 %v1844_v6  ;;  %vm1938_vm12 = vcmp.ge.f32.partialorder %v4463_v48, 0.0 }
 0x2eb   :  { %2757 = vrsqrt.f32 %v1845_v14  ;;  %vm1862_vm8 = vweird.f32 %v1845_v14  ;;  %v2021_v25 = vmul.f32 %v4475_v47, %v4475_v47  ;;  %v1911_v19 = vmul.f32 %v4467_v32, %v4467_v32 }
 0x2ec   :  { %vm1939_vm13 = vcmp.ge.f32.partialorder %v4467_v32, 0.0 }
 0x2ef   :  { %v2756_v34 = vpop.eup %2755 }
 0x2f0   :  { %v1847_v5 = vmul.f32 %v2756_v34, %v1844_v6  ;;  %vm1853_vm7 = vweird.f32 %v2756_v34 }
 0x2f1   :  { %v2758_v56 = vpop.eup %2757  ;;  %vm1854_vm10 = vmor %vm1852_vm6, %vm1853_vm7  ;;  %vm2048_vm6 = vcmp.ge.f32.partialorder %v4471_v51, 0.0  ;;  %vm2049_vm7 = vcmp.ge.f32.partialorder %v4475_v47, 0.0 }
 0x2f2   :  { %v1857_v45 = vmul.f32 %v2758_v56, %v1845_v14  ;;  %v1848_v35 = vmul.f32 %v2756_v34, %v1847_v5  ;;  %vm1863_vm9 = vweird.f32 %v2758_v56 }
 0x2f3   :  { %vm1864_vm11 = vmor %vm1862_vm8, %vm1863_vm9 }
 0x2f4   :  { %v1858_v43 = vmul.f32 %v2758_v56, %v1857_v45  ;;  %v1849_v13 = vmul.f32 0.5, %v1848_v35 }
 0x2f6   :  { %v1859_v52 = vmul.f32 0.5, %v1858_v43  ;;  %v1850_v55 = vsub.f32 1.5, %v1849_v13 }
 0x2f8   :  { %v1860_v50 = vsub.f32 1.5, %v1859_v52  ;;  %v1851_v27 = vmul.f32 %v2756_v34, %v1850_v55 }
 0x2fa   :  { %v1861_v2 = vmul.f32 %v2758_v56, %v1860_v50  ;;  %v1855_v28 = vsel %vm1854_vm10, %v2756_v34, %v1851_v27  ;;  %v1940_v27 = vsel %vm1938_vm12, 1.0, %v2866_v37 }
 0x2fb   :  { %v1866_v36 = vmul.f32 %v1855_v28, %v1840_v39  ;;  %v1870_v23 = vmul.f32 %v4427_v9, %v1855_v28 }
 0x2fc   :  { %v1865_v40 = vsel %vm1864_vm11, %v2758_v56, %v1861_v2  ;;  %v1941_v2 = vsel %vm1939_vm13, 1.0, %v2866_v37 }
 0x2fd   :  { %v1867_v16 = vmul.f32 %v1865_v40, %v1841_v22  ;;  %v1871_v57 = vmul.f32 %v4429_v59, %v1865_v40  ;;  %v1884_v11 = vmul.f32 %v1866_v36, %v4407_v17  ;;  %v1886_v33 = vmul.f32 0.0, %v1870_v23 }
 0x2fe   :  { %v1890_v62 = vmul.f32 %v1870_v23, %v4407_v17  ;;  %v1892_v44 = vmul.f32 0.0, %v1866_v36  ;;  %v1896_v9 = vmul.f32 %v1870_v23, %v4417_v21  ;;  %v1900_v20 = vmul.f32 %v1866_v36, %v4417_v21 }
 0x2ff   :  { %v1885_v49 = vmul.f32 %v1867_v16, %v4411_v41  ;;  %v1887_v60 = vmul.f32 0.0, %v1871_v57  ;;  %v1891_v7 = vmul.f32 %v1871_v57, %v4411_v41  ;;  %v1893_v0 = vmul.f32 0.0, %v1867_v16 }
 0x300   :  { %v1888_v12 = vsub.f32 %v1884_v11, %v1886_v33  ;;  %v4483_v15 = vadd.f32 %v1892_v44, %v1890_v62  ;;  %v1897_v54 = vmul.f32 %v1871_v57, %v4419_v53  ;;  %v1901_v17 = vmul.f32 %v1867_v16, %v4419_v53 }
 0x301   :  { %v1889_v59 = vsub.f32 %v1885_v49, %v1887_v60  ;;  %v4487_v29 = vadd.f32 %v1893_v0, %v1891_v7  ;;  %v4491_v18 = vsub.f32 %v1892_v44, %v1896_v9  ;;  %v1902_v41 = vadd.f32 %v1900_v20, %v1886_v33 }
 0x302   :  { %v4493_v3 = vsub.f32 %v1893_v0, %v1897_v54  ;;  %v1903_v39 = vadd.f32 %v1901_v17, %v1887_v60  ;;  %v4495_v38 = vadd.f32 %v1888_v12, %v1888_v12  ;;  %v2020_v22 = vmul.f32 %v4471_v51, %v4471_v51 }
 0x303   :  { %v4497_v26 = vadd.f32 %v1889_v59, %v1889_v59  ;;  %v1906_v4 = vadd.f32 %v1902_v41, %v1902_v41  ;;  %v1910_v53 = vmul.f32 %v4463_v48, %v4463_v48  ;;  %v1942_v36 = vand.u32 2147483647, %v4463_v48 }
 0x304   :  { %v1907_v21 = vadd.f32 %v1903_v39, %v1903_v39  ;;  %v4509_v42 = vmul.f32 %v4495_v38, %v4495_v38  ;;  %v1943_v23 = vand.u32 2147483647, %v4467_v32  ;;  %v2052_v33 = vand.u32 2147483647, %v4471_v51 }
 0x305   :  { %v4513_v6 = vmul.f32 %v4497_v26, %v4497_v26  ;;  %v4515_v14 = vmul.f32 %v1906_v4, %v1906_v4  ;;  %v2053_v62 = vand.u32 2147483647, %v4475_v47  ;;  %v4555_v20 = vmul.f32 %v1940_v27, %v1906_v4 }
 0x306   :  { %v4517_v34 = vmul.f32 %v1907_v21, %v1907_v21  ;;  %v4520_v56 = vadd.f32 %v2020_v22, %v4509_v42  ;;  %v4557_v17 = vmul.f32 %v1941_v2, %v1907_v21  ;;  %v2051_v47 = vsel %vm2049_vm7, 1.0, %v2866_v37 }
 0x307   :  { %v4523_v5 = vadd.f32 %v2021_v25, %v4513_v6  ;;  %v4526_v45 = vadd.f32 %v1910_v53, %v4515_v14 }
 0x308   :  { %v4529_v35 = vadd.f32 %v1911_v19, %v4517_v34  ;;  %2759 = vrsqrt.f32 %v4520_v56  ;;  %vm2031_vm14 = vcmp.eq.f32.partialorder %v4520_v56, inf  ;;  %vm2033_vm15 = vcmp.eq.f32.partialorder %v4520_v56, 0.0 }
 0x309   :  { %2761 = vrsqrt.f32 %v4526_v45  ;;  %vm1921_vm0 = vcmp.eq.f32.partialorder %v4526_v45, inf  ;;  %v2034_v48 = vand.u32 2147483648, %v4520_v56  ;;  %vm1923_vm1 = vcmp.eq.f32.partialorder %v4526_v45, 0.0 }
 0x30a   :  { %2763 = vrsqrt.f32 %v4529_v35  ;;  %v1924_v7 = vand.u32 2147483648, %v4526_v45  ;;  %vm1933_vm2 = vcmp.eq.f32.partialorder %v4529_v35, inf  ;;  %vm1935_vm3 = vcmp.eq.f32.partialorder %v4529_v35, 0.0 }
 0x30b   :  { %2765 = vrsqrt.f32 %v4523_v5  ;;  %v1936_v22 = vand.u32 2147483648, %v4529_v35  ;;  %vm2043_vm4 = vcmp.eq.f32.partialorder %v4523_v5, inf  ;;  %v1978_v19 = vadd.f32 %v4443_v30, %v4438_v8 }
 0x30c   :  { %vm2045_vm5 = vcmp.eq.f32.partialorder %v4523_v5, 0.0 }
 0x30e   :  { %v2760_v43 = vpop.eup %2759 }
 0x30f   :  { %v2762_v13 = vpop.eup %2761  ;;  %v2025_v52 = vmul.f32 %v2760_v43, %v4520_v56 }
 0x310   :  { %v2764_v55 = vpop.eup %2763  ;;  %v1915_v50 = vmul.f32 %v2762_v13, %v4526_v45 }
 0x311   :  { %v2766_v28 = vpop.eup %2765  ;;  %v1927_v40 = vmul.f32 %v2764_v55, %v4529_v35  ;;  %v2026_v16 = vmul.f32 %v2760_v43, %v2025_v52  ;;  %v1979_v52 = vadd.f32 %v4455_v1, %v4441_v10  ;;  %v2050_v1 = vsel %vm2048_vm6, 1.0, %v2866_v37 }
 0x312   :  { %v1916_v57 = vmul.f32 %v2762_v13, %v1915_v50  ;;  %v2037_v11 = vmul.f32 %v2766_v28, %v4523_v5 }
 0x313   :  { %v1928_v44 = vmul.f32 %v2764_v55, %v1927_v40  ;;  %v2027_v49 = vmul.f32 0.5, %v2026_v16 }
 0x314   :  { %v1917_v60 = vmul.f32 0.5, %v1916_v57  ;;  %v2038_v32 = vmul.f32 %v2766_v28, %v2037_v11 }
 0x315   :  { %v1929_v0 = vmul.f32 0.5, %v1928_v44  ;;  %v2028_v12 = vsub.f32 1.5, %v2027_v49 }
 0x316   :  { %v1918_v9 = vsub.f32 1.5, %v1917_v60  ;;  %v2039_v54 = vmul.f32 0.5, %v2038_v32 }
 0x317   :  { %v1930_v59 = vsub.f32 1.5, %v1929_v0  ;;  %v2029_v41 = vmul.f32 %v2760_v43, %v2028_v12  ;;  %v2046_v43 = vand.u32 2147483648, %v4523_v5 }
 0x318   :  { %v1919_v39 = vmul.f32 %v2762_v13, %v1918_v9  ;;  %v2040_v25 = vsub.f32 1.5, %v2039_v54  ;;  %v2084_v54 = vmul.f32 %v2050_v1, %v4495_v38 }
 0x319   :  { %v1931_v53 = vmul.f32 %v2764_v55, %v1930_v59  ;;  %v2030_v50 = vmul.f32 %v2029_v41, %v4520_v56  ;;  %v4619_v59 = vmul.f32 %v2051_v47, %v4497_v26 }
 0x31a   :  { %v1920_v4 = vmul.f32 %v1919_v39, %v4526_v45  ;;  %v2041_v21 = vmul.f32 %v2766_v28, %v2040_v25  ;;  %v2088_v39 = vadd.f32 %v4457_v58, %v4448_v61 }
 0x31b   :  { %v1932_v13 = vmul.f32 %v1931_v53, %v4529_v35  ;;  %v2032_v55 = vsel %vm2031_vm14, %v4520_v56, %v2030_v50 }
 0x31c   :  { %v1922_v8 = vsel %vm1921_vm0, %v4526_v45, %v1920_v4  ;;  %v2035_v10 = vsel %vm2033_vm15, %v2034_v48, %v2032_v55  ;;  %v2042_v30 = vmul.f32 %v2041_v21, %v4523_v5 }
 0x31d   :  { %v1925_v28 = vsel %vm1923_vm1, %v1924_v7, %v1922_v8  ;;  %v1934_v51 = vsel %vm1933_vm2, %v4529_v35, %v1932_v13  ;;  %v2054_v40 = vadd.f32 %v2052_v33, %v2035_v10 }
 0x31e   :  { %v1937_v16 = vsel %vm1935_vm3, %v1936_v22, %v1934_v51  ;;  %v1944_v57 = vadd.f32 %v1942_v36, %v1925_v28  ;;  %v1980_v56 = vmul.f32 %v1940_v27, %v1925_v28  ;;  %v2044_v11 = vsel %vm2043_vm4, %v4523_v5, %v2042_v30 }
 0x31f   :  { %v1945_v44 = vadd.f32 %v1943_v23, %v1937_v16  ;;  %v1981_v49 = vmul.f32 %v1941_v2, %v1937_v16  ;;  %v2047_v45 = vsel %vm2045_vm5, %v2046_v43, %v2044_v11  ;;  %v4595_v60 = vadd.f32 1e-18, %v2054_v40 }
 0x320   :  { %v4597_v48 = vadd.f32 1e-18, %v1944_v57  ;;  %v1982_v32 = vsub.f32 %v1978_v19, %v1980_v56  ;;  %v4599_v33 = vadd.f32 %v1980_v56, %v1978_v19  ;;  %v2055_v35 = vadd.f32 %v2053_v62, %v2047_v45 }
 0x321   :  { %v4601_v7 = vadd.f32 1e-18, %v1945_v44  ;;  %v1983_v27 = vsub.f32 %v1979_v52, %v1981_v49  ;;  %v4603_v36 = vadd.f32 %v1981_v49, %v1979_v52  ;;  %v2058_v23 = vmul.f32 %v4595_v60, %v4595_v60 }
 0x322   :  { %v1948_v5 = vmul.f32 %v4597_v48, %v4597_v48  ;;  %v4609_v2 = vadd.f32 1e-18, %v2055_v35  ;;  %v2091_v25 = vmul.f32 %v2051_v47, %v2047_v45  ;;  %v4627_v53 = vmul.f32 0.5, %v1982_v32 }
 0x323   :  { %v1949_v0 = vmul.f32 %v4601_v7, %v4601_v7  ;;  %v2060_v12 = vadd.f32 %v2058_v23, %v4509_v42  ;;  %v2089_v42 = vadd.f32 %v4459_v31, %v4453_v46  ;;  %v4629_v38 = vmul.f32 0.5, %v1983_v27 }
 0x324   :  { %v1950_v62 = vadd.f32 %v1948_v5, %v4515_v14  ;;  %v2059_v9 = vmul.f32 %v4609_v2, %v4609_v2  ;;  %v2090_v14 = vmul.f32 %v2050_v1, %v2035_v10 }
 0x325   :  { %v1951_v41 = vadd.f32 %v1949_v0, %v4517_v34  ;;  %2767 = vrsqrt.f32 %v2060_v12  ;;  %v2093_v34 = vsub.f32 %v2089_v42, %v2091_v25  ;;  %v4633_v52 = vadd.f32 %v2091_v25, %v2089_v42 }
 0x326   :  { %2769 = vrsqrt.f32 %v1950_v62  ;;  %v2061_v22 = vadd.f32 %v2059_v9, %v4513_v6  ;;  %v2092_v26 = vsub.f32 %v2088_v39, %v2090_v14  ;;  %v4631_v19 = vadd.f32 %v2090_v14, %v2088_v39 }
 0x327   :  { %2771 = vrsqrt.f32 %v1951_v41  ;;  %v4637_v6 = vmul.f32 0.5, %v2093_v34  ;;  %vm2068_vm8 = vweird.f32 %v2060_v12  ;;  %vm1958_vm10 = vweird.f32 %v1950_v62 }
 0x328   :  { %2773 = vrsqrt.f32 %v2061_v22  ;;  %v4635_v58 = vmul.f32 0.5, %v2092_v26  ;;  %vm1968_vm12 = vweird.f32 %v1951_v41  ;;  %vm2078_vm15 = vweird.f32 %v2061_v22 }
 0x329   :  { %v4645_v43 = vsub.f32 %v4629_v38, %v4637_v6 }
 0x32a   :  { %v4641_v21 = vsub.f32 %v4627_v53, %v4635_v58 }
 0x32b   :  { %v2768_v61 = vpop.eup %2767  ;;  %vm2159_vm5 = vcmp.ge.f32.partialorder %v4645_v43, 0.0 }
 0x32c   :  { %v2770_v46 = vpop.eup %2769  ;;  %v2063_v31 = vmul.f32 %v2768_v61, %v2060_v12  ;;  %vm2069_vm9 = vweird.f32 %v2768_v61  ;;  %vm2158_vm4 = vcmp.ge.f32.partialorder %v4641_v21, 0.0 }
 0x32d   :  { %v2772_v50 = vpop.eup %2771  ;;  %v1953_v4 = vmul.f32 %v2770_v46, %v1950_v62  ;;  %vm1959_vm11 = vweird.f32 %v2770_v46  ;;  %vm2070_vm14 = vmor %vm2068_vm8, %vm2069_vm9 }
 0x32e   :  { %v2774_v13 = vpop.eup %2773  ;;  %v1963_v55 = vmul.f32 %v2772_v50, %v1951_v41  ;;  %v2064_v8 = vmul.f32 %v2768_v61, %v2063_v31  ;;  %vm1969_vm13 = vweird.f32 %v2772_v50  ;;  %vm1960_vm1 = vmor %vm1958_vm10, %vm1959_vm11 }
 0x32f   :  { %v1954_v10 = vmul.f32 %v2770_v46, %v1953_v4  ;;  %v2073_v30 = vmul.f32 %v2774_v13, %v2061_v22  ;;  %vm2079_vm0 = vweird.f32 %v2774_v13  ;;  %vm1970_vm2 = vmor %vm1968_vm12, %vm1969_vm13 }
 0x330   :  { %v1964_v1 = vmul.f32 %v2772_v50, %v1963_v55  ;;  %v2065_v28 = vmul.f32 0.5, %v2064_v8  ;;  %vm2080_vm3 = vmor %vm2078_vm15, %vm2079_vm0 }
 0x331   :  { %v1955_v51 = vmul.f32 0.5, %v1954_v10  ;;  %v2074_v47 = vmul.f32 %v2774_v13, %v2073_v30 }
 0x332   :  { %v1965_v40 = vmul.f32 0.5, %v1964_v1  ;;  %v2066_v16 = vsub.f32 1.5, %v2065_v28 }
 0x333   :  { %v1956_v57 = vsub.f32 1.5, %v1955_v51  ;;  %v2075_v56 = vmul.f32 0.5, %v2074_v47 }
 0x334   :  { %v1966_v11 = vsub.f32 1.5, %v1965_v40  ;;  %v2067_v44 = vmul.f32 %v2768_v61, %v2066_v16 }
 0x335   :  { %v1957_v49 = vmul.f32 %v2770_v46, %v1956_v57  ;;  %v2076_v45 = vsub.f32 1.5, %v2075_v56 }
 0x336   :  { %v1967_v32 = vmul.f32 %v2772_v50, %v1966_v11  ;;  %v2071_v35 = vsel %vm2070_vm14, %v2768_v61, %v2067_v44 }
 0x337   :  { %v1961_v27 = vsel %vm1960_vm1, %v2770_v46, %v1957_v49  ;;  %v2077_v23 = vmul.f32 %v2774_v13, %v2076_v45  ;;  %v2082_v5 = vmul.f32 %v2071_v35, %v4595_v60  ;;  %v2086_v0 = vmul.f32 %v2084_v54, %v2071_v35 }
 0x338   :  { %v1971_v12 = vsel %vm1970_vm2, %v2772_v50, %v1967_v32  ;;  %v1972_v62 = vmul.f32 %v1961_v27, %v4597_v48  ;;  %v1976_v9 = vmul.f32 %v4555_v20, %v1961_v27 }
 0x339   :  { %v1973_v41 = vmul.f32 %v1971_v12, %v4601_v7  ;;  %v1977_v39 = vmul.f32 %v4557_v17, %v1971_v12  ;;  %v2081_v22 = vsel %vm2080_vm3, %v2774_v13, %v2077_v23 }
 0x33a   :  { %v1990_v42 = vmul.f32 %v1972_v62, %v4409_v63  ;;  %v1992_v14 = vmul.f32 %v1976_v9, %v4483_v15  ;;  %v1996_v25 = vmul.f32 %v1976_v9, %v4409_v63  ;;  %v1998_v26 = vmul.f32 %v1972_v62, %v4483_v15 }
 0x33b   :  { %v1991_v60 = vmul.f32 %v1973_v41, %v4413_v24  ;;  %v1993_v54 = vmul.f32 %v1977_v39, %v4487_v29  ;;  %v1997_v48 = vmul.f32 %v1977_v39, %v4413_v24  ;;  %v1999_v20 = vmul.f32 %v1973_v41, %v4487_v29 }
 0x33c   :  { %v1994_v7 = vsub.f32 %v1990_v42, %v1992_v14  ;;  %v2000_v34 = vadd.f32 %v1998_v26, %v1996_v25  ;;  %v2002_v17 = vmul.f32 %v1972_v62, %v4491_v18  ;;  %v2003_v61 = vmul.f32 %v1973_v41, %v4493_v3 }
 0x33d   :  { %v1995_v46 = vsub.f32 %v1991_v60, %v1993_v54  ;;  %v2001_v31 = vadd.f32 %v1999_v20, %v1997_v48  ;;  %v2004_v50 = vmul.f32 0.0, %v1976_v9  ;;  %v2005_v63 = vmul.f32 0.0, %v1977_v39 }
 0x33e   :  { %v2008_v15 = vmul.f32 %v1976_v9, %v4491_v18  ;;  %v2009_v4 = vmul.f32 %v1977_v39, %v4493_v3  ;;  %v2010_v13 = vmul.f32 0.0, %v1972_v62  ;;  %v2011_v55 = vmul.f32 0.0, %v1973_v41 }
 0x33f   :  { %v2006_v8 = vsub.f32 %v2002_v17, %v2004_v50  ;;  %v2007_v24 = vsub.f32 %v2003_v61, %v2005_v63  ;;  %v2083_v29 = vmul.f32 %v2081_v22, %v4609_v2  ;;  %v2087_v10 = vmul.f32 %v4619_v59, %v2081_v22 }
 0x340   :  { %v2012_v30 = vadd.f32 %v2010_v13, %v2008_v15  ;;  %v2013_v1 = vadd.f32 %v2011_v55, %v2009_v4  ;;  %v2100_v28 = vmul.f32 %v2082_v5, %v1994_v7  ;;  %v2106_v51 = vmul.f32 %v2086_v0, %v1994_v7 }
 0x341   :  { %v2101_v47 = vmul.f32 %v2083_v29, %v1995_v46  ;;  %v2102_v40 = vmul.f32 %v2086_v0, %v2006_v8  ;;  %v2103_v16 = vmul.f32 %v2087_v10, %v2007_v24  ;;  %v2107_v57 = vmul.f32 %v2087_v10, %v1995_v46 }
 0x342   :  { %v2108_v56 = vmul.f32 %v2082_v5, %v2006_v8  ;;  %v2109_v18 = vmul.f32 %v2083_v29, %v2007_v24  ;;  %v2112_v11 = vmul.f32 %v2082_v5, %v2000_v34  ;;  %v2113_v3 = vmul.f32 %v2083_v29, %v2001_v31 }
 0x343   :  { %v2104_v44 = vsub.f32 %v2100_v28, %v2102_v40  ;;  %v2105_v49 = vsub.f32 %v2101_v47, %v2103_v16  ;;  %v2114_v45 = vmul.f32 %v2086_v0, %v2012_v30  ;;  %v2115_v32 = vmul.f32 %v2087_v10, %v2013_v1 }
 0x344   :  { %v4666_v35 = vadd.f32 %v2108_v56, %v2106_v51  ;;  %v4668_v2 = vadd.f32 %v2109_v18, %v2107_v57  ;;  %v2118_v59 = vmul.f32 %v2086_v0, %v2000_v34  ;;  %v2119_v27 = vmul.f32 %v2087_v10, %v2001_v31 }
 0x345   :  { %v4670_v23 = vsub.f32 %v2112_v11, %v2114_v45  ;;  %v4672_v12 = vsub.f32 %v2113_v3, %v2115_v32  ;;  %v2120_v62 = vmul.f32 %v2082_v5, %v2012_v30  ;;  %v2121_v9 = vmul.f32 %v2083_v29, %v2013_v1 }
 0x346   :  { %v2126_v41 = vadd.f32 %v2104_v44, %v2104_v44  ;;  %v2127_v39 = vadd.f32 %v2105_v49, %v2105_v49  ;;  %v2130_v22 = vmul.f32 %v4641_v21, %v4641_v21  ;;  %v2131_v42 = vmul.f32 %v4645_v43, %v4645_v43 }
 0x347   :  { %v4678_v14 = vadd.f32 %v2120_v62, %v2118_v59  ;;  %v4680_v25 = vadd.f32 %v2121_v9, %v2119_v27  ;;  %v2160_v46 = vsel %vm2158_vm4, 1.0, %v2866_v37  ;;  %v2161_v31 = vsel %vm2159_vm5, 1.0, %v2866_v37 }
 0x348   :  { %v2128_v0 = vmul.f32 %v2126_v41, %v2126_v41  ;;  %v2129_v26 = vmul.f32 %v2127_v39, %v2127_v39  ;;  %v4686_v4 = vmul.f32 %v2160_v46, %v2126_v41  ;;  %v4688_v13 = vmul.f32 %v2161_v31, %v2127_v39 }
 0x349   :  { %v2162_v8 = vand.u32 2147483647, %v4641_v21  ;;  %v2198_v10 = vadd.f32 %v4635_v58, %v4627_v53  ;;  %v2199_v30 = vadd.f32 %v4637_v6, %v4629_v38  ;;  %v2163_v47 = vand.u32 2147483647, %v4645_v43 }
 0x34a   :  { %v2132_v60 = vadd.f32 %v2130_v22, %v2128_v0  ;;  %v2133_v54 = vadd.f32 %v2131_v42, %v2129_v26  ;;  %v4697_v11 = vmul.f32 0.5, %v4599_v33  ;;  %v4700_v53 = vmul.f32 0.5, %v4603_v36 }
 0x34b   :  { %v4703_v6 = vmul.f32 0.5, %v4631_v19  ;;  %v4706_v49 = vmul.f32 0.5, %v4633_v52 }
 0x34c   :  { %2775 = vrsqrt.f32 %v2132_v60  ;;  %vm2141_vm6 = vcmp.eq.f32.partialorder %v2132_v60, inf  ;;  %v2144_v24 = vand.u32 2147483648, %v2132_v60  ;;  %vm2143_vm7 = vcmp.eq.f32.partialorder %v2132_v60, 0.0 }
 0x34d   :  { %2777 = vrsqrt.f32 %v2133_v54  ;;  %vm2153_vm8 = vcmp.eq.f32.partialorder %v2133_v54, inf  ;;  %v2156_v28 = vand.u32 2147483648, %v2133_v54  ;;  %vm2155_vm9 = vcmp.eq.f32.partialorder %v2133_v54, 0.0 }
 0x352   :  { %v2776_v5 = vpop.eup %2775 }
 0x353   :  { %v2778_v48 = vpop.eup %2777  ;;  %v2135_v20 = vmul.f32 %v2776_v5, %v2132_v60 }
 0x354   :  { %v2147_v7 = vmul.f32 %v2778_v48, %v2133_v54 }
 0x355   :  { %v2136_v34 = vmul.f32 %v2776_v5, %v2135_v20 }
 0x356   :  { %v2148_v17 = vmul.f32 %v2778_v48, %v2147_v7 }
 0x357   :  { %v2137_v61 = vmul.f32 0.5, %v2136_v34 }
 0x358   :  { %v2149_v50 = vmul.f32 0.5, %v2148_v17 }
 0x359   :  { %v2138_v63 = vsub.f32 1.5, %v2137_v61 }
 0x35a   :  { %v2150_v15 = vsub.f32 1.5, %v2149_v50 }
 0x35b   :  { %v2139_v55 = vmul.f32 %v2776_v5, %v2138_v63 }
 0x35c   :  { %v2151_v29 = vmul.f32 %v2778_v48, %v2150_v15 }
 0x35d   :  { %v2140_v1 = vmul.f32 %v2139_v55, %v2132_v60 }
 0x35e   :  { %v2152_v51 = vmul.f32 %v2151_v29, %v2133_v54 }
 0x35f   :  { %v2142_v40 = vsel %vm2141_vm6, %v2132_v60, %v2140_v1 }
 0x360   :  { %v2145_v16 = vsel %vm2143_vm7, %v2144_v24, %v2142_v40  ;;  %v2154_v57 = vsel %vm2153_vm8, %v2133_v54, %v2152_v51 }
 0x361   :  { %v2157_v21 = vsel %vm2155_vm9, %v2156_v28, %v2154_v57  ;;  %v2164_v56 = vadd.f32 %v2162_v8, %v2145_v16  ;;  %v2200_v18 = vmul.f32 %v2160_v46, %v2145_v16 }
 0x362   :  { %v2165_v38 = vadd.f32 %v2163_v47, %v2157_v21  ;;  %v2201_v58 = vmul.f32 %v2161_v31, %v2157_v21 }
 0x363   :  { %v2166_v3 = vadd.f32 1e-18, %v2164_v56  ;;  %v2202_v44 = vsub.f32 %v2198_v10, %v2200_v18  ;;  %v2206_v43 = vadd.f32 %v2200_v18, %v2198_v10 }
 0x364   :  { %v2167_v45 = vadd.f32 1e-18, %v2165_v38  ;;  %v2203_v32 = vsub.f32 %v2199_v30, %v2201_v58  ;;  %v2207_v59 = vadd.f32 %v2201_v58, %v2199_v30 }
 0x365   :  { %v2168_v27 = vmul.f32 %v2166_v3, %v2166_v3  ;;  %v4708_v33 = vmul.f32 0.5, %v2202_v44  ;;  %v4710_v62 = vmul.f32 0.5, %v2206_v43 }
 0x366   :  { %v2169_v36 = vmul.f32 %v2167_v45, %v2167_v45  ;;  %v4712_v9 = vmul.f32 0.5, %v2203_v32  ;;  %v4714_v41 = vmul.f32 0.5, %v2207_v59 }
 0x367   :  { %v2170_v19 = vadd.f32 %v2168_v27, %v2128_v0  ;;  %v4718_v39 = vsub.f32 %v4697_v11, %v4708_v33  ;;  %v4726_v42 = vsub.f32 %v4710_v62, %v4703_v6 }
 0x368   :  { %v2171_v52 = vadd.f32 %v2169_v36, %v2129_v26  ;;  %v4722_v22 = vsub.f32 %v4700_v53, %v4712_v9  ;;  %v4730_v60 = vsub.f32 %v4714_v41, %v4706_v49 }
 0x369   :  { %2779 = vrsqrt.f32 %v2170_v19  ;;  %vm2178_vm10 = vweird.f32 %v2170_v19  ;;  %vm2264_vm0 = vcmp.ge.f32.partialorder %v4718_v39, 0.0  ;;  %vm2362_vm9 = vcmp.ge.f32.partialorder %v4726_v42, 0.0 }
 0x36a   :  { %2781 = vrsqrt.f32 %v2171_v52  ;;  %vm2188_vm12 = vweird.f32 %v2171_v52  ;;  %v2237_v32 = vmul.f32 %v4722_v22, %v4722_v22  ;;  %v2335_v27 = vmul.f32 %v4730_v60, %v4730_v60 }
 0x36b   :  { %vm2265_vm1 = vcmp.ge.f32.partialorder %v4722_v22, 0.0 }
 0x36f   :  { %v2780_v0 = vpop.eup %2779 }
 0x370   :  { %v2782_v54 = vpop.eup %2781  ;;  %v2173_v5 = vmul.f32 %v2780_v0, %v2170_v19  ;;  %vm2179_vm11 = vweird.f32 %v2780_v0 }
 0x371   :  { %v2183_v48 = vmul.f32 %v2782_v54, %v2171_v52  ;;  %vm2189_vm13 = vweird.f32 %v2782_v54  ;;  %vm2180_vm14 = vmor %vm2178_vm10, %vm2179_vm11  ;;  %vm2363_vm10 = vcmp.ge.f32.partialorder %v4730_v60, 0.0 }
 0x372   :  { %v2174_v20 = vmul.f32 %v2780_v0, %v2173_v5  ;;  %vm2190_vm15 = vmor %vm2188_vm12, %vm2189_vm13 }
 0x373   :  { %v2184_v26 = vmul.f32 %v2782_v54, %v2183_v48 }
 0x374   :  { %v2175_v7 = vmul.f32 0.5, %v2174_v20 }
 0x375   :  { %v2185_v34 = vmul.f32 0.5, %v2184_v26 }
 0x376   :  { %v2176_v17 = vsub.f32 1.5, %v2175_v7 }
 0x377   :  { %v2186_v61 = vsub.f32 1.5, %v2185_v34 }
 0x378   :  { %v2177_v46 = vmul.f32 %v2780_v0, %v2176_v17  ;;  %v2266_v17 = vsel %vm2264_vm0, 1.0, %v2866_v37 }
 0x379   :  { %v2187_v31 = vmul.f32 %v2782_v54, %v2186_v61  ;;  %v2267_v61 = vsel %vm2265_vm1, 1.0, %v2866_v37 }
 0x37a   :  { %v2181_v50 = vsel %vm2180_vm14, %v2780_v0, %v2177_v46 }
 0x37b   :  { %v2191_v63 = vsel %vm2190_vm15, %v2782_v54, %v2187_v31  ;;  %v2192_v15 = vmul.f32 %v2181_v50, %v2166_v3  ;;  %v2196_v55 = vmul.f32 %v4686_v4, %v2181_v50  ;;  %v2268_v50 = vand.u32 2147483647, %v4718_v39 }
 0x37c   :  { %v2193_v8 = vmul.f32 %v2191_v63, %v2167_v45  ;;  %v2197_v24 = vmul.f32 %v4688_v13, %v2191_v63  ;;  %v2236_v45 = vmul.f32 %v4718_v39, %v4718_v39  ;;  %v2269_v63 = vand.u32 2147483647, %v4722_v22 }
 0x37d   :  { %v4734_v29 = vmul.f32 0.0, %v2192_v15  ;;  %v4737_v10 = vmul.f32 %v2196_v55, %v4666_v35  ;;  %v2216_v30 = vmul.f32 0.0, %v2196_v55  ;;  %v2218_v1 = vmul.f32 %v2192_v15, %v4666_v35 }
 0x37e   :  { %v4740_v28 = vmul.f32 0.0, %v2193_v8  ;;  %v4743_v51 = vmul.f32 %v2197_v24, %v4668_v2  ;;  %v2217_v47 = vmul.f32 0.0, %v2197_v24  ;;  %v2219_v40 = vmul.f32 %v2193_v8, %v4668_v2 }
 0x37f   :  { %v2214_v4 = vsub.f32 %v4734_v29, %v4737_v10  ;;  %v2220_v13 = vadd.f32 %v2218_v1, %v2216_v30  ;;  %v2222_v16 = vmul.f32 %v2192_v15, %v4670_v23  ;;  %v2223_v57 = vmul.f32 %v2193_v8, %v4672_v12 }
 0x380   :  { %v2215_v21 = vsub.f32 %v4740_v28, %v4743_v51  ;;  %v2221_v35 = vadd.f32 %v2219_v40, %v2217_v47  ;;  %v2226_v56 = vmul.f32 %v2196_v55, %v4670_v23  ;;  %v2227_v18 = vmul.f32 %v2197_v24, %v4672_v12 }
 0x381   :  { %v2224_v38 = vsub.f32 %v2222_v16, %v2216_v30  ;;  %v2225_v58 = vsub.f32 %v2223_v57, %v2217_v47  ;;  %v4764_v59 = vadd.f32 %v2220_v13, %v2220_v13  ;;  %v2334_v12 = vmul.f32 %v4726_v42, %v4726_v42 }
 0x382   :  { %v4755_v2 = vadd.f32 %v2226_v56, %v4734_v29  ;;  %v4758_v3 = vadd.f32 %v2227_v18, %v4740_v28  ;;  %v4766_v23 = vadd.f32 %v2221_v35, %v2221_v35  ;;  %v2366_v15 = vand.u32 2147483647, %v4726_v42 }
 0x383   :  { %v2232_v44 = vadd.f32 %v2224_v38, %v2224_v38  ;;  %v2233_v43 = vadd.f32 %v2225_v58, %v2225_v58  ;;  %v4778_v52 = vmul.f32 %v4764_v59, %v4764_v59  ;;  %v2367_v30 = vand.u32 2147483647, %v4730_v60 }
 0x384   :  { %v4782_v0 = vmul.f32 %v4766_v23, %v4766_v23  ;;  %v2403_v42 = vadd.f32 %v4714_v41, %v4706_v49 }
 0x385   :  { %v4772_v36 = vmul.f32 %v2232_v44, %v2232_v44  ;;  %v4774_v19 = vmul.f32 %v2233_v43, %v2233_v43  ;;  %v4791_v48 = vadd.f32 %v2334_v12, %v4778_v52  ;;  %v4821_v58 = vmul.f32 %v2266_v17, %v2232_v44 }
 0x386   :  { %v4794_v20 = vadd.f32 %v2335_v27, %v4782_v0 }
 0x387   :  { %v4785_v54 = vadd.f32 %v2236_v45, %v4772_v36  ;;  %v4788_v5 = vadd.f32 %v2237_v32, %v4774_v19  ;;  %vm2345_vm6 = vcmp.eq.f32.partialorder %v4791_v48, inf  ;;  %vm2347_vm7 = vcmp.eq.f32.partialorder %v4791_v48, 0.0 }
 0x388   :  { %v2348_v18 = vand.u32 2147483648, %v4791_v48  ;;  %v4823_v45 = vmul.f32 %v2267_v61, %v2233_v43  ;;  %vm2357_vm8 = vcmp.eq.f32.partialorder %v4794_v20, inf  ;;  %vm2359_vm11 = vcmp.eq.f32.partialorder %v4794_v20, 0.0 }
 0x389   :  { %2783 = vrsqrt.f32 %v4785_v54  ;;  %vm2247_vm2 = vcmp.eq.f32.partialorder %v4785_v54, inf  ;;  %vm2249_vm3 = vcmp.eq.f32.partialorder %v4785_v54, 0.0  ;;  %v2250_v1 = vand.u32 2147483648, %v4785_v54 }
 0x38a   :  { %2785 = vrsqrt.f32 %v4788_v5  ;;  %vm2259_vm4 = vcmp.eq.f32.partialorder %v4788_v5, inf  ;;  %vm2261_vm5 = vcmp.eq.f32.partialorder %v4788_v5, 0.0  ;;  %v2262_v16 = vand.u32 2147483648, %v4788_v5 }
 0x38b   :  { %2787 = vrsqrt.f32 %v4791_v48 }
 0x38c   :  { %2789 = vrsqrt.f32 %v4794_v20 }
 0x38f   :  { %v2784_v26 = vpop.eup %2783 }
 0x390   :  { %v2786_v7 = vpop.eup %2785  ;;  %v2241_v34 = vmul.f32 %v2784_v26, %v4785_v54 }
 0x391   :  { %v2788_v46 = vpop.eup %2787  ;;  %v2253_v31 = vmul.f32 %v2786_v7, %v4788_v5 }
 0x392   :  { %v2790_v55 = vpop.eup %2789  ;;  %v2242_v8 = vmul.f32 %v2784_v26, %v2241_v34  ;;  %v2339_v24 = vmul.f32 %v2788_v46, %v4791_v48  ;;  %v2360_v34 = vand.u32 2147483648, %v4794_v20 }
 0x393   :  { %v2254_v47 = vmul.f32 %v2786_v7, %v2253_v31  ;;  %v2351_v40 = vmul.f32 %v2790_v55, %v4794_v20 }
 0x394   :  { %v2243_v39 = vmul.f32 0.5, %v2242_v8  ;;  %v2340_v22 = vmul.f32 %v2788_v46, %v2339_v24  ;;  %v4829_v8 = vadd.f32 %v4708_v33, %v4697_v11  ;;  %v4833_v24 = vadd.f32 %v4712_v9, %v4700_v53 }
 0x395   :  { %v2255_v13 = vmul.f32 0.5, %v2254_v47  ;;  %v2352_v57 = vmul.f32 %v2790_v55, %v2351_v40  ;;  %v2365_v11 = vsel %vm2363_vm10, 1.0, %v2866_v37 }
 0x396   :  { %v2244_v35 = vsub.f32 1.5, %v2243_v39  ;;  %v2341_v56 = vmul.f32 0.5, %v2340_v22 }
 0x397   :  { %v2256_v38 = vsub.f32 1.5, %v2255_v13  ;;  %v2353_v32 = vmul.f32 0.5, %v2352_v57 }
 0x398   :  { %v2245_v12 = vmul.f32 %v2784_v26, %v2244_v35  ;;  %v2342_v27 = vsub.f32 1.5, %v2341_v56 }
 0x399   :  { %v2257_v31 = vmul.f32 %v2786_v7, %v2256_v38  ;;  %v2354_v44 = vsub.f32 1.5, %v2353_v32  ;;  %v2364_v7 = vsel %vm2362_vm9, 1.0, %v2866_v37 }
 0x39a   :  { %v2246_v43 = vmul.f32 %v2245_v12, %v4785_v54  ;;  %v2343_v47 = vmul.f32 %v2788_v46, %v2342_v27  ;;  %v4846_v9 = vmul.f32 %v2364_v7, %v4764_v59  ;;  %v4849_v46 = vmul.f32 %v2365_v11, %v4766_v23 }
 0x39b   :  { %v2258_v26 = vmul.f32 %v2257_v31, %v4788_v5  ;;  %v2355_v40 = vmul.f32 %v2790_v55, %v2354_v44 }
 0x39c   :  { %v2248_v53 = vsel %vm2247_vm2, %v4785_v54, %v2246_v43  ;;  %v2344_v33 = vmul.f32 %v2343_v47, %v4791_v48 }
 0x39d   :  { %v2251_v60 = vsel %vm2249_vm3, %v2250_v1, %v2248_v53  ;;  %v2260_v55 = vsel %vm2259_vm4, %v4788_v5, %v2258_v26  ;;  %v2356_v39 = vmul.f32 %v2355_v40, %v4794_v20 }
 0x39e   :  { %v2263_v22 = vsel %vm2261_vm5, %v2262_v16, %v2260_v55  ;;  %v2270_v13 = vadd.f32 %v2268_v50, %v2251_v60  ;;  %v4860_v59 = vmul.f32 %v2266_v17, %v2251_v60  ;;  %v2346_v23 = vsel %vm2345_vm6, %v4791_v48, %v2344_v33 }
 0x39f   :  { %v2271_v54 = vadd.f32 %v2269_v63, %v2263_v22  ;;  %v4865_v1 = vmul.f32 %v2267_v61, %v2263_v22  ;;  %v2349_v57 = vsel %vm2347_vm7, %v2348_v18, %v2346_v23  ;;  %v2358_v35 = vsel %vm2357_vm8, %v4794_v20, %v2356_v39 }
 0x3a0   :  { %v4872_v56 = vadd.f32 1e-18, %v2270_v13  ;;  %v2308_v5 = vsub.f32 %v4829_v8, %v4860_v59  ;;  %v2312_v17 = vadd.f32 %v4860_v59, %v4829_v8  ;;  %v2361_v50 = vsel %vm2359_vm11, %v2360_v34, %v2358_v35 }
 0x3a1   :  { %v4878_v16 = vadd.f32 1e-18, %v2271_v54  ;;  %v2309_v61 = vsub.f32 %v4833_v24, %v4865_v1  ;;  %v2313_v48 = vadd.f32 %v4865_v1, %v4833_v24  ;;  %v2368_v20 = vadd.f32 %v2366_v15, %v2349_v57 }
 0x3a2   :  { %v2274_v63 = vmul.f32 %v4872_v56, %v4872_v56  ;;  %v2369_v18 = vadd.f32 %v2367_v30, %v2361_v50  ;;  %v2402_v34 = vadd.f32 %v4710_v62, %v4703_v6  ;;  %v2404_v31 = vmul.f32 %v2364_v7, %v2349_v57 }
 0x3a3   :  { %v2275_v38 = vmul.f32 %v4878_v16, %v4878_v16  ;;  %v4890_v32 = vadd.f32 1e-18, %v2368_v20  ;;  %v2405_v44 = vmul.f32 %v2365_v11, %v2361_v50  ;;  %v4902_v43 = vmul.f32 0.5, %v2312_v17 }
 0x3a4   :  { %v2276_v12 = vadd.f32 %v2274_v63, %v4772_v36  ;;  %v4893_v27 = vadd.f32 1e-18, %v2369_v18  ;;  %v4906_v47 = vmul.f32 0.5, %v2313_v48  ;;  %v2406_v62 = vsub.f32 %v2402_v34, %v2404_v31 }
 0x3a5   :  { %v2277_v15 = vadd.f32 %v2275_v38, %v4774_v19  ;;  %v2372_v30 = vmul.f32 %v4890_v32, %v4890_v32  ;;  %v2407_v41 = vsub.f32 %v2403_v42, %v2405_v44  ;;  %v4910_v19 = vadd.f32 %v2404_v31, %v2402_v34 }
 0x3a6   :  { %2791 = vrsqrt.f32 %v2276_v12  ;;  %v2373_v36 = vmul.f32 %v4893_v27, %v4893_v27  ;;  %v4912_v26 = vadd.f32 %v2405_v44, %v2403_v42  ;;  %v4914_v40 = vmul.f32 0.5, %v2406_v62 }
 0x3a7   :  { %2793 = vrsqrt.f32 %v2277_v15  ;;  %v2374_v6 = vadd.f32 %v2372_v30, %v4778_v52  ;;  %v4916_v7 = vmul.f32 0.5, %v2407_v41  ;;  %vm2284_vm12 = vweird.f32 %v2276_v12 }
 0x3a8   :  { %v2375_v49 = vadd.f32 %v2373_v36, %v4782_v0  ;;  %v4920_v11 = vsub.f32 %v4902_v43, %v4914_v40  ;;  %vm2294_vm14 = vweird.f32 %v2277_v15 }
 0x3a9   :  { %2795 = vrsqrt.f32 %v2374_v6  ;;  %v4924_v52 = vsub.f32 %v4906_v47, %v4916_v7  ;;  %vm2382_vm2 = vweird.f32 %v2374_v6 }
 0x3aa   :  { %2797 = vrsqrt.f32 %v2375_v49  ;;  %vm2392_vm4 = vweird.f32 %v2375_v49  ;;  %vm2460_vm8 = vcmp.ge.f32.partialorder %v4920_v11, 0.0 }
 0x3ab   :  { %vm2461_vm9 = vcmp.ge.f32.partialorder %v4924_v52, 0.0 }
 0x3ac   :  { %v2792_v53 = vpop.eup %2791 }
 0x3ad   :  { %v2794_v0 = vpop.eup %2793  ;;  %v2279_v33 = vmul.f32 %v2792_v53, %v2276_v12  ;;  %vm2285_vm13 = vweird.f32 %v2792_v53 }
 0x3ae   :  { %v2289_v60 = vmul.f32 %v2794_v0, %v2277_v15  ;;  %vm2295_vm15 = vweird.f32 %v2794_v0  ;;  %vm2286_vm0 = vmor %vm2284_vm12, %vm2285_vm13 }
 0x3af   :  { %v2796_v55 = vpop.eup %2795  ;;  %v2280_v39 = vmul.f32 %v2792_v53, %v2279_v33  ;;  %vm2296_vm1 = vmor %vm2294_vm14, %vm2295_vm15 }
 0x3b0   :  { %v2798_v22 = vpop.eup %2797  ;;  %v2290_v13 = vmul.f32 %v2794_v0, %v2289_v60  ;;  %v2377_v23 = vmul.f32 %v2796_v55, %v2374_v6  ;;  %vm2383_vm3 = vweird.f32 %v2796_v55 }
 0x3b1   :  { %v2281_v54 = vmul.f32 0.5, %v2280_v39  ;;  %v2387_v57 = vmul.f32 %v2798_v22, %v2375_v49  ;;  %vm2393_vm5 = vweird.f32 %v2798_v22  ;;  %vm2384_vm6 = vmor %vm2382_vm2, %vm2383_vm3 }
 0x3b2   :  { %v2291_v35 = vmul.f32 0.5, %v2290_v13  ;;  %v2378_v17 = vmul.f32 %v2796_v55, %v2377_v23  ;;  %vm2394_vm7 = vmor %vm2392_vm4, %vm2393_vm5 }
 0x3b3   :  { %v2282_v50 = vsub.f32 1.5, %v2281_v54  ;;  %v2388_v48 = vmul.f32 %v2798_v22, %v2387_v57 }
 0x3b4   :  { %v2292_v20 = vsub.f32 1.5, %v2291_v35  ;;  %v2379_v63 = vmul.f32 0.5, %v2378_v17 }
 0x3b5   :  { %v2283_v18 = vmul.f32 %v2792_v53, %v2282_v50  ;;  %v2389_v38 = vmul.f32 0.5, %v2388_v48 }
 0x3b6   :  { %v2293_v34 = vmul.f32 %v2794_v0, %v2292_v20  ;;  %v2380_v42 = vsub.f32 1.5, %v2379_v63 }
 0x3b7   :  { %v2287_v12 = vsel %vm2286_vm0, %v2792_v53, %v2283_v18  ;;  %v2390_v30 = vsub.f32 1.5, %v2389_v38 }
 0x3b8   :  { %v2297_v31 = vsel %vm2296_vm1, %v2794_v0, %v2293_v34  ;;  %v2298_v15 = vmul.f32 %v2287_v12, %v4872_v56  ;;  %v2302_v44 = vmul.f32 %v4821_v58, %v2287_v12  ;;  %v2381_v36 = vmul.f32 %v2796_v55, %v2380_v42 }
 0x3b9   :  { %v2299_v62 = vmul.f32 %v2297_v31, %v4878_v16  ;;  %v2303_v41 = vmul.f32 %v4823_v45, %v2297_v31  ;;  %v2391_v6 = vmul.f32 %v2798_v22, %v2390_v30 }
 0x3ba   :  { %v2316_v49 = vmul.f32 %v2302_v44, %v2214_v4  ;;  %v2318_v53 = vmul.f32 %v2298_v15, %v4678_v14  ;;  %v2322_v33 = vmul.f32 0.0, %v2302_v44  ;;  %v2324_v0 = vmul.f32 %v2298_v15, %v4755_v2 }
 0x3bb   :  { %v2317_v58 = vmul.f32 %v2303_v41, %v2215_v21  ;;  %v2319_v56 = vmul.f32 %v2299_v62, %v4680_v25  ;;  %v2323_v16 = vmul.f32 0.0, %v2303_v41  ;;  %v2325_v45 = vmul.f32 %v2299_v62, %v4758_v3 }
 0x3bc   :  { %v2320_v60 = vadd.f32 %v2318_v53, %v2316_v49  ;;  %v2326_v39 = vadd.f32 %v2324_v0, %v2322_v33  ;;  %v2385_v13 = vsel %vm2384_vm6, %v2796_v55, %v2381_v36  ;;  %v2395_v23 = vsel %vm2394_vm7, %v2798_v22, %v2391_v6 }
 0x3bd   :  { %v2321_v29 = vadd.f32 %v2319_v56, %v2317_v58  ;;  %v2327_v10 = vadd.f32 %v2325_v45, %v2323_v16  ;;  %v2396_v14 = vmul.f32 %v2385_v13, %v4890_v32  ;;  %v2397_v4 = vmul.f32 %v2395_v23, %v4893_v27 }
 0x3be   :  { %v2400_v2 = vmul.f32 %v4846_v9, %v2385_v13  ;;  %v2401_v28 = vmul.f32 %v4849_v46, %v2395_v23  ;;  %v2432_v9 = vmul.f32 %v4920_v11, %v4920_v11  ;;  %v2433_v46 = vmul.f32 %v4924_v52, %v4924_v52 }
 0x3bf   :  { %v2414_v51 = vmul.f32 %v2396_v14, %v2320_v60  ;;  %v2415_v21 = vmul.f32 %v2397_v4, %v2321_v29  ;;  %v2422_v25 = vmul.f32 %v2396_v14, %v2326_v39  ;;  %v2423_v54 = vmul.f32 %v2397_v4, %v2327_v10 }
 0x3c0   :  { %v2416_v57 = vmul.f32 %v2400_v2, %v2326_v39  ;;  %v2417_v3 = vmul.f32 %v2401_v28, %v2327_v10  ;;  %v2420_v35 = vmul.f32 %v2400_v2, %v2320_v60  ;;  %v2421_v17 = vmul.f32 %v2401_v28, %v2321_v29 }
 0x3c1   :  { %v2462_v36 = vsel %vm2460_vm8, 1.0, %v2866_v37  ;;  %v2463_v62 = vsel %vm2461_vm9, 1.0, %v2866_v37  ;;  %v2464_v58 = vand.u32 2147483647, %v4920_v11  ;;  %v2500_v45 = vadd.f32 %v4914_v40, %v4902_v43 }
 0x3c2   :  { %v2418_v55 = vsub.f32 %v2414_v51, %v2416_v57  ;;  %v2419_v22 = vsub.f32 %v2415_v21, %v2417_v3  ;;  %v4944_v50 = vadd.f32 %v2422_v25, %v2420_v35  ;;  %v4946_v48 = vadd.f32 %v2423_v54, %v2421_v17 }
 0x3c3   :  { %v2501_v60 = vadd.f32 %v4916_v7, %v4906_v47  ;;  %v2465_v29 = vand.u32 2147483647, %v4924_v52  ;;  %v2412_v43 = vmul.f32 0.5, %v4910_v19  ;;  %v2413_v25 = vmul.f32 0.5, %v4912_v26 }
 0x3c4   :  { %v2428_v32 = vadd.f32 %v2418_v55, %v2418_v55  ;;  %v2429_v27 = vadd.f32 %v2419_v22, %v2419_v22 }
 0x3c6   :  { %v2430_v20 = vmul.f32 %v2428_v32, %v2428_v32  ;;  %v2431_v63 = vmul.f32 %v2429_v27, %v2429_v27  ;;  %v4956_v53 = vmul.f32 %v2462_v36, %v2428_v32  ;;  %v4958_v33 = vmul.f32 %v2463_v62, %v2429_v27 }
 0x3c8   :  { %v2434_v18 = vadd.f32 %v2432_v9, %v2430_v20  ;;  %v2435_v38 = vadd.f32 %v2433_v46, %v2431_v63 }
 0x3ca   :  { %2799 = vrsqrt.f32 %v2434_v18  ;;  %vm2443_vm10 = vcmp.eq.f32.partialorder %v2434_v18, inf  ;;  %v2446_v56 = vand.u32 2147483648, %v2434_v18  ;;  %vm2445_vm11 = vcmp.eq.f32.partialorder %v2434_v18, 0.0 }
 0x3cb   :  { %2801 = vrsqrt.f32 %v2435_v38  ;;  %vm2455_vm12 = vcmp.eq.f32.partialorder %v2435_v38, inf  ;;  %v2458_v13 = vand.u32 2147483648, %v2435_v38  ;;  %vm2457_vm13 = vcmp.eq.f32.partialorder %v2435_v38, 0.0 }
 0x3d0   :  { %v2800_v34 = vpop.eup %2799 }
 0x3d1   :  { %v2802_v42 = vpop.eup %2801  ;;  %v2437_v12 = vmul.f32 %v2800_v34, %v2434_v18 }
 0x3d2   :  { %v2449_v30 = vmul.f32 %v2802_v42, %v2435_v38 }
 0x3d3   :  { %v2438_v31 = vmul.f32 %v2800_v34, %v2437_v12 }
 0x3d4   :  { %v2450_v15 = vmul.f32 %v2802_v42, %v2449_v30 }
 0x3d5   :  { %v2439_v44 = vmul.f32 0.5, %v2438_v31 }
 0x3d6   :  { %v2451_v41 = vmul.f32 0.5, %v2450_v15 }
 0x3d7   :  { %v2440_v6 = vsub.f32 1.5, %v2439_v44  ;;  %v2310_v44 = vmul.f32 0.5, %v2308_v5 }
 0x3d8   :  { %v2452_v49 = vsub.f32 1.5, %v2451_v41 }
 0x3d9   :  { %v2441_v0 = vmul.f32 %v2800_v34, %v2440_v6  ;;  %v2311_v6 = vmul.f32 0.5, %v2309_v61 }
 0x3da   :  { %v2453_v16 = vmul.f32 %v2802_v42, %v2452_v49 }
 0x3db   :  { %v2442_v39 = vmul.f32 %v2441_v0, %v2434_v18 }
 0x3dc   :  { %v2454_v23 = vmul.f32 %v2453_v16, %v2435_v38 }
 0x3dd   :  { %v2444_v10 = vsel %vm2443_vm10, %v2434_v18, %v2442_v39 }
 0x3de   :  { %v2447_v14 = vsel %vm2445_vm11, %v2446_v56, %v2444_v10  ;;  %v2456_v4 = vsel %vm2455_vm12, %v2435_v38, %v2454_v23 }
 0x3df   :  { %v2459_v11 = vsel %vm2457_vm13, %v2458_v13, %v2456_v4  ;;  %v2466_v2 = vadd.f32 %v2464_v58, %v2447_v14  ;;  %v2502_v28 = vmul.f32 %v2462_v36, %v2447_v14 }
 0x3e0   :  { %v2467_v51 = vadd.f32 %v2465_v29, %v2459_v11  ;;  %v2503_v21 = vmul.f32 %v2463_v62, %v2459_v11 }
 0x3e1   :  { %v2468_v40 = vadd.f32 1e-18, %v2466_v2  ;;  %v2504_v47 = vsub.f32 %v2500_v45, %v2502_v28  ;;  %v2508_v7 = vadd.f32 %v2502_v28, %v2500_v45 }
 0x3e2   :  { %v2469_v54 = vadd.f32 1e-18, %v2467_v51  ;;  %v2505_v57 = vsub.f32 %v2501_v60, %v2503_v21  ;;  %v2509_v3 = vadd.f32 %v2503_v21, %v2501_v60 }
 0x3e3   :  { %v2470_v35 = vmul.f32 %v2468_v40, %v2468_v40  ;;  %v2510_v52 = vmul.f32 0.5, %v2508_v7  ;;  %v2506_v58 = vmul.f32 0.5, %v2504_v47 }
 0x3e4   :  { %v2471_v17 = vmul.f32 %v2469_v54, %v2469_v54  ;;  %v2511_v55 = vmul.f32 0.5, %v2509_v3  ;;  %v2507_v56 = vmul.f32 0.5, %v2505_v57 }
 0x3e5   :  { %v2472_v22 = vadd.f32 %v2470_v35, %v2430_v20  ;;  %v4968_v32 = vsub.f32 %v2510_v52, %v2412_v43  ;;  %v2556_v60 = vadd.f32 %v2510_v52, %v2412_v43  ;;  %v4984_v1 = vmin.f32 %v2310_v44, %v2506_v58 }
 0x3e6   :  { %v2473_v27 = vadd.f32 %v2471_v17, %v2431_v63  ;;  %v4970_v9 = vsub.f32 %v2511_v55, %v2413_v25  ;;  %v2557_v59 = vadd.f32 %v2511_v55, %v2413_v25  ;;  %v4986_v61 = vmin.f32 %v2311_v6, %v2507_v56 }
 0x3e7   :  { %2803 = vrsqrt.f32 %v2472_v22  ;;  %vm2480_vm14 = vweird.f32 %v2472_v22  ;;  %v4992_v29 = vmax.f32 %v2311_v6, %v2507_v56  ;;  %vm2552_vm4 = vcmp.ge.f32.partialorder %v4968_v32, 0.0 }
 0x3e8   :  { %2805 = vrsqrt.f32 %v2473_v27  ;;  %vm2490_vm0 = vweird.f32 %v2473_v27  ;;  %vm2553_vm6 = vcmp.ge.f32.partialorder %v4970_v9, 0.0  ;;  %v2554_v55 = vsel %vm2552_vm4, 1.0, %v2866_v37 }
 0x3ed   :  { %v2804_v19 = vpop.eup %2803 }
 0x3ee   :  { %v2806_v46 = vpop.eup %2805  ;;  %v2475_v18 = vmul.f32 %v2804_v19, %v2472_v22  ;;  %vm2481_vm15 = vweird.f32 %v2804_v19 }
 0x3ef   :  { %v2485_v38 = vmul.f32 %v2806_v46, %v2473_v27  ;;  %vm2491_vm1 = vweird.f32 %v2806_v46  ;;  %vm2482_vm2 = vmor %vm2480_vm14, %vm2481_vm15  ;;  %v2555_v27 = vsel %vm2553_vm6, 1.0, %v2866_v37 }
 0x3f0   :  { %v2476_v26 = vmul.f32 %v2804_v19, %v2475_v18  ;;  %vm2492_vm3 = vmor %vm2490_vm0, %vm2491_vm1 }
 0x3f1   :  { %v2486_v34 = vmul.f32 %v2806_v46, %v2485_v38 }
 0x3f2   :  { %v2477_v42 = vmul.f32 0.5, %v2476_v26 }
 0x3f3   :  { %v2487_v12 = vmul.f32 0.5, %v2486_v34 }
 0x3f4   :  { %v2478_v20 = vsub.f32 1.5, %v2477_v42 }
 0x3f5   :  { %v2488_v30 = vsub.f32 1.5, %v2487_v12 }
 0x3f6   :  { %v2479_v63 = vmul.f32 %v2804_v19, %v2478_v20 }
 0x3f7   :  { %v2489_v31 = vmul.f32 %v2806_v46, %v2488_v30 }
 0x3f8   :  { %v2483_v15 = vsel %vm2482_vm2, %v2804_v19, %v2479_v63 }
 0x3f9   :  { %v2493_v36 = vsel %vm2492_vm3, %v2806_v46, %v2489_v31  ;;  %v2494_v62 = vmul.f32 %v2483_v15, %v2468_v40  ;;  %v2498_v41 = vmul.f32 %v4956_v53, %v2483_v15  ;;  %v2524_v53 = vmul.f32 %v4968_v32, %v4968_v32 }
 0x3fa   :  { %v2495_v49 = vmul.f32 %v2493_v36, %v2469_v54  ;;  %v2499_v0 = vmul.f32 %v4958_v33, %v2493_v36  ;;  %v4988_v33 = vmax.f32 %v2310_v44, %v2506_v58 }
 0x3fb   :  { %v2512_v16 = vmul.f32 0.0, %v2498_v41  ;;  %v2514_v45 = vmul.f32 %v2494_v62, %v4944_v50  ;;  %v2525_v50 = vmul.f32 %v4970_v9, %v4970_v9 }
 0x3fc   :  { %v2513_v39 = vmul.f32 0.0, %v2499_v0  ;;  %v2515_v8 = vmul.f32 %v2495_v49, %v4946_v48 }
 0x3fd   :  { %v2516_v5 = vadd.f32 %v2514_v45, %v2512_v16 }
 0x3fe   :  { %v2517_v13 = vadd.f32 %v2515_v8, %v2513_v39 }
 0x3ff   :  { %v2520_v24 = vadd.f32 %v2516_v5, %v2516_v5 }
 0x400   :  { %v2521_v23 = vadd.f32 %v2517_v13, %v2517_v13 }
 0x401   :  { %v2522_v48 = vmul.f32 %v2520_v24, %v2520_v24 }
 0x402   :  { %v2523_v10 = vmul.f32 %v2521_v23, %v2521_v23 }
 0x403   :  { %v2526_v14 = vadd.f32 %v2524_v53, %v2522_v48 }
 0x404   :  { %v2527_v4 = vadd.f32 %v2525_v50, %v2523_v10 }
 0x405   :  { %2807 = vrsqrt.f32 %v2526_v14  ;;  %vm2535_vm5 = vcmp.eq.f32.partialorder %v2526_v14, inf  ;;  %v2538_v57 = vand.u32 2147483648, %v2526_v14  ;;  %vm2537_vm7 = vcmp.eq.f32.partialorder %v2526_v14, 0.0 }
 0x406   :  { %2809 = vrsqrt.f32 %v2527_v4  ;;  %vm2547_vm8 = vcmp.eq.f32.partialorder %v2527_v4, inf  ;;  %v2550_v52 = vand.u32 2147483648, %v2527_v4  ;;  %vm2549_vm9 = vcmp.eq.f32.partialorder %v2527_v4, 0.0 }
 0x40b   :  { %v2808_v11 = vpop.eup %2807 }
 0x40c   :  { %v2810_v2 = vpop.eup %2809  ;;  %v2529_v28 = vmul.f32 %v2808_v11, %v2526_v14 }
 0x40d   :  { %v2541_v51 = vmul.f32 %v2810_v2, %v2527_v4 }
 0x40e   :  { %v2530_v21 = vmul.f32 %v2808_v11, %v2529_v28 }
 0x40f   :  { %v2542_v43 = vmul.f32 %v2810_v2, %v2541_v51 }
 0x410   :  { %v2531_v40 = vmul.f32 0.5, %v2530_v21 }
 0x411   :  { %v2543_v47 = vmul.f32 0.5, %v2542_v43 }
 0x412   :  { %v2532_v7 = vsub.f32 1.5, %v2531_v40 }
 0x413   :  { %v2544_v25 = vsub.f32 1.5, %v2543_v47 }
 0x414   :  { %v2533_v54 = vmul.f32 %v2808_v11, %v2532_v7 }
 0x415   :  { %v2545_v3 = vmul.f32 %v2810_v2, %v2544_v25 }
 0x416   :  { %v2534_v35 = vmul.f32 %v2533_v54, %v2526_v14 }
 0x417   :  { %v2546_v17 = vmul.f32 %v2545_v3, %v2527_v4 }
 0x418   :  { %v2536_v22 = vsel %vm2535_vm5, %v2526_v14, %v2534_v35 }
 0x419   :  { %v2539_v19 = vsel %vm2537_vm7, %v2538_v57, %v2536_v22  ;;  %v2548_v46 = vsel %vm2547_vm8, %v2527_v4, %v2546_v17 }
 0x41a   :  { %v2551_v18 = vsel %vm2549_vm9, %v2550_v52, %v2548_v46  ;;  %v2558_v32 = vmul.f32 %v2554_v55, %v2539_v19 }
 0x41b   :  { %v2559_v38 = vmul.f32 %v2555_v27, %v2551_v18 }
 0x41c   :  { %v2560_v26 = vsub.f32 %v2556_v60, %v2558_v32  ;;  %v2564_v34 = vadd.f32 %v2558_v32, %v2556_v60 }
 0x41d   :  { %v2561_v42 = vsub.f32 %v2557_v59, %v2559_v38  ;;  %v2565_v9 = vadd.f32 %v2559_v38, %v2557_v59 }
 0x41e   :  { %v2562_v12 = vmul.f32 0.5, %v2560_v26  ;;  %v2566_v20 = vmul.f32 0.5, %v2564_v34 }
 0x41f   :  { %v2563_v30 = vmul.f32 0.5, %v2561_v42  ;;  %v2567_v63 = vmul.f32 0.5, %v2565_v9 }
 0x420   :  { %v2572_v31 = vmin.f32 %v2562_v12, %v2566_v20  ;;  %v2574_v15 = vmax.f32 %v2562_v12, %v2566_v20 }
 0x421   :  { %v2573_v44 = vmin.f32 %v2563_v30, %v2567_v63  ;;  %v2575_v36 = vmax.f32 %v2563_v30, %v2567_v63 }
 0x422   :  { %v2576_v62 = vmin.f32 %v4984_v1, %v2572_v31  ;;  %v2578_v37 = vmax.f32 %v4984_v1, %v2572_v31  ;;  %v2580_v41 = vmin.f32 %v4988_v33, %v2574_v15  ;;  %v2582_v6 = vmax.f32 %v4988_v33, %v2574_v15 }
 0x423   :  { %v2577_v49 = vmin.f32 %v4986_v61, %v2573_v44  ;;  %v2579_v0 = vmax.f32 %v4986_v61, %v2573_v44  ;;  %v2581_v58 = vmin.f32 %v4992_v29, %v2575_v36  ;;  %v2583_v56 = vmax.f32 %v4992_v29, %v2575_v36 }
 0x424   :  { %v2584_v16 = vmin.f32 %v2580_v41, %v2578_v37  ;;  %v2586_v45 = vmax.f32 %v2580_v41, %v2578_v37  ;;  %2588 = vst [vmem:[#allocation5] sm:$0xff] %v2576_v62 }
 0x425   :  { %v2585_v60 = vmin.f32 %v2581_v58, %v2579_v0  ;;  %v2587_v39 = vmax.f32 %v2581_v58, %v2579_v0  ;;  %2589 = vst [vmem:[#allocation5 + $0x8] sm:$0xff] %v2577_v49 }
 0x426   :  { %2591 = vst [vmem:[#allocation5 + $0x10] sm:$0xff] %v2584_v16 }
 0x427   :  { %2592 = vst [vmem:[#allocation5 + $0x18] sm:$0xff] %v2585_v60 }
 0x428   :  { %2594 = vst [vmem:[#allocation5 + $0x20] sm:$0xff] %v2586_v45 }
 0x429   :  { %2595 = vst [vmem:[#allocation5 + $0x28] sm:$0xff] %v2587_v39 }
 0x42a   :  { %2597 = vst [vmem:[#allocation5 + $0x30] sm:$0xff] %v2582_v6 }
 0x42b   :  { %2598 = vst [vmem:[#allocation5 + $0x38] sm:$0xff] %v2583_v56 }
 0x42c   :  { %2611 = dma.vmem_to_hbm [thread:$0]  %s2604_s13, 1024, %s2606_s16, [#allocation4], %s2864_s11, %s2864_s11, %s2865_s12  }
 0x42d   :  { %2861 = dma.done.wait [#allocation4], 1024  }
 0x42e   :  { %2862 = vsyncadd [#allocation4], 4294966272 }
 0x42f   :  { %2616 = vsyncpa [#allocation3], 1 }
 0x430   :  { %2617 = vsyncpa [#allocation4], 1 }

</bundles_post_ra>
